<compile_context>
chip_gen: v7x
topology: tpu7x:2x2x1
jax: 0.10.0
libtpu: 0.0.40
codegen_flags: <defaults>
</compile_context>

<pallas_src>
import functools

import jax
import jax.numpy as jnp
from jax.experimental import pallas as pl
from jax.experimental.pallas import tpu as pltpu

LN_EPS = 1e-5  # nn.LayerNorm default


def _round_up(x, m):
    return ((x + m - 1) // m) * m


def _vmem_capacity_bytes():
    try:
        return int(pltpu.get_tpu_info().vmem_capacity_bytes)
    except Exception:
        return 64 * 1024 * 1024  # conservative default (v7x per-TC VMEM)


def _epilogue(h, b_ref, gamma_ref, beta_ref, o_ref):
    """bias + (eval-mode dropout = identity) + tanh + LayerNorm, all in f32."""
    h = h + b_ref[...].astype(jnp.float32)           # (1, D) row broadcast (VPU)
    # Dropout: identity in eval/inference mode.
    # TODO(synk): training-mode dropout (stochastic masking) not implemented.
    h = jnp.tanh(h)                                   # EUP
    # One-pass LN statistics; safe only AFTER tanh (values bounded in [-1, 1]).
    d_inv = jnp.float32(1.0 / h.shape[-1])
    s1 = jnp.sum(h, axis=-1, keepdims=True)           # XLU
    s2 = jnp.sum(h * h, axis=-1, keepdims=True)
    mean = s1 * d_inv
    var = s2 * d_inv - mean * mean                    # biased variance, as in PyTorch LN
    inv = jax.lax.rsqrt(var + jnp.float32(LN_EPS))    # EUP
    out = (h - mean) * inv * gamma_ref[...].astype(jnp.float32) \
          + beta_ref[...].astype(jnp.float32)
    o_ref[...] = out.astype(o_ref.dtype)


def dnn_kernel(x_ref, w_ref, b_ref, gamma_ref, beta_ref, o_ref, *scratch, nk):
    if nk == 1:
        # Full-K path: weight is VMEM-resident; single MXU matmul + fused epilogue.
        # Native-dtype operands, f32 accumulation (no pre-upcast).
        h = jnp.dot(x_ref[...], w_ref[...], preferred_element_type=jnp.float32)
        _epilogue(h, b_ref, gamma_ref, beta_ref, o_ref)
    else:
        # K-tiled path: accumulate in f32 scratch; epilogue only on the last K step.
        (acc_ref,) = scratch
        k = pl.program_id(1)

        @pl.when(k == 0)
        def _():
            acc_ref[...] = jnp.zeros_like(acc_ref)

        acc_ref[...] += jnp.dot(x_ref[...], w_ref[...],
                                preferred_element_type=jnp.float32)

        @pl.when(k == nk - 1)
        def _():
            _epilogue(acc_ref[...], b_ref, gamma_ref, beta_ref, o_ref)


def dnn_forward(x, w_t, b, gamma, beta, *, max_tile_m=1024):
    """x: (N, K); w_t: (K, D) pre-transposed Linear weight; b/gamma/beta: (D,)."""
    N, K = x.shape
    Kw, D = w_t.shape
    assert K == Kw, "weight must be pre-transposed to (input_size, output_size)"
    # NOTE: D is never tiled (LayerNorm reduces over the whole feature dim).  For best
    # store bandwidth D should be a multiple of 128 (lane-dense, unmasked vst).

    act_b = jnp.dtype(x.dtype).itemsize
    w_b = jnp.dtype(w_t.dtype).itemsize

    cap = _vmem_capacity_bytes()
    budget = int(cap * 0.80)  # leave compiler / internal-scratch headroom

    def plan_bytes(tm, tk, n_k, single_w):
        x_buf = 2 * tm * tk * act_b                    # double-buffered activation tile
        w_buf = (1 if single_w else 2) * tk * D * w_b  # weight tile(s)
        o_buf = 2 * tm * D * act_b                     # double-buffered output tile
        acc = tm * D * 4 if n_k > 1 else 0             # f32 accumulator scratch
        params = 3 * 8 * max(D, 128) * 4               # (1, D) params, sublane-padded
        return x_buf + w_buf + o_buf + acc + params

    # ---- tile plan ------------------------------------------------------------------
    # Prefer full-K (weight resident + single-buffered); pick the largest row tile that
    # fits the generation-aware budget.  Fall back to K-tiling for very large K*D.
    tile_m_cap = max(8, _round_up(N, 8))
    tile_m, tile_k, nk = None, K, 1
    for cand in (1024, 512, 256, 128, 64, 32, 16, 8):
        tm = min(cand, max_tile_m, tile_m_cap)
        if plan_bytes(tm, K, 1, True) <= budget:
            tile_m = tm
            break
    if tile_m is None:
        # Weight too large to keep resident: K-tiled accumulation (large-K v7x case).
        tile_m = min(max_tile_m, 256, tile_m_cap)
        for tk in (2048, 1024, 512, 256, 128):
            if K % tk == 0 and plan_bytes(tile_m, tk, K // tk, False) <= budget:
                tile_k, nk = tk, K // tk
                break

    need = plan_bytes(tile_m, tile_k, nk, nk == 1)
    vmem_limit = int(min(max(need + (4 << 20), 32 << 20), int(cap * 0.90)))

    nm = pl.cdiv(N, tile_m)

    # 1-D params as (1, D) tiles; constant index_map -> loaded once, stays resident.
    b2 = b.reshape(1, D)
    g2 = gamma.reshape(1, D)
    be2 = beta.reshape(1, D)

    def build_call(single_buffer_consts):
        const_kw = {"pipeline_mode": pl.Buffered(1)} if single_buffer_consts else {}
        if nk == 1:
            grid = (nm,)
            in_specs = [
                pl.BlockSpec((tile_m, K), lambda i: (i, 0)),          # activation rows
                pl.BlockSpec((K, D), lambda i: (0, 0), **const_kw),   # resident weight
                pl.BlockSpec((1, D), lambda i: (0, 0), **const_kw),   # bias
                pl.BlockSpec((1, D), lambda i: (0, 0), **const_kw),   # LN gamma
                pl.BlockSpec((1, D), lambda i: (0, 0), **const_kw),   # LN beta
            ]
            out_spec = pl.BlockSpec((tile_m, D), lambda i: (i, 0))
            scratch = []
            # TODO(synk): on v7x, pltpu.CORE_PARALLEL on this axis would shard row tiles
            # across the 2 TensorCores; "parallel" kept for portability across generations.
            dims = ("parallel",)
        else:
            grid = (nm, nk)  # reduction axis last
            in_specs = [
                pl.BlockSpec((tile_m, tile_k), lambda i, k: (i, k)),
                pl.BlockSpec((tile_k, D), lambda i, k: (k, 0)),
                pl.BlockSpec((1, D), lambda i, k: (0, 0), **const_kw),
                pl.BlockSpec((1, D), lambda i, k: (0, 0), **const_kw),
                pl.BlockSpec((1, D), lambda i, k: (0, 0), **const_kw),
            ]
            out_spec = pl.BlockSpec((tile_m, D), lambda i, k: (i, 0))
            scratch = [pltpu.VMEM((tile_m, D), jnp.float32)]
            dims = ("parallel", "arbitrary")

        return pl.pallas_call(
            functools.partial(dnn_kernel, nk=nk),
            out_shape=jax.ShapeDtypeStruct((N, D), x.dtype),
            grid_spec=pltpu.PrefetchScalarGridSpec(
                num_scalar_prefetch=0,
                grid=grid,
                in_specs=in_specs,
                out_specs=out_spec,
                scratch_shapes=scratch,
            ),
            compiler_params=pltpu.CompilerParams(
                dimension_semantics=dims,
                vmem_limit_bytes=vmem_limit,
            ),
        )

    try:
        out = build_call(True)(x, w_t, b2, g2, be2)
    except Exception:
        # Fallback if this jax build rejects pl.Buffered(1) single-buffering.
        out = build_call(False)(x, w_t, b2, g2, be2)
    return out


def dnn_reference(x, w_t, b, gamma, beta):
    h = x @ w_t + b
    h = jnp.tanh(h)
    mean = jnp.mean(h, axis=-1, keepdims=True)
    var = jnp.mean((h - mean) ** 2, axis=-1, keepdims=True)
    return (h - mean) / jnp.sqrt(var + LN_EPS) * gamma + beta


if __name__ == "__main__":
    key = jax.random.PRNGKey(0)
    k_x, k_w, k_b = jax.random.split(key, 3)

    # Small, TPU-aligned demo: lane-dense D (multiple of 128); N deliberately NOT a tile
    # multiple so the unpadded ragged-tail (masked-store) path is exercised; max_tile_m=256
    # gives a 2-step grid so the parallel axis and pipelining are real.
    N = 500
    input_size = 256
    output_size = 128

    x = jax.random.normal(k_x, (N, input_size), dtype=jnp.float32)

    # nn.Linear init style (uniform in +-1/sqrt(fan_in)), deterministic here.
    bound = 1.0 / (input_size ** 0.5)
    w = jax.random.uniform(k_w, (output_size, input_size),
                           minval=-bound, maxval=bound, dtype=jnp.float32)
    b = jax.random.uniform(k_b, (output_size,),
                           minval=-bound, maxval=bound, dtype=jnp.float32)
    w_t = w.T  # (input_size, output_size), pre-transposed for the kernel

    # nn.LayerNorm default init: weight=1, bias=0.
    gamma = jnp.ones((output_size,), dtype=jnp.float32)
    beta = jnp.zeros((output_size,), dtype=jnp.float32)

    out = dnn_forward(x, w_t, b, gamma, beta, max_tile_m=256)
    out = jax.block_until_ready(out)

    ref = dnn_reference(x, w_t, b, gamma, beta)
    assert out.shape == (N, output_size)
    max_err = float(jnp.max(jnp.abs(out - ref)))
    assert jnp.allclose(out, ref, atol=5e-4, rtol=5e-4), f"mismatch vs reference: {max_err}"

    print("KERNEL_OK")
</pallas_src>

<mosaic_0001>
module attributes {stable_mosaic.version = 11 : i64} {
  func.func @dnn_kernel(%arg0: i32, %arg1: memref<256x256xf32, #tpu.memory_space<vmem>>, %arg2: memref<256x128xf32, #tpu.memory_space<vmem>>, %arg3: memref<1x128xf32, #tpu.memory_space<vmem>>, %arg4: memref<1x128xf32, #tpu.memory_space<vmem>>, %arg5: memref<1x128xf32, #tpu.memory_space<vmem>>, %arg6: memref<256x128xf32, #tpu.memory_space<vmem>>) attributes {dimension_semantics = [#tpu.dimension_semantics<parallel>], iteration_bounds = array<i64: 2>, scalar_prefetch = 0 : i64, scratch_operands = 0 : i64, tpu.core_type = #tpu.core_type<tc>, window_params = [{transform_indices = @transform_0, window_bounds = array<i64: 256, 256>}, {pipeline_mode = #tpu.pipeline_mode<synchronous>, transform_indices = @transform_1, window_bounds = array<i64: 256, 128>}, {pipeline_mode = #tpu.pipeline_mode<synchronous>, transform_indices = @transform_2, window_bounds = array<i64: 1, 128>}, {pipeline_mode = #tpu.pipeline_mode<synchronous>, transform_indices = @transform_3, window_bounds = array<i64: 1, 128>}, {pipeline_mode = #tpu.pipeline_mode<synchronous>, transform_indices = @transform_4, window_bounds = array<i64: 1, 128>}, {transform_indices = @transform_5, window_bounds = array<i64: 256, 128>}]} {
    %c0 = arith.constant 0 : index
    %c0_0 = arith.constant 0 : index
    %0 = vector.load %arg1[%c0, %c0_0] : memref<256x256xf32, #tpu.memory_space<vmem>>, vector<256x256xf32>
    %c0_1 = arith.constant 0 : index
    %c0_2 = arith.constant 0 : index
    %1 = vector.load %arg2[%c0_1, %c0_2] : memref<256x128xf32, #tpu.memory_space<vmem>>, vector<256x128xf32>
    %cst = arith.constant dense<0.000000e+00> : vector<256x128xf32>
    %2 = tpu.matmul %0, %1, %cst {dimension_numbers = #tpu.dot_dimension_numbers<[1], [0], [0], [1], [0, 0, 1, 1], [], []>} : vector<256x256xf32>, vector<256x128xf32>, vector<256x128xf32> -> vector<256x128xf32>
    %c0_3 = arith.constant 0 : index
    %c0_4 = arith.constant 0 : index
    %3 = vector.load %arg3[%c0_3, %c0_4] : memref<1x128xf32, #tpu.memory_space<vmem>>, vector<1x128xf32>
    %4 = vector.broadcast %3 : vector<1x128xf32> to vector<256x128xf32>
    %5 = arith.addf %2, %4 : vector<256x128xf32>
    %6 = math.tanh %5 : vector<256x128xf32>
    %cst_5 = arith.constant dense<0.000000e+00> : vector<256xf32>
    %7 = vector.multi_reduction <add>, %6, %cst_5 [1] : vector<256x128xf32> to vector<256xf32>
    %8 = vector.shape_cast %7 : vector<256xf32> to vector<256x1xf32>
    %9 = arith.mulf %6, %6 : vector<256x128xf32>
    %cst_6 = arith.constant dense<0.000000e+00> : vector<256xf32>
    %10 = vector.multi_reduction <add>, %9, %cst_6 [1] : vector<256x128xf32> to vector<256xf32>
    %11 = vector.shape_cast %10 : vector<256xf32> to vector<256x1xf32>
    %cst_7 = arith.constant 7.812500e-03 : f32
    %12 = vector.broadcast %cst_7 : f32 to vector<256x1xf32>
    %13 = arith.mulf %8, %12 : vector<256x1xf32>
    %cst_8 = arith.constant 7.812500e-03 : f32
    %14 = vector.broadcast %cst_8 : f32 to vector<256x1xf32>
    %15 = arith.mulf %11, %14 : vector<256x1xf32>
    %16 = arith.mulf %13, %13 : vector<256x1xf32>
    %17 = arith.subf %15, %16 : vector<256x1xf32>
    %cst_9 = arith.constant 9.99999974E-6 : f32
    %18 = vector.broadcast %cst_9 : f32 to vector<256x1xf32>
    %19 = arith.addf %17, %18 : vector<256x1xf32>
    %20 = math.rsqrt %19 : vector<256x1xf32>
    %21 = vector.broadcast %13 : vector<256x1xf32> to vector<256x128xf32>
    %22 = arith.subf %6, %21 : vector<256x128xf32>
    %23 = vector.broadcast %20 : vector<256x1xf32> to vector<256x128xf32>
    %24 = arith.mulf %22, %23 : vector<256x128xf32>
    %c0_10 = arith.constant 0 : index
    %c0_11 = arith.constant 0 : index
    %25 = vector.load %arg4[%c0_10, %c0_11] : memref<1x128xf32, #tpu.memory_space<vmem>>, vector<1x128xf32>
    %26 = vector.broadcast %25 : vector<1x128xf32> to vector<256x128xf32>
    %27 = arith.mulf %24, %26 : vector<256x128xf32>
    %c0_12 = arith.constant 0 : index
    %c0_13 = arith.constant 0 : index
    %28 = vector.load %arg5[%c0_12, %c0_13] : memref<1x128xf32, #tpu.memory_space<vmem>>, vector<1x128xf32>
    %29 = vector.broadcast %28 : vector<1x128xf32> to vector<256x128xf32>
    %30 = arith.addf %27, %29 : vector<256x128xf32>
    %c0_14 = arith.constant 0 : index
    %c0_15 = arith.constant 0 : index
    %31 = vector.load %arg6[%c0_14, %c0_15] : memref<256x128xf32, #tpu.memory_space<vmem>>, vector<256x128xf32>
    tpu.vector_store %arg6[%c0_14, %c0_15], %30 {strides = array<i32>} : memref<256x128xf32, #tpu.memory_space<vmem>>, vector<256x128xf32>,
    return
  }
  func.func @transform_0(%arg0: i32) -> (i32, i32) {
    %c0_i32 = arith.constant 0 : i32
    %c0_i32_0 = arith.constant 0 : i32
    return %arg0, %c0_i32 : i32, i32
  }
  func.func @transform_1(%arg0: i32) -> (i32, i32) {
    %c0_i32 = arith.constant 0 : i32
    %c0_i32_0 = arith.constant 0 : i32
    %c0_i32_1 = arith.constant 0 : i32
    return %c0_i32, %c0_i32_0 : i32, i32
  }
  func.func @transform_2(%arg0: i32) -> (i32, i32) {
    %c0_i32 = arith.constant 0 : i32
    %c0_i32_0 = arith.constant 0 : i32
    %c0_i32_1 = arith.constant 0 : i32
    return %c0_i32, %c0_i32_0 : i32, i32
  }
  func.func @transform_3(%arg0: i32) -> (i32, i32) {
    %c0_i32 = arith.constant 0 : i32
    %c0_i32_0 = arith.constant 0 : i32
    %c0_i32_1 = arith.constant 0 : i32
    return %c0_i32, %c0_i32_0 : i32, i32
  }
  func.func @transform_4(%arg0: i32) -> (i32, i32) {
    %c0_i32 = arith.constant 0 : i32
    %c0_i32_0 = arith.constant 0 : i32
    %c0_i32_1 = arith.constant 0 : i32
    return %c0_i32, %c0_i32_0 : i32, i32
  }
  func.func @transform_5(%arg0: i32) -> (i32, i32) {
    %c0_i32 = arith.constant 0 : i32
    %c0_i32_0 = arith.constant 0 : i32
    return %arg0, %c0_i32 : i32, i32
  }
}

module attributes {stable_mosaic.version = 11 : i64} {
  func.func @dnn_kernel(%arg0: i32, %arg1: memref<256x256xf32, #tpu.memory_space<vmem>>, %arg2: memref<256x128xf32, #tpu.memory_space<vmem>>, %arg3: memref<1x128xf32, #tpu.memory_space<vmem>>, %arg4: memref<1x128xf32, #tpu.memory_space<vmem>>, %arg5: memref<1x128xf32, #tpu.memory_space<vmem>>, %arg6: memref<256x128xf32, #tpu.memory_space<vmem>>) attributes {dimension_semantics = [#tpu.dimension_semantics<parallel>], iteration_bounds = array<i64: 2>, scalar_prefetch = 0 : i64, scratch_operands = 0 : i64, tpu.core_type = #tpu.core_type<tc>, window_params = [{transform_indices = @transform_0, window_bounds = array<i64: 256, 256>}, {pipeline_mode = #tpu.pipeline_mode<synchronous>, transform_indices = @transform_1, window_bounds = array<i64: 256, 128>}, {pipeline_mode = #tpu.pipeline_mode<synchronous>, transform_indices = @transform_2, window_bounds = array<i64: 1, 128>}, {pipeline_mode = #tpu.pipeline_mode<synchronous>, transform_indices = @transform_3, window_bounds = array<i64: 1, 128>}, {pipeline_mode = #tpu.pipeline_mode<synchronous>, transform_indices = @transform_4, window_bounds = array<i64: 1, 128>}, {transform_indices = @transform_5, window_bounds = array<i64: 256, 128>}]} {
    %c0 = arith.constant 0 : index
    %c0_0 = arith.constant 0 : index
    %0 = vector.load %arg1[%c0, %c0_0] : memref<256x256xf32, #tpu.memory_space<vmem>>, vector<256x256xf32>
    %c0_1 = arith.constant 0 : index
    %c0_2 = arith.constant 0 : index
    %1 = vector.load %arg2[%c0_1, %c0_2] : memref<256x128xf32, #tpu.memory_space<vmem>>, vector<256x128xf32>
    %cst = arith.constant dense<0.000000e+00> : vector<256x128xf32>
    %2 = tpu.matmul %0, %1, %cst {dimension_numbers = #tpu.dot_dimension_numbers<[1], [0], [0], [1], [0, 0, 1, 1], [], []>} : vector<256x256xf32>, vector<256x128xf32>, vector<256x128xf32> -> vector<256x128xf32>
    %c0_3 = arith.constant 0 : index
    %c0_4 = arith.constant 0 : index
    %3 = vector.load %arg3[%c0_3, %c0_4] : memref<1x128xf32, #tpu.memory_space<vmem>>, vector<1x128xf32>
    %4 = vector.broadcast %3 : vector<1x128xf32> to vector<256x128xf32>
    %5 = arith.addf %2, %4 : vector<256x128xf32>
    %6 = math.tanh %5 : vector<256x128xf32>
    %cst_5 = arith.constant dense<0.000000e+00> : vector<256xf32>
    %7 = vector.multi_reduction <add>, %6, %cst_5 [1] : vector<256x128xf32> to vector<256xf32>
    %8 = vector.shape_cast %7 : vector<256xf32> to vector<256x1xf32>
    %9 = arith.mulf %6, %6 : vector<256x128xf32>
    %cst_6 = arith.constant dense<0.000000e+00> : vector<256xf32>
    %10 = vector.multi_reduction <add>, %9, %cst_6 [1] : vector<256x128xf32> to vector<256xf32>
    %11 = vector.shape_cast %10 : vector<256xf32> to vector<256x1xf32>
    %cst_7 = arith.constant 7.812500e-03 : f32
    %12 = vector.broadcast %cst_7 : f32 to vector<256x1xf32>
    %13 = arith.mulf %8, %12 : vector<256x1xf32>
    %cst_8 = arith.constant 7.812500e-03 : f32
    %14 = vector.broadcast %cst_8 : f32 to vector<256x1xf32>
    %15 = arith.mulf %11, %14 : vector<256x1xf32>
    %16 = arith.mulf %13, %13 : vector<256x1xf32>
    %17 = arith.subf %15, %16 : vector<256x1xf32>
    %cst_9 = arith.constant 9.99999974E-6 : f32
    %18 = vector.broadcast %cst_9 : f32 to vector<256x1xf32>
    %19 = arith.addf %17, %18 : vector<256x1xf32>
    %20 = math.rsqrt %19 : vector<256x1xf32>
    %21 = vector.broadcast %13 : vector<256x1xf32> to vector<256x128xf32>
    %22 = arith.subf %6, %21 : vector<256x128xf32>
    %23 = vector.broadcast %20 : vector<256x1xf32> to vector<256x128xf32>
    %24 = arith.mulf %22, %23 : vector<256x128xf32>
    %c0_10 = arith.constant 0 : index
    %c0_11 = arith.constant 0 : index
    %25 = vector.load %arg4[%c0_10, %c0_11] : memref<1x128xf32, #tpu.memory_space<vmem>>, vector<1x128xf32>
    %26 = vector.broadcast %25 : vector<1x128xf32> to vector<256x128xf32>
    %27 = arith.mulf %24, %26 : vector<256x128xf32>
    %c0_12 = arith.constant 0 : index
    %c0_13 = arith.constant 0 : index
    %28 = vector.load %arg5[%c0_12, %c0_13] : memref<1x128xf32, #tpu.memory_space<vmem>>, vector<1x128xf32>
    %29 = vector.broadcast %28 : vector<1x128xf32> to vector<256x128xf32>
    %30 = arith.addf %27, %29 : vector<256x128xf32>
    %c0_14 = arith.constant 0 : index
    %c0_15 = arith.constant 0 : index
    %31 = vector.load %arg6[%c0_14, %c0_15] : memref<256x128xf32, #tpu.memory_space<vmem>>, vector<256x128xf32>
    tpu.vector_store %arg6[%c0_14, %c0_15], %30 {strides = array<i32>} : memref<256x128xf32, #tpu.memory_space<vmem>>, vector<256x128xf32>,
    return
  }
  func.func @transform_0(%arg0: i32) -> (i32, i32) {
    %c0_i32 = arith.constant 0 : i32
    %c0_i32_0 = arith.constant 0 : i32
    return %arg0, %c0_i32 : i32, i32
  }
  func.func @transform_1(%arg0: i32) -> (i32, i32) {
    %c0_i32 = arith.constant 0 : i32
    %c0_i32_0 = arith.constant 0 : i32
    %c0_i32_1 = arith.constant 0 : i32
    return %c0_i32, %c0_i32_0 : i32, i32
  }
  func.func @transform_2(%arg0: i32) -> (i32, i32) {
    %c0_i32 = arith.constant 0 : i32
    %c0_i32_0 = arith.constant 0 : i32
    %c0_i32_1 = arith.constant 0 : i32
    return %c0_i32, %c0_i32_0 : i32, i32
  }
  func.func @transform_3(%arg0: i32) -> (i32, i32) {
    %c0_i32 = arith.constant 0 : i32
    %c0_i32_0 = arith.constant 0 : i32
    %c0_i32_1 = arith.constant 0 : i32
    return %c0_i32, %c0_i32_0 : i32, i32
  }
  func.func @transform_4(%arg0: i32) -> (i32, i32) {
    %c0_i32 = arith.constant 0 : i32
    %c0_i32_0 = arith.constant 0 : i32
    %c0_i32_1 = arith.constant 0 : i32
    return %c0_i32, %c0_i32_0 : i32, i32
  }
  func.func @transform_5(%arg0: i32) -> (i32, i32) {
    %c0_i32 = arith.constant 0 : i32
    %c0_i32_0 = arith.constant 0 : i32
    return %arg0, %c0_i32 : i32, i32
  }
}

</mosaic_0001>

<bundles_post_ra>
// kernel: tpu_custom_call.1
= control target key start
LH: loop header
LB: loop body
LE: loop exit
PB: predicated region body
PF: predicated region fallthrough
CT: control target
= control target key end

     0   :  { %10 = vsyncpa [#allocation3], 0  ;;  %s2555_s0 = inlined_call_operand.hbm [shape: f32[500,256], index: 0, kind: input, shape index: {}]   ;;  %s2556_s1 = inlined_call_operand.hbm [shape: f32[256,128], index: 1, kind: input, shape index: {}]   ;;  %s2557_s2 = inlined_call_operand.vmem [shape: f32[1,128], index: 2, kind: input, shape index: {}]   ;;  %s2558_s3 = inlined_call_operand.vmem [shape: f32[1,128], index: 3, kind: input, shape index: {}]   ;;  %s2559_s4 = inlined_call_operand.vmem [shape: f32[1,128], index: 4, kind: input, shape index: {}]   ;;  %s2560_s5 = inlined_call_operand.hbm [shape: f32[500,128], index: 5, kind: output, shape index: {}]  }
   0x1   :  { %12 = vsyncpa [#allocation3 + $0x1], 0 }
   0x2   :  { %13 = vsyncpa [#allocation6], 0 }
   0x3   :  { %14 = vsyncpa [#allocation4], 0 }
   0x4   :  { %16 = vsyncpa [#allocation4 + $0x1], 0  ;;  %s1732_s18 = smov 0   ;;  %s1734_s19 = smov 0  }
   0x5   :  { %s1736_s20 = smov 0   ;;  %s1738_s21 = smov 0  }
   0x6 LB: > { %s1753_s22 = sadd.s32 4294967295, %s1690_s21   ;;  %s1266_s23 = sadd.s32 4294967294, %s1690_s21   ;;  %s1690_s21 = sphi %s1738_s21, %s2580_s21   ;;  %s1686_s20 = sphi %s1736_s20, %s2579_s20   ;;  %s1682_s19 = sphi %s1734_s19, %s2578_s19   ;;  %s1678_s18 = sphi %s1732_s18, %s2577_s18  }
   0x7   : > { %s1757_s24 = sadd.s32 1, %s1690_s21   ;;  %s29_s25 = sadd.s32 1, %s1686_s20 }
   0x8   : > { %s26_s26 = ssub.s32 %s1690_s21, %s1757_s24  ;;  %p36_p0 = scmp.ne.s32.totalorder %s1686_s20, %s1682_s19 }
   0x9   : > { %p27_p1 = scmp.eq.s32.totalorder %s26_s26, 0  ;;  %p37_p2 = scmp.eq.s32.totalorder %s1690_s21, 0 }
   0xa   : > { %p42_p3 = scmp.ne.s32.totalorder %s1682_s19, %s1678_s18  ;;  %p2561_p4 = scmp.eq.s32.totalorder %s1753_s22, 0 }
   0xb   : > { %s1769_s27 = scalar_select %p27_p1, %s1686_s20, %s29_s25  }
   0xc   : > { %p1771_p5 = por %p37_p2, %p36_p0  ;;  %p1777_p6 = por %p2561_p4, %p42_p3 }
   0xd   : > { %p150_p7 = scmp.eq.s32.totalorder %s1753_s22, 1  ;;  %p156_p8 = scmp.eq.s32.totalorder %s1266_s23, 1 }
   0xe   : > { %s2564_s28 = scalar_select %p1771_p5, 1, 0 }
   0xf   : > { %s2565_s29 = scalar_select %p1777_p6, 1, 0 }
  0x10   : > { %p1267_p9 = scmp.ge.s32.totalorder %s1690_s21, 1  ;;  %p163_p10 = scmp.lt.s32.totalorder %s1690_s21, 3 }
  0x11   : > { %p1784_p11 = por %p150_p7, %p36_p0  ;;  %p1788_p12 = por %p156_p8, %p42_p3 }
  0x12   : > { %p1792_p13 = pnand %p1267_p9, %p163_p10  ;;  %s1692_s8 = smov [#allocation5]  }
  0x13   : > { %s2566_s30 = scalar_select %p1784_p11, 1, 0 }
  0x14   : > { %s2567_s6 = scalar_select %p1788_p12, 1, 0 }
  0x15   : > { %s2568_s7 = scalar_select %p1792_p13, 1, 0 }
  0x16   : > { %p1385_p1 = pneg %p1792_p13  ;;  %s175_s9 = sshll.u32 %s1692_s8, 4  ;;  %s176_s9 = int_to_ptr.vmem [resolvable:$true] %s175_s9 }
  0x17   : > { %s1564_s13 = scalar_lea.hbm %s2556_s1, 4096 }
  0x18   : > { %p1800_p2 = pnand %p1385_p1, %p2561_p4  ;;  %p1565_p0 = scmp.ne.s32.totalorder %s2556_s1, %s1564_s13 }
  0x19   : > { %p1571_p9 = scmp.lt.u32.totalorder %s1564_s13, %s2556_s1 }
  0x1a   : > { %p1566_p3 = pneg %p1800_p2 }
  0x1c   : > { %p1567_p7 = pnand %p1566_p3, %p1565_p0 }
  0x1e   : > { %p1568_p8 = pneg %p1567_p7 }
  0x20   : > { %p1573_p10 = pnand %p1571_p9, %p1568_p8 }
  0x22   : > { %1576 = shalt.err (!%p1573_p10)
}
  0x23   : > { %s1577_s23 = scalar_lea.vmem %s176_s9, 4096  ;;  %p1585_p11 = scmp.lt.s32.totalorder %s176_s9, %s176_s9 }
  0x24   : > { %p1578_p1 = scmp.ne.s32.totalorder %s176_s9, %s1577_s23  ;;  %p1586_p6 = scmp.lt.s32.totalorder %s1577_s23, %s1577_s23 }
  0x26   : > { %p1580_p4 = pnand %p1578_p1, %p1566_p3  ;;  %p1587_p13 = por %p1586_p6, %p1585_p11 }
  0x28   : > { %p1581_p12 = pneg %p1580_p4 }
  0x2a   : > { %p1588_p5 = pnand %p1587_p13, %p1581_p12 }
  0x2c   : > { %1591 = shalt.err (!%p1588_p5)
}
  0x2d   : > { %s1693_s25 = smov 128   ;;  %s1694_s26 = smov 8  }
  0x2e   : > { %1388 = dma.hbm_to_vmem [thread:$0]  (!%p1800_p2), %s2556_s1, 4096, %s176_s9, [#allocation6], %s1693_s25, %s1693_s25, %s1694_s26  }
  0x2f   : > { %p1269_p0 = scmp.ge.s32.totalorder %s1690_s21, 2 }
  0x30   : > { %p2570_p4 = scmp.ne.s32.totalorder (!%p1269_p0), %s2564_s28, 0 }
  0x31   : > { %194 = sbr.rel (%p1269_p0) target bundleno = 91 (0x5b), region = 32 }
  0x38   : > { %197 = sbr.rel (!%p2570_p4) target bundleno = 91 (0x5b), region = 36  ;;  %s198_s12 = sand.u32 (%p2570_p4), 1, %s1686_s20  }
  0x39   : > { %s1271_s13 = sshll.u32 (%p2570_p4), %s1690_s21, 5  ;;  %s1270_s14 = sshll.u32 (%p2570_p4), %s198_s12, 9 }
  0x3a   : > { %s204_s15 = ssub.s32 (%p2570_p4), 63, %s1271_s13  ;;  %s1830_s16 = scalar_lea.sflag (%p2570_p4), [#allocation3], %s198_s12 }
  0x3b   : > { %p205_p5 = scmp.lt.s32.totalorder (%p2570_p4), %s204_s15, 32  ;;  %s202_s17 = scalar_lea.vmem (%p2570_p4), [#allocation2], %s1270_s14 }
  0x3f   : > { %s2582_s15 = smov (!%p205_p5, %s204_s15), 32 }
  0x40   : > { %s1827_s10 = sshll.u32 %s2582_s15, 8 }
  0x41   : > { %s210_s9 = ssub.s32 8192, %s1827_s10 }
  0x42   : > { %211 = vsyncadd %s1830_s16, %s210_s9  ;;  %p1274_p6 = scmp.ne.s32.totalorder %s1827_s10, 0  ;;  %s1297_s28 = sshll.u32 %s1690_s21, 13 }
  0x43   : > { %s1838_s26 = scalar_lea.hbm %s2555_s0, %s1297_s28  ;;  %s217_s8 = sshll.u32 %s202_s17, 4  ;;  %s1840_s8 = int_to_ptr.vmem [resolvable:$true] %s217_s8 }
  0x44   : > { %s1592_s11 = scalar_lea.hbm %s1838_s26, %s1827_s10  ;;  %s1596_s14 = scalar_lea.hbm %s2555_s0, 16128 }
  0x45   : > { %p1593_p11 = scmp.ne.s32.totalorder %s1838_s26, %s1592_s11  ;;  %p1597_p2 = scmp.lt.u32.totalorder %s1838_s26, %s2555_s0 }
  0x46   : > { %p1598_p3 = scmp.lt.u32.totalorder %s1596_s14, %s1592_s11  ;;  %p1600_p8 = scmp.lt.u32.totalorder %s1592_s11, %s1838_s26 }
  0x47   : > { %p1594_p12 = pnand %p1593_p11, %p1274_p6 }
  0x48   : > { %p1599_p7 = por %p1598_p3, %p1597_p2 }
  0x49   : > { %p1595_p13 = pneg %p1594_p12 }
  0x4a   : > { %p1601_p9 = por %p1600_p8, %p1599_p7 }
  0x4c   : > { %p1602_p10 = pnand %p1601_p9, %p1595_p13 }
  0x4e   : > { %1605 = shalt.err (!%p1602_p10)
}
  0x4f   : > { %s1606_s17 = scalar_lea.vmem %s1840_s8, %s1827_s10  ;;  %s1695_s28 = smov [#allocation2]  }
  0x50   : > { %p1607_p1 = scmp.ne.s32.totalorder %s1840_s8, %s1606_s17  ;;  %s1610_s23 = sshll.u32 %s1695_s28, 4  ;;  %s1611_s23 = int_to_ptr.vmem [resolvable:$false] %s1610_s23 }
  0x51   : > { %s1612_s25 = scalar_lea.vmem %s1611_s23, 16384  ;;  %p1613_p11 = scmp.lt.s32.totalorder %s1840_s8, %s1611_s23 }
  0x52   : > { %p1608_p4 = pnand %p1607_p1, %p1274_p6  ;;  %p1614_p12 = scmp.lt.s32.totalorder %s1612_s25, %s1606_s17 }
  0x54   : > { %p1609_p5 = pneg %p1608_p4  ;;  %p1615_p2 = por %p1614_p12, %p1613_p11 }
  0x56   : > { %p1616_p3 = pnand %p1615_p2, %p1609_p5 }
  0x58   : > { %1619 = shalt.err (!%p1616_p3)
}
  0x59   : > { %s1696_s11 = smov 256   ;;  %s1697_s12 = smov 16  }
  0x5a   : > { %223 = dma.hbm_to_vmem [thread:$0]  (%p1274_p6), %s1838_s26, %s1827_s10, %s1840_s8, %s1830_s16, %s1696_s11, %s1696_s11, %s1697_s12  }
  0x5b PF: > { %p2571_p13 = scmp.ne.s32.totalorder %s2568_s7, 0 }
  0x5c   : > { %s1870_s13 = sand.u32 (!%p2571_p13), 1, %s1682_s19   ;;  %p2572_p7 = scmp.ne.s32.totalorder (!%p2571_p13), %s2565_s29, 0 }
  0x5d   : > { %229 = sbr.rel (%p2571_p13) target bundleno = 717 (0x2cd), region = 40  ;;  %s1280_s14 = sshll.u32 (!%p2571_p13), %s1870_s13, 9 }
  0x5e   : > { %s232_s15 = scalar_lea.sflag (!%p2571_p13), [#allocation3], %s1870_s13  ;;  %s1874_s9 = scalar_lea.vmem (!%p2571_p13), [#allocation2], %s1280_s14 }
  0x64   : > { %1665 = dma.done.wait (%p2572_p7), %s232_s15, 8192  }
  0x65   : > { %1667 = vsyncadd (%p2572_p7), %s232_s15, 4294959104  ;;  %p2573_p6 = scmp.eq.s32.totalorder %s1753_s22, 0 }
  0x67   : > { %1669 = dma.done.wait (%p2573_p6), [#allocation6], 4096   ;;  %p2574_p8 = pmov %p2573_p6 }
  0x68   : > { %v1698_v0 = vmov 0.0|0.0   ;;  %v341_v1 = vld [vmem:[#allocation5] sm:$0xff]  ;;  %v342_v2 = vld [vmem:[#allocation5 + $0x8] sm:$0xff]  ;;  %v343_v3 = vld [vmem:[#allocation5 + $0x10] sm:$0xff]  ;;  %s1282_s26 = sshll.u32 %s1870_s13, 8  ;;  %s1164_s23 = scalar_lea.sflag [#allocation4], %s1870_s13 }
  0x69   : > { %1671 = vsyncadd (%p2574_p8), [#allocation6], 4294963200  ;;  %1299 = vmatprep.subr.bf16.mxu0 %v1698_v0  ;;  %1347 = vmatprep.subr.bf16.mxu1 %v1698_v0  ;;  %v1300_v4 = vpack.c.bf16 %v342_v2, %v341_v1  ;;  %v344_v5 = vld [vmem:[#allocation5 + $0x18] sm:$0xff]  ;;  %v345_v7 = vld [vmem:[#allocation5 + $0x20] sm:$0xff]  ;;  %s2261_s28 = scalar_lea.vmem [#allocation7], %s1282_s26  ;;  %p2575_p9 = scmp.ne.s32.totalorder %s2566_s30, 0 }
  0x6a   : > { %v1303_v6 = vpack.c.bf16 %v344_v5, %v343_v3  ;;  %v346_v8 = vld [vmem:[#allocation5 + $0x28] sm:$0xff]  ;;  %v347_v10 = vld [vmem:[#allocation5 + $0x30] sm:$0xff]  ;;  %v348_v11 = vld [vmem:[#allocation5 + $0x38] sm:$0xff]  ;;  %s1287_s25 = sshll.u32 (%p2575_p9), %s1753_s22, 5 }
  0x6b   : > { %1301 = vmatpush1.bf16.msra.mxu0 %v1300_v4  ;;  %1363 = vmatpush1.bf16.msra.mxu1 %v1300_v4  ;;  %v1306_v9 = vpack.c.bf16 %v346_v8, %v345_v7  ;;  %v278_v12 = vld [vmem:[%s1874_s9 + $0x8] sm:$0xff]  ;;  %v1309_v13 = vpack.c.bf16 %v348_v11, %v347_v10  ;;  %v349_v15 = vld [vmem:[#allocation5 + $0x40] sm:$0xff]  ;;  %v351_v18 = vld [vmem:[#allocation5 + $0x50] sm:$0xff]  ;;  %s1172_s11 = ssub.s32 (%p2575_p9), 63, %s1287_s25 }
  0x6c   : > { %1302 = vmatprep.subr.bf16.mxu0 %v1698_v0  ;;  %1348 = vmatprep.subr.bf16.mxu1 %v1698_v0  ;;  %v310_v14 = vld [vmem:[%s1874_s9 + $0x108] sm:$0xff]  ;;  %v352_v19 = vld [vmem:[#allocation5 + $0x58] sm:$0xff]  ;;  %v353_v21 = vld [vmem:[#allocation5 + $0x60] sm:$0xff]  ;;  %p1173_p10 = scmp.lt.s32.totalorder (%p2575_p9), %s1172_s11, 32 }
  0x6d   : > { %v350_v16 = vld [vmem:[#allocation5 + $0x48] sm:$0xff]  ;;  %444 = vmatprep.mubr.f32.mxu0 %v278_v12  ;;  %524 = vmatprep.mubr.f32.mxu1 %v310_v14  ;;  %v1315_v20 = vpack.c.bf16 %v352_v19, %v351_v18  ;;  %v355_v24 = vld [vmem:[#allocation5 + $0x70] sm:$0xff]  ;;  %v356_v25 = vld [vmem:[#allocation5 + $0x78] sm:$0xff] }
  0x6e   : > { %v1312_v17 = vpack.c.bf16 %v350_v16, %v349_v15  ;;  %v354_v22 = vld [vmem:[#allocation5 + $0x68] sm:$0xff]  ;;  %v1321_v26 = vpack.c.bf16 %v356_v25, %v355_v24  ;;  %v357_v27 = vld [vmem:[#allocation5 + $0x80] sm:$0xff]  ;;  %v359_v30 = vld [vmem:[#allocation5 + $0x90] sm:$0xff] }
  0x6f   : > { %1304 = vmatpush1.bf16.msra.mxu0 %v1303_v6  ;;  %1364 = vmatpush1.bf16.msra.mxu1 %v1303_v6  ;;  %v1318_v23 = vpack.c.bf16 %v354_v22, %v353_v21  ;;  %v358_v28 = vld [vmem:[#allocation5 + $0x88] sm:$0xff]  ;;  %v360_v31 = vld [vmem:[#allocation5 + $0x98] sm:$0xff]  ;;  %v361_v33 = vld [vmem:[#allocation5 + $0xa0] sm:$0xff] }
  0x70   : > { %1305 = vmatprep.subr.bf16.mxu0 %v1698_v0  ;;  %1349 = vmatprep.subr.bf16.mxu1 %v1698_v0  ;;  %v1324_v29 = vpack.c.bf16 %v358_v28, %v357_v27  ;;  %v1327_v32 = vpack.c.bf16 %v360_v31, %v359_v30  ;;  %v362_v34 = vld [vmem:[#allocation5 + $0xa8] sm:$0xff]  ;;  %v363_v36 = vld [vmem:[#allocation5 + $0xb0] sm:$0xff]  ;;  %v364_v37 = vld [vmem:[#allocation5 + $0xb8] sm:$0xff] }
  0x71   : > { %v1330_v35 = vpack.c.bf16 %v362_v34, %v361_v33  ;;  %v1333_v38 = vpack.c.bf16 %v364_v37, %v363_v36  ;;  %v365_v39 = vld [vmem:[#allocation5 + $0xc0] sm:$0xff]  ;;  %v366_v40 = vld [vmem:[#allocation5 + $0xc8] sm:$0xff]  ;;  %v367_v42 = vld [vmem:[#allocation5 + $0xd0] sm:$0xff] }
  0x72   : > { %v1336_v41 = vpack.c.bf16 %v366_v40, %v365_v39  ;;  %v368_v43 = vld [vmem:[#allocation5 + $0xd8] sm:$0xff]  ;;  %v369_v45 = vld [vmem:[#allocation5 + $0xe0] sm:$0xff]  ;;  %v370_v46 = vld [vmem:[#allocation5 + $0xe8] sm:$0xff] }
  0x73   : > { %1307 = vmatpush1.bf16.msra.mxu0 %v1306_v9  ;;  %1365 = vmatpush1.bf16.msra.mxu1 %v1306_v9  ;;  %v1339_v44 = vpack.c.bf16 %v368_v43, %v367_v42  ;;  %v1342_v47 = vpack.c.bf16 %v370_v46, %v369_v45  ;;  %v371_v48 = vld [vmem:[#allocation5 + $0xf0] sm:$0xff]  ;;  %v372_v49 = vld [vmem:[#allocation5 + $0xf8] sm:$0xff]  ;;  %v277_v51 = vld [vmem:[%s1874_s9] sm:$0xff] }
  0x74   : > { %1308 = vmatprep.subr.bf16.mxu0 %v1698_v0  ;;  %1350 = vmatprep.subr.bf16.mxu1 %v1698_v0  ;;  %v1345_v50 = vpack.c.bf16 %v372_v49, %v371_v48  ;;  %v309_v52 = vld [vmem:[%s1874_s9 + $0x100] sm:$0xff]  ;;  %v312_v53 = vld [vmem:[%s1874_s9 + $0x118] sm:$0xff]  ;;  %v311_v55 = vld [vmem:[%s1874_s9 + $0x110] sm:$0xff] }
  0x75   : > { %v280_v54 = vld [vmem:[%s1874_s9 + $0x18] sm:$0xff]  ;;  %v279_v56 = vld [vmem:[%s1874_s9 + $0x10] sm:$0xff]  ;;  %v282_v57 = vld [vmem:[%s1874_s9 + $0x28] sm:$0xff] }
  0x76   : > { %v314_v58 = vld [vmem:[%s1874_s9 + $0x128] sm:$0xff]  ;;  %v281_v59 = vld [vmem:[%s1874_s9 + $0x20] sm:$0xff]  ;;  %v284_v61 = vld [vmem:[%s1874_s9 + $0x38] sm:$0xff] }
  0x77   : > { %1310 = vmatpush1.bf16.msra.mxu0 %v1309_v13  ;;  %1366 = vmatpush1.bf16.msra.mxu1 %v1309_v13  ;;  %v313_v60 = vld [vmem:[%s1874_s9 + $0x120] sm:$0xff]  ;;  %v316_v62 = vld [vmem:[%s1874_s9 + $0x138] sm:$0xff]  ;;  %v283_v63 = vld [vmem:[%s1874_s9 + $0x30] sm:$0xff] }
  0x78   : > { %1311 = vmatprep.subr.bf16.mxu0 %v1698_v0  ;;  %1351 = vmatprep.subr.bf16.mxu1 %v1698_v0  ;;  %v286_v1 = vld [vmem:[%s1874_s9 + $0x48] sm:$0xff]  ;;  %v285_v3 = vld [vmem:[%s1874_s9 + $0x40] sm:$0xff]  ;;  %v288_v5 = vld [vmem:[%s1874_s9 + $0x58] sm:$0xff] }
  0x79   : > { %v318_v2 = vld [vmem:[%s1874_s9 + $0x148] sm:$0xff]  ;;  %v317_v4 = vld [vmem:[%s1874_s9 + $0x140] sm:$0xff]  ;;  %v320_v6 = vld [vmem:[%s1874_s9 + $0x158] sm:$0xff] }
  0x7a   : > { %v287_v7 = vld [vmem:[%s1874_s9 + $0x50] sm:$0xff]  ;;  %v290_v9 = vld [vmem:[%s1874_s9 + $0x68] sm:$0xff]  ;;  %v289_v11 = vld [vmem:[%s1874_s9 + $0x60] sm:$0xff] }
  0x7b   : > { %1313 = vmatpush1.bf16.msra.mxu0 %v1312_v17  ;;  %1367 = vmatpush1.bf16.msra.mxu1 %v1312_v17  ;;  %v319_v8 = vld [vmem:[%s1874_s9 + $0x150] sm:$0xff]  ;;  %v322_v10 = vld [vmem:[%s1874_s9 + $0x168] sm:$0xff]  ;;  %v321_v12 = vld [vmem:[%s1874_s9 + $0x160] sm:$0xff] }
  0x7c   : > { %1314 = vmatprep.subr.bf16.mxu0 %v1698_v0  ;;  %1352 = vmatprep.subr.bf16.mxu1 %v1698_v0  ;;  %v292_v13 = vld [vmem:[%s1874_s9 + $0x78] sm:$0xff]  ;;  %v291_v15 = vld [vmem:[%s1874_s9 + $0x70] sm:$0xff]  ;;  %v294_v17 = vld [vmem:[%s1874_s9 + $0x88] sm:$0xff] }
  0x7d   : > { %v324_v14 = vld [vmem:[%s1874_s9 + $0x178] sm:$0xff]  ;;  %v323_v16 = vld [vmem:[%s1874_s9 + $0x170] sm:$0xff]  ;;  %v326_v18 = vld [vmem:[%s1874_s9 + $0x188] sm:$0xff] }
  0x7e   : > { %v293_v19 = vld [vmem:[%s1874_s9 + $0x80] sm:$0xff]  ;;  %v296_v21 = vld [vmem:[%s1874_s9 + $0x98] sm:$0xff]  ;;  %v327_v24 = vld [vmem:[%s1874_s9 + $0x190] sm:$0xff] }
  0x7f   : > { %1316 = vmatpush1.bf16.msra.mxu0 %v1315_v20  ;;  %1368 = vmatpush1.bf16.msra.mxu1 %v1315_v20  ;;  %v325_v20 = vld [vmem:[%s1874_s9 + $0x180] sm:$0xff]  ;;  %v328_v22 = vld [vmem:[%s1874_s9 + $0x198] sm:$0xff]  ;;  %v298_v25 = vld [vmem:[%s1874_s9 + $0xa8] sm:$0xff] }
  0x80   : > { %1317 = vmatprep.subr.bf16.mxu0 %v1698_v0  ;;  %1353 = vmatprep.subr.bf16.mxu1 %v1698_v0  ;;  %v297_v27 = vld [vmem:[%s1874_s9 + $0xa0] sm:$0xff]  ;;  %v332_v30 = vld [vmem:[%s1874_s9 + $0x1b8] sm:$0xff]  ;;  %v299_v31 = vld [vmem:[%s1874_s9 + $0xb0] sm:$0xff] }
  0x81   : > { %v329_v28 = vld [vmem:[%s1874_s9 + $0x1a0] sm:$0xff]  ;;  %v302_v33 = vld [vmem:[%s1874_s9 + $0xc8] sm:$0xff]  ;;  %v304_v37 = vld [vmem:[%s1874_s9 + $0xd8] sm:$0xff] }
  0x82   : > { %v334_v34 = vld [vmem:[%s1874_s9 + $0x1c8] sm:$0xff]  ;;  %v333_v36 = vld [vmem:[%s1874_s9 + $0x1c0] sm:$0xff]  ;;  %v303_v39 = vld [vmem:[%s1874_s9 + $0xd0] sm:$0xff] }
  0x83   : > { %1319 = vmatpush1.bf16.msra.mxu0 %v1318_v23  ;;  %1369 = vmatpush1.bf16.msra.mxu1 %v1318_v23  ;;  %v295_v23 = vld [vmem:[%s1874_s9 + $0x90] sm:$0xff]  ;;  %v338_v42 = vld [vmem:[%s1874_s9 + $0x1e8] sm:$0xff]  ;;  %v305_v43 = vld [vmem:[%s1874_s9 + $0xe0] sm:$0xff] }
  0x84   : > { %1320 = vmatprep.subr.bf16.mxu0 %v1698_v0  ;;  %1354 = vmatprep.subr.bf16.mxu1 %v1698_v0  ;;  %v335_v40 = vld [vmem:[%s1874_s9 + $0x1d0] sm:$0xff]  ;;  %v308_v45 = vld [vmem:[%s1874_s9 + $0xf8] sm:$0xff]  ;;  %v1983_v49 = vld [vmem:[%s2557_s2] ss:$0 sm:$0xff] }
  0x85   : > { %v340_v46 = vld [vmem:[%s1874_s9 + $0x1f8] sm:$0xff]  ;;  %v339_v48 = vld [vmem:[%s1874_s9 + $0x1f0] sm:$0xff] }
  0x87   : > { %1322 = vmatpush1.bf16.msra.mxu0 %v1321_v26  ;;  %1370 = vmatpush1.bf16.msra.mxu1 %v1321_v26  ;;  %v330_v26 = vld [vmem:[%s1874_s9 + $0x1a8] sm:$0xff] }
  0x88   : > { %1323 = vmatprep.subr.bf16.mxu0 %v1698_v0  ;;  %1355 = vmatprep.subr.bf16.mxu1 %v1698_v0 }
  0x8b   : > { %1325 = vmatpush1.bf16.msra.mxu0 %v1324_v29  ;;  %1371 = vmatpush1.bf16.msra.mxu1 %v1324_v29  ;;  %v300_v29 = vld [vmem:[%s1874_s9 + $0xb8] sm:$0xff] }
  0x8c   : > { %1326 = vmatprep.subr.bf16.mxu0 %v1698_v0  ;;  %1356 = vmatprep.subr.bf16.mxu1 %v1698_v0 }
  0x8f   : > { %1328 = vmatpush1.bf16.msra.mxu0 %v1327_v32  ;;  %1372 = vmatpush1.bf16.msra.mxu1 %v1327_v32  ;;  %v331_v32 = vld [vmem:[%s1874_s9 + $0x1b0] sm:$0xff] }
  0x90   : > { %1329 = vmatprep.subr.bf16.mxu0 %v1698_v0  ;;  %1357 = vmatprep.subr.bf16.mxu1 %v1698_v0 }
  0x93   : > { %1331 = vmatpush1.bf16.msra.mxu0 %v1330_v35  ;;  %1373 = vmatpush1.bf16.msra.mxu1 %v1330_v35  ;;  %v301_v35 = vld [vmem:[%s1874_s9 + $0xc0] sm:$0xff] }
  0x94   : > { %1332 = vmatprep.subr.bf16.mxu0 %v1698_v0  ;;  %1358 = vmatprep.subr.bf16.mxu1 %v1698_v0 }
  0x97   : > { %1334 = vmatpush1.bf16.msra.mxu0 %v1333_v38  ;;  %1374 = vmatpush1.bf16.msra.mxu1 %v1333_v38  ;;  %v336_v38 = vld [vmem:[%s1874_s9 + $0x1d8] sm:$0xff] }
  0x98   : > { %1335 = vmatprep.subr.bf16.mxu0 %v1698_v0  ;;  %1359 = vmatprep.subr.bf16.mxu1 %v1698_v0 }
  0x9b   : > { %1337 = vmatpush1.bf16.msra.mxu0 %v1336_v41  ;;  %1375 = vmatpush1.bf16.msra.mxu1 %v1336_v41  ;;  %v306_v41 = vld [vmem:[%s1874_s9 + $0xe8] sm:$0xff] }
  0x9c   : > { %1338 = vmatprep.subr.bf16.mxu0 %v1698_v0  ;;  %1360 = vmatprep.subr.bf16.mxu1 %v1698_v0 }
  0x9f   : > { %1340 = vmatpush1.bf16.msra.mxu0 %v1339_v44  ;;  %1376 = vmatpush1.bf16.msra.mxu1 %v1339_v44  ;;  %v337_v44 = vld [vmem:[%s1874_s9 + $0x1e0] sm:$0xff] }
  0xa0   : > { %1341 = vmatprep.subr.bf16.mxu0 %v1698_v0  ;;  %1361 = vmatprep.subr.bf16.mxu1 %v1698_v0 }
  0xa3   : > { %1343 = vmatpush1.bf16.msra.mxu0 %v1342_v47  ;;  %1377 = vmatpush1.bf16.msra.mxu1 %v1342_v47  ;;  %v307_v47 = vld [vmem:[%s1874_s9 + $0xf0] sm:$0xff] }
  0xa4   : > { %1344 = vmatprep.subr.bf16.mxu0 %v1698_v0  ;;  %1362 = vmatprep.subr.bf16.mxu1 %v1698_v0  ;;  %v315_v0 = vld [vmem:[%s1874_s9 + $0x130] sm:$0xff] }
  0xa7   : > { %1346 = vmatpush1.bf16.msra.mxu0 %v1345_v50  ;;  %1378 = vmatpush1.bf16.msra.mxu1 %v1345_v50 }
  0xaa   : > { %445 = vmatmul.mubr.f32.vlgmr.msra.gmra.mrb[0].mxu0 %v277_v51  ;;  %525 = vmatmul.mubr.f32.vlgmr.msra.gmra.mrb[0].mxu1 %v309_v52 }
  0xab   : > { %529 = vmatprep.mubr.f32.mxu1 %v312_v53  ;;  %449 = vmatprep.mubr.f32.mxu0 %v280_v54 }
  0xae   : > { %530 = vmatmul.mubr.f32.gmra.mrb[2].mxu1 %v311_v55  ;;  %450 = vmatmul.mubr.f32.gmra.mrb[2].mxu0 %v279_v56 }
  0xaf   : > { %454 = vmatprep.mubr.f32.mxu0 %v282_v57  ;;  %534 = vmatprep.mubr.f32.mxu1 %v314_v58 }
  0xb2   : > { %455 = vmatmul.mubr.f32.gmra.mrb[4].mxu0 %v281_v59  ;;  %535 = vmatmul.mubr.f32.gmra.mrb[4].mxu1 %v313_v60 }
  0xb3   : > { %459 = vmatprep.mubr.f32.mxu0 %v284_v61  ;;  %539 = vmatprep.mubr.f32.mxu1 %v316_v62 }
  0xb6   : > { %460 = vmatmul.mubr.f32.gmra.mrb[6].mxu0 %v283_v63  ;;  %540 = vmatmul.mubr.f32.gmra.mrb[6].mxu1 %v315_v0 }
  0xb7   : > { %464 = vmatprep.mubr.f32.mxu0 %v286_v1  ;;  %544 = vmatprep.mubr.f32.mxu1 %v318_v2 }
  0xba   : > { %465 = vmatmul.mubr.f32.gmra.mrb[8].mxu0 %v285_v3  ;;  %545 = vmatmul.mubr.f32.gmra.mrb[8].mxu1 %v317_v4 }
  0xbb   : > { %469 = vmatprep.mubr.f32.mxu0 %v288_v5  ;;  %549 = vmatprep.mubr.f32.mxu1 %v320_v6 }
  0xbe   : > { %470 = vmatmul.mubr.f32.gmra.mrb[10].mxu0 %v287_v7  ;;  %550 = vmatmul.mubr.f32.gmra.mrb[10].mxu1 %v319_v8 }
  0xbf   : > { %474 = vmatprep.mubr.f32.mxu0 %v290_v9  ;;  %554 = vmatprep.mubr.f32.mxu1 %v322_v10 }
  0xc2   : > { %475 = vmatmul.mubr.f32.gmra.mrb[12].mxu0 %v289_v11  ;;  %555 = vmatmul.mubr.f32.gmra.mrb[12].mxu1 %v321_v12 }
  0xc3   : > { %479 = vmatprep.mubr.f32.mxu0 %v292_v13  ;;  %559 = vmatprep.mubr.f32.mxu1 %v324_v14 }
  0xc6   : > { %480 = vmatmul.mubr.f32.gmra.mrb[14].mxu0 %v291_v15  ;;  %560 = vmatmul.mubr.f32.gmra.mrb[14].mxu1 %v323_v16 }
  0xc7   : > { %484 = vmatprep.mubr.f32.mxu0 %v294_v17  ;;  %564 = vmatprep.mubr.f32.mxu1 %v326_v18 }
  0xca   : > { %485 = vmatmul.mubr.f32.gmra.mrb[16].mxu0 %v293_v19  ;;  %565 = vmatmul.mubr.f32.gmra.mrb[16].mxu1 %v325_v20 }
  0xcb   : > { %489 = vmatprep.mubr.f32.mxu0 %v296_v21  ;;  %569 = vmatprep.mubr.f32.mxu1 %v328_v22 }
  0xce   : > { %490 = vmatmul.mubr.f32.gmra.mrb[18].mxu0 %v295_v23  ;;  %570 = vmatmul.mubr.f32.gmra.mrb[18].mxu1 %v327_v24 }
  0xcf   : > { %494 = vmatprep.mubr.f32.mxu0 %v298_v25  ;;  %574 = vmatprep.mubr.f32.mxu1 %v330_v26 }
  0xd2   : > { %495 = vmatmul.mubr.f32.gmra.mrb[20].mxu0 %v297_v27  ;;  %575 = vmatmul.mubr.f32.gmra.mrb[20].mxu1 %v329_v28 }
  0xd3   : > { %499 = vmatprep.mubr.f32.mxu0 %v300_v29  ;;  %579 = vmatprep.mubr.f32.mxu1 %v332_v30 }
  0xd6   : > { %500 = vmatmul.mubr.f32.gmra.mrb[22].mxu0 %v299_v31  ;;  %580 = vmatmul.mubr.f32.gmra.mrb[22].mxu1 %v331_v32 }
  0xd7   : > { %504 = vmatprep.mubr.f32.mxu0 %v302_v33  ;;  %584 = vmatprep.mubr.f32.mxu1 %v334_v34 }
  0xda   : > { %505 = vmatmul.mubr.f32.gmra.mrb[24].mxu0 %v301_v35  ;;  %585 = vmatmul.mubr.f32.gmra.mrb[24].mxu1 %v333_v36 }
  0xdb   : > { %509 = vmatprep.mubr.f32.mxu0 %v304_v37  ;;  %589 = vmatprep.mubr.f32.mxu1 %v336_v38 }
  0xde   : > { %510 = vmatmul.mubr.f32.gmra.mrb[26].mxu0 %v303_v39  ;;  %590 = vmatmul.mubr.f32.gmra.mrb[26].mxu1 %v335_v40 }
  0xdf   : > { %514 = vmatprep.mubr.f32.mxu0 %v306_v41  ;;  %594 = vmatprep.mubr.f32.mxu1 %v338_v42 }
  0xe2   : > { %515 = vmatmul.mubr.f32.gmra.mrb[28].mxu0 %v305_v43  ;;  %595 = vmatmul.mubr.f32.gmra.mrb[28].mxu1 %v337_v44 }
  0xe3   : > { %519 = vmatprep.mubr.f32.mxu0 %v308_v45  ;;  %599 = vmatprep.mubr.f32.mxu1 %v340_v46 }
  0xe6   : > { %520 = vmatmul.mubr.f32.gmra.mrb[30].mxu0 %v307_v47  ;;  %600 = vmatmul.mubr.f32.gmra.mrb[30].mxu1 %v339_v48 }
 0x17d   : > { %v446_v50 = vpop.f32.mrb[0].mxu0  ;;  %v526_v51 = vpop.f32.mrb[0].mxu1 }
 0x17e   : > { %v447_v52 = vadd.f32 %v1983_v49, %v446_v50  ;;  %v528_v53 = vpop.f32.mrb[1].mxu1  ;;  %v448_v54 = vpop.f32.mrb[1].mxu0  ;;  %v527_v55 = vadd.f32 %v1983_v49, %v526_v51 }
 0x180   : > { %1436 = vtanh.f32 %v447_v52 }
 0x181   : > { %v531_v56 = vpop.f32.mrb[2].mxu1  ;;  %v451_v57 = vpop.f32.mrb[2].mxu0  ;;  %1438 = vtanh.f32 %v527_v55 }
 0x182   : > { %v532_v58 = vadd.f32 %v1983_v49, %v531_v56  ;;  %v452_v59 = vadd.f32 %v1983_v49, %v451_v57  ;;  %v533_v60 = vpop.f32.mrb[3].mxu1  ;;  %v453_v61 = vpop.f32.mrb[3].mxu0 }
 0x184   : > { %1440 = vtanh.f32 %v532_v58 }
 0x185   : > { %1442 = vtanh.f32 %v452_v59  ;;  %v456_v62 = vpop.f32.mrb[4].mxu0  ;;  %v536_v63 = vpop.f32.mrb[4].mxu1 }
 0x186   : > { %v458_v0 = vpop.f32.mrb[5].mxu0  ;;  %v538_v1 = vpop.f32.mrb[5].mxu1  ;;  %v457_v5 = vadd.f32 %v1983_v49, %v456_v62  ;;  %v537_v9 = vadd.f32 %v1983_v49, %v536_v63 }
 0x188   : > { %1444 = vtanh.f32 %v457_v5 }
 0x189   : > { %v461_v2 = vpop.f32.mrb[6].mxu0  ;;  %v541_v3 = vpop.f32.mrb[6].mxu1  ;;  %1446 = vtanh.f32 %v537_v9 }
 0x18a   : > { %v1989_v4 = vpop.eup %1436  ;;  %v463_v6 = vpop.f32.mrb[7].mxu0  ;;  %v462_v13 = vadd.f32 %v1983_v49, %v461_v2  ;;  %v542_v21 = vadd.f32 %v1983_v49, %v541_v3 }
 0x18b   : > { %v543_v7 = vpop.f32.mrb[7].mxu1  ;;  %637 = vadd.xlane.f32.xlu0 %v1989_v4  ;;  %v1993_v8 = vpop.eup %1438  ;;  %v701_v18 = vmul.f32 %v1989_v4, %v1989_v4 }
 0x18c   : > { %1448 = vtanh.f32 %v462_v13  ;;  %v717_v25 = vmul.f32 %v1993_v8, %v1993_v8 }
 0x18d   : > { %v466_v10 = vpop.f32.mrb[8].mxu0  ;;  %v546_v11 = vpop.f32.mrb[8].mxu1  ;;  %1450 = vtanh.f32 %v542_v21 }
 0x18e   : > { %v1996_v12 = vpop.eup %1440  ;;  %v468_v14 = vpop.f32.mrb[9].mxu0  ;;  %v467_v33 = vadd.f32 %v1983_v49, %v466_v10  ;;  %v547_v38 = vadd.f32 %v1983_v49, %v546_v11 }
 0x18f   : > { %v548_v15 = vpop.f32.mrb[9].mxu1  ;;  %v1999_v16 = vpop.eup %1442  ;;  %671 = vadd.xlane.f32.xlu1 %v1996_v12  ;;  %669 = vadd.xlane.f32.xlu0 %v1993_v8  ;;  %v718_v24 = vmul.f32 %v1996_v12, %v1996_v12 }
 0x190   : > { %v702_v17 = vmul.f32 %v1999_v16, %v1999_v16  ;;  %1452 = vtanh.f32 %v467_v33 }
 0x191   : > { %v471_v19 = vpop.f32.mrb[10].mxu0  ;;  %v551_v20 = vpop.f32.mrb[10].mxu1  ;;  %1454 = vtanh.f32 %v547_v38 }
 0x192   : > { %v473_v22 = vpop.f32.mrb[11].mxu0  ;;  %v553_v23 = vpop.f32.mrb[11].mxu1  ;;  %v472_v41 = vadd.f32 %v1983_v49, %v471_v19  ;;  %v552_v51 = vadd.f32 %v1983_v49, %v551_v20 }
 0x193   : > { %735 = vadd.xlane.f32.xlu1 %v702_v17  ;;  %733 = vadd.xlane.f32.xlu0 %v701_v18  ;;  %v2014_v30 = vpop.eup %1444 }
 0x194   : > { %v2019_v36 = vpop.eup %1446  ;;  %v703_v47 = vmul.f32 %v2014_v30, %v2014_v30  ;;  %1456 = vtanh.f32 %v472_v41 }
 0x195   : > { %v476_v26 = vpop.f32.mrb[12].mxu0  ;;  %v2012_v27 = vpop.f32.mrb[12].mxu1  ;;  %v719_v57 = vmul.f32 %v2019_v36, %v2019_v36  ;;  %1458 = vtanh.f32 %v552_v51 }
 0x196   : > { %v478_v28 = vpop.f32.mrb[13].mxu0  ;;  %v558_v29 = vpop.f32.mrb[13].mxu1  ;;  %v477_v5 = vadd.f32 %v1983_v49, %v476_v26  ;;  %v557_v14 = vadd.f32 %v1983_v49, %v2012_v27 }
 0x197   : > { %767 = vadd.xlane.f32.xlu1 %v718_v24  ;;  %765 = vadd.xlane.f32.xlu0 %v717_v25  ;;  %v2023_v37 = vpop.eup %1448 }
 0x198   : > { %v2035_v46 = vpop.eup %1450  ;;  %v704_v56 = vmul.f32 %v2023_v37, %v2023_v37  ;;  %1460 = vtanh.f32 %v477_v5 }
 0x199   : > { %v481_v31 = vpop.f32.mrb[14].mxu0  ;;  %v2016_v32 = vpop.f32.mrb[14].mxu1  ;;  %v720_v1 = vmul.f32 %v2035_v46, %v2035_v46  ;;  %1462 = vtanh.f32 %v557_v14 }
 0x19a   : > { %v483_v34 = vpop.f32.mrb[15].mxu0  ;;  %v563_v35 = vpop.f32.mrb[15].mxu1  ;;  %v482_v18 = vadd.f32 %v1983_v49, %v481_v31  ;;  %v562_v27 = vadd.f32 %v1983_v49, %v2016_v32 }
 0x19b   : > { %641 = vadd.xlane.f32.xlu1 %v2014_v30  ;;  %639 = vadd.xlane.f32.xlu0 %v1999_v16  ;;  %v2057_v0 = vpop.eup %1452 }
 0x19c   : > { %v2068_v11 = vpop.eup %1454  ;;  %v705_v24 = vmul.f32 %v2057_v0, %v2057_v0  ;;  %1464 = vtanh.f32 %v482_v18 }
 0x19d   : > { %v486_v39 = vpop.f32.mrb[16].mxu0  ;;  %v566_v40 = vpop.f32.mrb[16].mxu1  ;;  %v721_v35 = vmul.f32 %v2068_v11, %v2068_v11  ;;  %1466 = vtanh.f32 %v562_v27 }
 0x19e   : > { %v2028_v42 = vadd.f32 %v1983_v49, %v486_v39  ;;  %v488_v43 = vpop.f32.mrb[17].mxu0  ;;  %v2031_v44 = vadd.f32 %v1983_v49, %v566_v40  ;;  %v568_v45 = vpop.f32.mrb[17].mxu1 }
 0x19f   : > { %643 = vadd.xlane.f32.xlu1 %v2023_v37  ;;  %673 = vadd.xlane.f32.xlu0 %v2019_v36  ;;  %v2071_v13 = vpop.eup %1456 }
 0x1a0   : > { %v2084_v23 = vpop.eup %1458  ;;  %v706_v34 = vmul.f32 %v2071_v13, %v2071_v13  ;;  %1468 = vtanh.f32 %v2028_v42 }
 0x1a1   : > { %v491_v48 = vpop.f32.mrb[18].mxu0  ;;  %v571_v50 = vpop.f32.mrb[18].mxu1  ;;  %1470 = vtanh.f32 %v2031_v44 }
 0x1a2   : > { %v2041_v52 = vadd.f32 %v1983_v49, %v491_v48  ;;  %v493_v53 = vpop.f32.mrb[19].mxu0  ;;  %v2044_v54 = vadd.f32 %v1983_v49, %v571_v50  ;;  %v573_v55 = vpop.f32.mrb[19].mxu1 }
 0x1a3   : > { %675 = vadd.xlane.f32.xlu1 %v2035_v46  ;;  %737 = vadd.xlane.f32.xlu0 %v703_v47  ;;  %v2107_v45 = vpop.eup %1460  ;;  %v722_v47 = vmul.f32 %v2084_v23, %v2084_v23 }
 0x1a4   : > { %1472 = vtanh.f32 %v2041_v52 }
 0x1a5   : > { %v496_v58 = vpop.f32.mrb[20].mxu0  ;;  %v576_v59 = vpop.f32.mrb[20].mxu1  ;;  %1474 = vtanh.f32 %v2044_v54 }
 0x1a6   : > { %v2052_v60 = vadd.f32 %v1983_v49, %v496_v58  ;;  %v498_v61 = vpop.f32.mrb[21].mxu0  ;;  %v2055_v62 = vadd.f32 %v1983_v49, %v576_v59  ;;  %v578_v63 = vpop.f32.mrb[21].mxu1 }
 0x1a7   : > { %739 = vadd.xlane.f32.xlu1 %v704_v56  ;;  %769 = vadd.xlane.f32.xlu0 %v719_v57  ;;  %v2117_v57 = vpop.eup %1462 }
 0x1a8   : > { %v2120_v58 = vpop.eup %1464  ;;  %v723_v42 = vmul.f32 %v2117_v57, %v2117_v57  ;;  %1476 = vtanh.f32 %v2052_v60 }
 0x1a9   : > { %v501_v2 = vpop.f32.mrb[22].mxu0  ;;  %v581_v3 = vpop.f32.mrb[22].mxu1  ;;  %v708_v61 = vmul.f32 %v2120_v58, %v2120_v58  ;;  %1478 = vtanh.f32 %v2055_v62 }
 0x1aa   : > { %v2063_v6 = vadd.f32 %v1983_v49, %v501_v2  ;;  %v503_v7 = vpop.f32.mrb[23].mxu0  ;;  %v2066_v9 = vadd.f32 %v1983_v49, %v581_v3  ;;  %v583_v10 = vpop.f32.mrb[23].mxu1 }
 0x1ab   : > { %771 = vadd.xlane.f32.xlu1 %v720_v1  ;;  %645 = vadd.xlane.f32.xlu0 %v2057_v0  ;;  %v2125_v59 = vpop.eup %1466 }
 0x1ac   : > { %v2137_v63 = vpop.eup %1468  ;;  %v724_v44 = vmul.f32 %v2125_v59, %v2125_v59  ;;  %1480 = vtanh.f32 %v2063_v6 }
 0x1ad   : > { %v506_v15 = vpop.f32.mrb[24].mxu0  ;;  %v586_v17 = vpop.f32.mrb[24].mxu1  ;;  %v709_v2 = vmul.f32 %v2137_v63, %v2137_v63  ;;  %1482 = vtanh.f32 %v2066_v9 }
 0x1ae   : > { %v2077_v19 = vadd.f32 %v1983_v49, %v506_v15  ;;  %v508_v20 = vpop.f32.mrb[25].mxu0  ;;  %v2080_v21 = vadd.f32 %v1983_v49, %v586_v17  ;;  %v588_v22 = vpop.f32.mrb[25].mxu1 }
 0x1af   : > { %647 = vadd.xlane.f32.xlu1 %v2071_v13  ;;  %677 = vadd.xlane.f32.xlu0 %v2068_v11  ;;  %v2141_v1 = vpop.eup %1470 }
 0x1b0   : > { %v2144_v52 = vpop.eup %1472  ;;  %v725_v60 = vmul.f32 %v2141_v1, %v2141_v1  ;;  %1484 = vtanh.f32 %v2077_v19 }
 0x1b1   : > { %v511_v25 = vpop.f32.mrb[26].mxu0  ;;  %v591_v26 = vpop.f32.mrb[26].mxu1  ;;  %v710_v3 = vmul.f32 %v2144_v52, %v2144_v52  ;;  %1486 = vtanh.f32 %v2080_v21 }
 0x1b2   : > { %v2091_v28 = vadd.f32 %v1983_v49, %v511_v25  ;;  %v513_v29 = vpop.f32.mrb[27].mxu0  ;;  %v2094_v31 = vadd.f32 %v1983_v49, %v591_v26  ;;  %v593_v33 = vpop.f32.mrb[27].mxu1 }
 0x1b3   : > { %679 = vadd.xlane.f32.xlu1 %v2084_v23  ;;  %741 = vadd.xlane.f32.xlu0 %v705_v24  ;;  %v2149_v54 = vpop.eup %1474 }
 0x1b4   : > { %v2161_v5 = vpop.eup %1476  ;;  %v726_v62 = vmul.f32 %v2149_v54, %v2149_v54  ;;  %1488 = vtanh.f32 %v2091_v28 }
 0x1b5   : > { %v516_v38 = vpop.f32.mrb[28].mxu0  ;;  %v596_v39 = vpop.f32.mrb[28].mxu1  ;;  %v711_v10 = vmul.f32 %v2161_v5, %v2161_v5  ;;  %1490 = vtanh.f32 %v2094_v31 }
 0x1b6   : > { %v2102_v32 = vadd.f32 %v1983_v49, %v516_v38  ;;  %v518_v40 = vpop.f32.mrb[29].mxu0  ;;  %v2105_v41 = vadd.f32 %v1983_v49, %v596_v39  ;;  %v598_v43 = vpop.f32.mrb[29].mxu1 }
 0x1b7   : > { %743 = vadd.xlane.f32.xlu1 %v706_v34  ;;  %773 = vadd.xlane.f32.xlu0 %v721_v35  ;;  %v2165_v7 = vpop.eup %1478 }
 0x1b8   : > { %v2168_v6 = vpop.eup %1480  ;;  %v727_v15 = vmul.f32 %v2165_v7, %v2165_v7  ;;  %1492 = vtanh.f32 %v2102_v32 }
 0x1b9   : > { %v521_v48 = vpop.f32.mrb[30].mxu0  ;;  %v601_v50 = vpop.f32.mrb[30].mxu1  ;;  %v712_v14 = vmul.f32 %v2168_v6, %v2168_v6  ;;  %1494 = vtanh.f32 %v2105_v41 }
 0x1ba   : > { %v2112_v51 = vadd.f32 %v1983_v49, %v521_v48  ;;  %v523_v53 = vpop.f32.mrb[31].mxu0  ;;  %v2115_v55 = vadd.f32 %v1983_v49, %v601_v50  ;;  %v603_v56 = vpop.f32.mrb[31].mxu1  ;;  %v707_v49 = vmul.f32 %v2107_v45, %v2107_v45 }
 0x1bb   : > { %775 = vadd.xlane.f32.xlu1 %v722_v47  ;;  %649 = vadd.xlane.f32.xlu0 %v2107_v45  ;;  %v2173_v9 = vpop.eup %1482 }
 0x1bc   : > { %v2185_v17 = vpop.eup %1484  ;;  %v728_v18 = vmul.f32 %v2173_v9, %v2173_v9  ;;  %1496 = vtanh.f32 %v2112_v51 }
 0x1bd   : > { %v2189_v19 = vpop.eup %1486  ;;  %v713_v22 = vmul.f32 %v2185_v17, %v2185_v17  ;;  %1498 = vtanh.f32 %v2115_v55 }
 0x1be   : > { %v2192_v20 = vpop.eup %1488  ;;  %v729_v25 = vmul.f32 %v2189_v19, %v2189_v19 }
 0x1bf   : > { %651 = vadd.xlane.f32.xlu1 %v2120_v58  ;;  %681 = vadd.xlane.f32.xlu0 %v2117_v57  ;;  %v2197_v21 = vpop.eup %1490  ;;  %v714_v24 = vmul.f32 %v2192_v20, %v2192_v20 }
 0x1c0   : > { %v730_v27 = vmul.f32 %v2197_v21, %v2197_v21 }
 0x1c2   : > { %v2209_v26 = vpop.eup %1492 }
 0x1c3   : > { %683 = vadd.xlane.f32.xlu1 %v2125_v59  ;;  %745 = vadd.xlane.f32.xlu0 %v707_v49  ;;  %v2213_v28 = vpop.eup %1494  ;;  %v715_v33 = vmul.f32 %v2209_v26, %v2209_v26 }
 0x1c4   : > { %v731_v35 = vmul.f32 %v2213_v28, %v2213_v28 }
 0x1c6   : > { %v2216_v29 = vpop.eup %1496 }
 0x1c7   : > { %747 = vadd.xlane.f32.xlu1 %v708_v61  ;;  %777 = vadd.xlane.f32.xlu0 %v723_v42  ;;  %v2220_v31 = vpop.eup %1498  ;;  %v716_v34 = vmul.f32 %v2216_v29, %v2216_v29 }
 0x1c8   : > { %v732_v38 = vmul.f32 %v2220_v31, %v2220_v31 }
 0x1cb   : > { %779 = vadd.xlane.f32.xlu1 %v724_v44  ;;  %653 = vadd.xlane.f32.xlu0 %v2137_v63 }
 0x1cf   : > { %655 = vadd.xlane.f32.xlu1 %v2144_v52  ;;  %685 = vadd.xlane.f32.xlu0 %v2141_v1 }
 0x1d3   : > { %687 = vadd.xlane.f32.xlu1 %v2149_v54  ;;  %749 = vadd.xlane.f32.xlu0 %v709_v2 }
 0x1d7   : > { %751 = vadd.xlane.f32.xlu1 %v710_v3  ;;  %781 = vadd.xlane.f32.xlu0 %v725_v60 }
 0x1db   : > { %783 = vadd.xlane.f32.xlu1 %v726_v62  ;;  %657 = vadd.xlane.f32.xlu0 %v2161_v5 }
 0x1df   : > { %659 = vadd.xlane.f32.xlu1 %v2168_v6  ;;  %689 = vadd.xlane.f32.xlu0 %v2165_v7 }
 0x1e3   : > { %691 = vadd.xlane.f32.xlu1 %v2173_v9  ;;  %753 = vadd.xlane.f32.xlu0 %v711_v10 }
 0x1e7   : > { %755 = vadd.xlane.f32.xlu1 %v712_v14  ;;  %785 = vadd.xlane.f32.xlu0 %v727_v15 }
 0x1eb   : > { %787 = vadd.xlane.f32.xlu1 %v728_v18  ;;  %661 = vadd.xlane.f32.xlu0 %v2185_v17 }
 0x1ef   : > { %663 = vadd.xlane.f32.xlu1 %v2192_v20  ;;  %693 = vadd.xlane.f32.xlu0 %v2189_v19 }
 0x1f3   : > { %695 = vadd.xlane.f32.xlu1 %v2197_v21  ;;  %757 = vadd.xlane.f32.xlu0 %v713_v22 }
 0x1f7   : > { %759 = vadd.xlane.f32.xlu1 %v714_v24  ;;  %789 = vadd.xlane.f32.xlu0 %v729_v25 }
 0x1fb   : > { %791 = vadd.xlane.f32.xlu1 %v730_v27  ;;  %665 = vadd.xlane.f32.xlu0 %v2209_v26 }
 0x1ff   : > { %667 = vadd.xlane.f32.xlu1 %v2216_v29  ;;  %697 = vadd.xlane.f32.xlu0 %v2213_v28 }
 0x203   : > { %699 = vadd.xlane.f32.xlu1 %v2220_v31  ;;  %761 = vadd.xlane.f32.xlu0 %v715_v33 }
 0x207   : > { %763 = vadd.xlane.f32.xlu1 %v716_v34  ;;  %793 = vadd.xlane.f32.xlu0 %v731_v35 }
 0x20b   : > { %795 = vadd.xlane.f32.xlu1 %v732_v38 }
 0x218   : > { %v638_v39 = vpop.xlane.xlu0 %637 }
 0x219   : > { %v797_v41 = vmul.f32 0.0078125, %v638_v39 }
 0x21b   : > { %v861_v50 = vmul.f32 %v797_v41, %v797_v41  ;;  %v989_v39 = vsub.f32 %v1989_v4, %v797_v41  ;;  %v2250_v41 = vld [vmem:[%s2559_s4] ss:$0 sm:$0xff] }
 0x21c   : > { %v672_v32 = vpop.xlane.xlu1 %671  ;;  %v670_v40 = vpop.xlane.xlu0 %669 }
 0x21d   : > { %v814_v43 = vmul.f32 0.0078125, %v672_v32  ;;  %v813_v51 = vmul.f32 0.0078125, %v670_v40 }
 0x21f   : > { %v878_v56 = vmul.f32 %v814_v43, %v814_v43  ;;  %v877_v42 = vmul.f32 %v813_v51, %v813_v51  ;;  %v1006_v4 = vsub.f32 %v1996_v12, %v814_v43 }
 0x220   : > { %v736_v47 = vpop.xlane.xlu1 %735  ;;  %v734_v48 = vpop.xlane.xlu0 %733 }
 0x221   : > { %v829_v53 = vmul.f32 0.0078125, %v734_v48  ;;  %v830_v24 = vmul.f32 0.0078125, %v736_v47  ;;  %v2239_v47 = vld [vmem:[%s2558_s3] ss:$0 sm:$0xff] }
 0x223   : > { %v893_v55 = vsub.f32 %v829_v53, %v861_v50 }
 0x224   : > { %v768_v49 = vpop.xlane.xlu1 %767  ;;  %v766_v61 = vpop.xlane.xlu0 %765 }
 0x225   : > { %v925_v44 = vadd.f32 1e-05, %v893_v55  ;;  %v846_v2 = vmul.f32 0.0078125, %v768_v49  ;;  %v845_v3 = vmul.f32 0.0078125, %v766_v61 }
 0x227   : > { %1500 = vrsqrt.f32 %v925_v44  ;;  %v910_v60 = vsub.f32 %v846_v2, %v878_v56  ;;  %v909_v62 = vsub.f32 %v845_v3, %v877_v42  ;;  %v1005_v42 = vsub.f32 %v1993_v8, %v813_v51 }
 0x228   : > { %v642_v10 = vpop.xlane.xlu1 %641  ;;  %v640_v14 = vpop.xlane.xlu0 %639 }
 0x229   : > { %v942_v15 = vadd.f32 1e-05, %v910_v60  ;;  %v941_v18 = vadd.f32 1e-05, %v909_v62  ;;  %v798_v22 = vmul.f32 0.0078125, %v640_v14  ;;  %v2231_v34 = vmul.f32 0.0078125, %v642_v10 }
 0x22b   : > { %1502 = vrsqrt.f32 %v942_v15  ;;  %v862_v25 = vmul.f32 %v798_v22, %v798_v22  ;;  %v863_v53 = vmul.f32 %v2231_v34, %v2231_v34 }
 0x22c   : > { %1504 = vrsqrt.f32 %v941_v18  ;;  %v644_v27 = vpop.xlane.xlu1 %643  ;;  %v674_v33 = vpop.xlane.xlu0 %673 }
 0x22d   : > { %v894_v35 = vsub.f32 %v830_v24, %v862_v25  ;;  %v2234_v32 = vmul.f32 0.0078125, %v644_v27  ;;  %v2243_v55 = vmul.f32 0.0078125, %v674_v33 }
 0x22f   : > { %v926_v38 = vadd.f32 1e-05, %v894_v35  ;;  %v864_v2 = vmul.f32 %v2234_v32, %v2234_v32  ;;  %v879_v12 = vmul.f32 %v2243_v55, %v2243_v55 }
 0x230   : > { %v676_v40 = vpop.xlane.xlu1 %675  ;;  %v738_v48 = vpop.xlane.xlu0 %737 }
 0x231   : > { %v1501_v50 = vpop.eup %1500  ;;  %1506 = vrsqrt.f32 %v926_v38  ;;  %v831_v56 = vmul.f32 0.0078125, %v738_v48  ;;  %v2256_v3 = vmul.f32 0.0078125, %v676_v40 }
 0x232   : > { %v1021_v49 = vmul.f32 %v1501_v50, %v989_v39 }
 0x233   : > { %v895_v61 = vsub.f32 %v831_v56, %v863_v53  ;;  %v880_v35 = vmul.f32 %v2256_v3, %v2256_v3 }
 0x234   : > { %v1060_v44 = vmul.f32 %v2239_v47, %v1021_v49  ;;  %v740_v60 = vpop.xlane.xlu1 %739  ;;  %v770_v62 = vpop.xlane.xlu0 %769  ;;  %v990_v49 = vsub.f32 %v1999_v16, %v798_v22  ;;  %v991_v16 = vsub.f32 %v2014_v30, %v2231_v34  ;;  %v1007_v30 = vsub.f32 %v2019_v36, %v2243_v55 }
 0x235   : > { %v1503_v10 = vpop.eup %1502  ;;  %v927_v43 = vadd.f32 1e-05, %v895_v61  ;;  %v832_v14 = vmul.f32 0.0078125, %v740_v60  ;;  %v847_v15 = vmul.f32 0.0078125, %v770_v62 }
 0x236   : > { %v1505_v18 = vpop.eup %1504  ;;  %v1099_v24 = vadd.f32 %v2250_v41, %v1060_v44  ;;  %v1038_v8 = vmul.f32 %v1503_v10, %v1006_v4 }
 0x237   : > { %v1037_v51 = vmul.f32 %v1505_v18, %v1005_v42  ;;  %1508 = vrsqrt.f32 %v927_v43  ;;  %v896_v25 = vsub.f32 %v832_v14, %v864_v2  ;;  %v911_v27 = vsub.f32 %v847_v15, %v879_v12 }
 0x238   : > { %1131 = vst [vmem:[%s2261_s28] sm:$0xff] %v1099_v24  ;;  %v1077_v33 = vmul.f32 %v2239_v47, %v1038_v8  ;;  %v772_v38 = vpop.xlane.xlu1 %771  ;;  %v646_v39 = vpop.xlane.xlu0 %645 }
 0x239   : > { %v1076_v40 = vmul.f32 %v2239_v47, %v1037_v51  ;;  %v928_v48 = vadd.f32 1e-05, %v896_v25  ;;  %v943_v50 = vadd.f32 1e-05, %v911_v27  ;;  %v848_v53 = vmul.f32 0.0078125, %v772_v38 }
 0x23a   : > { %v1116_v56 = vadd.f32 %v2250_v41, %v1077_v33  ;;  %v2273_v10 = vmul.f32 0.0078125, %v646_v39  ;;  %v992_v27 = vsub.f32 %v2023_v37, %v2234_v32 }
 0x23b   : > { %v1507_v4 = vpop.eup %1506  ;;  %v1115_v61 = vadd.f32 %v2250_v41, %v1076_v40  ;;  %1510 = vrsqrt.f32 %v928_v48  ;;  %v912_v42 = vsub.f32 %v848_v53, %v880_v35 }
 0x23c   : > { %1148 = vst [vmem:[%s2261_s28 + $0x88] sm:$0xff] %v1116_v56  ;;  %v1022_v44 = vmul.f32 %v1507_v4, %v990_v49  ;;  %1512 = vrsqrt.f32 %v943_v50  ;;  %v648_v2 = vpop.xlane.xlu1 %647  ;;  %v678_v60 = vpop.xlane.xlu0 %677  ;;  %v865_v24 = vmul.f32 %v2273_v10, %v2273_v10 }
 0x23d   : > { %1147 = vst [vmem:[%s2261_s28 + $0x80] sm:$0xff] %v1115_v61  ;;  %v944_v62 = vadd.f32 1e-05, %v912_v42  ;;  %v2279_v43 = vmul.f32 0.0078125, %v648_v2  ;;  %v2283_v8 = vmul.f32 0.0078125, %v678_v60  ;;  %v1008_v42 = vsub.f32 %v2035_v46, %v2256_v3 }
 0x23e   : > { %v1061_v12 = vmul.f32 %v2239_v47, %v1022_v44 }
 0x23f   : > { %1514 = vrsqrt.f32 %v944_v62  ;;  %v866_v35 = vmul.f32 %v2279_v43, %v2279_v43  ;;  %v881_v50 = vmul.f32 %v2283_v8, %v2283_v8 }
 0x240   : > { %v1100_v22 = vadd.f32 %v2250_v41, %v1061_v12  ;;  %v680_v14 = vpop.xlane.xlu1 %679  ;;  %v742_v15 = vpop.xlane.xlu0 %741 }
 0x241   : > { %v1509_v18 = vpop.eup %1508  ;;  %v833_v51 = vmul.f32 0.0078125, %v742_v15  ;;  %v2293_v38 = vmul.f32 0.0078125, %v680_v14 }
 0x242   : > { %1132 = vst [vmem:[%s2261_s28 + $0x8] sm:$0xff] %v1100_v22  ;;  %v1023_v25 = vmul.f32 %v1509_v18, %v991_v16 }
 0x243   : > { %v897_v33 = vsub.f32 %v833_v51, %v865_v24  ;;  %v882_v2 = vmul.f32 %v2293_v38, %v2293_v38 }
 0x244   : > { %v1062_v34 = vmul.f32 %v2239_v47, %v1023_v25  ;;  %v744_v39 = vpop.xlane.xlu1 %743  ;;  %v774_v40 = vpop.xlane.xlu0 %773 }
 0x245   : > { %v1511_v48 = vpop.eup %1510  ;;  %v929_v53 = vadd.f32 1e-05, %v897_v33  ;;  %v834_v37 = vmul.f32 0.0078125, %v744_v39  ;;  %v849_v32 = vmul.f32 0.0078125, %v774_v40 }
 0x246   : > { %v1513_v56 = vpop.eup %1512  ;;  %v1101_v36 = vadd.f32 %v2250_v41, %v1062_v34  ;;  %v1024_v55 = vmul.f32 %v1511_v48, %v992_v27 }
 0x247   : > { %v1039_v49 = vmul.f32 %v1513_v56, %v1007_v30  ;;  %1516 = vrsqrt.f32 %v929_v53  ;;  %v898_v4 = vsub.f32 %v834_v37, %v866_v35  ;;  %v913_v61 = vsub.f32 %v849_v32, %v881_v50 }
 0x248   : > { %1133 = vst [vmem:[%s2261_s28 + $0x10] sm:$0xff] %v1101_v36  ;;  %v1063_v44 = vmul.f32 %v2239_v47, %v1024_v55  ;;  %v776_v60 = vpop.xlane.xlu1 %775  ;;  %v650_v62 = vpop.xlane.xlu0 %649  ;;  %v993_v35 = vsub.f32 %v2057_v0, %v2273_v10  ;;  %v994_v36 = vsub.f32 %v2071_v13, %v2279_v43 }
 0x249   : > { %v1515_v12 = vpop.eup %1514  ;;  %v1078_v16 = vmul.f32 %v2239_v47, %v1039_v49  ;;  %v930_v22 = vadd.f32 1e-05, %v898_v4  ;;  %v945_v14 = vadd.f32 1e-05, %v913_v61  ;;  %v850_v15 = vmul.f32 0.0078125, %v776_v60 }
 0x24a   : > { %v1102_v18 = vadd.f32 %v2250_v41, %v1063_v44  ;;  %v1040_v46 = vmul.f32 %v1515_v12, %v1008_v42  ;;  %v2310_v30 = vmul.f32 0.0078125, %v650_v62  ;;  %v1009_v49 = vsub.f32 %v2068_v11, %v2283_v8 }
 0x24b   : > { %v1117_v3 = vadd.f32 %v2250_v41, %v1078_v16  ;;  %1518 = vrsqrt.f32 %v930_v22  ;;  %v914_v24 = vsub.f32 %v850_v15, %v882_v2 }
 0x24c   : > { %1134 = vst [vmem:[%s2261_s28 + $0x18] sm:$0xff] %v1102_v18  ;;  %v1079_v51 = vmul.f32 %v2239_v47, %v1040_v46  ;;  %1520 = vrsqrt.f32 %v945_v14  ;;  %v652_v25 = vpop.xlane.xlu1 %651  ;;  %v682_v27 = vpop.xlane.xlu0 %681  ;;  %v867_v53 = vmul.f32 %v2310_v30, %v2310_v30  ;;  %v1010_v14 = vsub.f32 %v2084_v23, %v2293_v38 }
 0x24d   : > { %1149 = vst [vmem:[%s2261_s28 + $0x90] sm:$0xff] %v1117_v3  ;;  %v946_v33 = vadd.f32 1e-05, %v914_v24  ;;  %v2316_v39 = vmul.f32 0.0078125, %v652_v25  ;;  %v2320_v37 = vmul.f32 0.0078125, %v682_v27 }
 0x24e   : > { %v1118_v34 = vadd.f32 %v2250_v41, %v1079_v51 }
 0x24f   : > { %1522 = vrsqrt.f32 %v946_v33  ;;  %v868_v10 = vmul.f32 %v2316_v39, %v2316_v39  ;;  %v883_v2 = vmul.f32 %v2320_v37, %v2320_v37 }
 0x250   : > { %1150 = vst [vmem:[%s2261_s28 + $0x98] sm:$0xff] %v1118_v34  ;;  %v684_v40 = vpop.xlane.xlu1 %683  ;;  %v746_v48 = vpop.xlane.xlu0 %745 }
 0x251   : > { %v1517_v50 = vpop.eup %1516  ;;  %v835_v32 = vmul.f32 0.0078125, %v746_v48  ;;  %v2329_v4 = vmul.f32 0.0078125, %v684_v40 }
 0x252   : > { %v1025_v56 = vmul.f32 %v1517_v50, %v993_v35 }
 0x253   : > { %v899_v55 = vsub.f32 %v835_v32, %v867_v53  ;;  %v884_v18 = vmul.f32 %v2329_v4, %v2329_v4 }
 0x254   : > { %v1064_v0 = vmul.f32 %v2239_v47, %v1025_v56  ;;  %v748_v61 = vpop.xlane.xlu1 %747  ;;  %v778_v42 = vpop.xlane.xlu0 %777 }
 0x255   : > { %v1519_v44 = vpop.eup %1518  ;;  %v931_v60 = vadd.f32 1e-05, %v899_v55  ;;  %v836_v13 = vmul.f32 0.0078125, %v748_v61  ;;  %v851_v43 = vmul.f32 0.0078125, %v778_v42 }
 0x256   : > { %v1521_v62 = vpop.eup %1520  ;;  %v1103_v11 = vadd.f32 %v2250_v41, %v1064_v0  ;;  %v1026_v8 = vmul.f32 %v1519_v44, %v994_v36  ;;  %v995_v36 = vsub.f32 %v2107_v45, %v2310_v30 }
 0x257   : > { %v1041_v12 = vmul.f32 %v1521_v62, %v1009_v49  ;;  %1524 = vrsqrt.f32 %v931_v60  ;;  %v900_v16 = vsub.f32 %v836_v13, %v868_v10  ;;  %v915_v22 = vsub.f32 %v851_v43, %v883_v2 }
 0x258   : > { %1135 = vst [vmem:[%s2261_s28 + $0x20] sm:$0xff] %v1103_v11  ;;  %v1065_v15 = vmul.f32 %v2239_v47, %v1026_v8  ;;  %v780_v46 = vpop.xlane.xlu1 %779  ;;  %v654_v3 = vpop.xlane.xlu0 %653  ;;  %v996_v60 = vsub.f32 %v2120_v58, %v2316_v39  ;;  %v1011_v43 = vsub.f32 %v2117_v57, %v2320_v37 }
 0x259   : > { %v1523_v24 = vpop.eup %1522  ;;  %v1080_v51 = vmul.f32 %v2239_v47, %v1041_v12  ;;  %v932_v25 = vadd.f32 1e-05, %v900_v16  ;;  %v947_v27 = vadd.f32 1e-05, %v915_v22  ;;  %v852_v33 = vmul.f32 0.0078125, %v780_v46 }
 0x25a   : > { %v1104_v34 = vadd.f32 %v2250_v41, %v1065_v15  ;;  %v1042_v23 = vmul.f32 %v1523_v24, %v1010_v14  ;;  %v2346_v32 = vmul.f32 0.0078125, %v654_v3  ;;  %v1012_v3 = vsub.f32 %v2125_v59, %v2329_v4 }
 0x25b   : > { %v1119_v38 = vadd.f32 %v2250_v41, %v1080_v51  ;;  %1526 = vrsqrt.f32 %v932_v25  ;;  %v916_v35 = vsub.f32 %v852_v33, %v884_v18 }
 0x25c   : > { %1136 = vst [vmem:[%s2261_s28 + $0x28] sm:$0xff] %v1104_v34  ;;  %v1081_v40 = vmul.f32 %v2239_v47, %v1042_v23  ;;  %1528 = vrsqrt.f32 %v947_v27  ;;  %v656_v48 = vpop.xlane.xlu1 %655  ;;  %v686_v50 = vpop.xlane.xlu0 %685  ;;  %v869_v61 = vmul.f32 %v2346_v32, %v2346_v32 }
 0x25d   : > { %1151 = vst [vmem:[%s2261_s28 + $0xa0] sm:$0xff] %v1119_v38  ;;  %v948_v53 = vadd.f32 1e-05, %v916_v35  ;;  %v2352_v55 = vmul.f32 0.0078125, %v656_v48  ;;  %v2356_v42 = vmul.f32 0.0078125, %v686_v50 }
 0x25e   : > { %v1120_v56 = vadd.f32 %v2250_v41, %v1081_v40 }
 0x25f   : > { %1530 = vrsqrt.f32 %v948_v53  ;;  %v870_v30 = vmul.f32 %v2352_v55, %v2352_v55  ;;  %v885_v16 = vmul.f32 %v2356_v42, %v2356_v42 }
 0x260   : > { %1152 = vst [vmem:[%s2261_s28 + $0xa8] sm:$0xff] %v1120_v56  ;;  %v688_v49 = vpop.xlane.xlu1 %687  ;;  %v750_v0 = vpop.xlane.xlu0 %749 }
 0x261   : > { %v1525_v10 = vpop.eup %1524  ;;  %v837_v44 = vmul.f32 0.0078125, %v750_v0  ;;  %v2365_v62 = vmul.f32 0.0078125, %v688_v49 }
 0x262   : > { %v1027_v2 = vmul.f32 %v1525_v10, %v995_v36  ;;  %v997_v10 = vsub.f32 %v2137_v63, %v2346_v32 }
 0x263   : > { %v901_v13 = vsub.f32 %v837_v44, %v869_v61  ;;  %v886_v51 = vmul.f32 %v2365_v62, %v2365_v62 }
 0x264   : > { %v1066_v45 = vmul.f32 %v2239_v47, %v1027_v2  ;;  %v752_v11 = vpop.xlane.xlu1 %751  ;;  %v782_v8 = vpop.xlane.xlu0 %781 }
 0x265   : > { %v1527_v12 = vpop.eup %1526  ;;  %v933_v22 = vadd.f32 1e-05, %v901_v13  ;;  %v838_v58 = vmul.f32 0.0078125, %v752_v11  ;;  %v853_v39 = vmul.f32 0.0078125, %v782_v8  ;;  %v998_v11 = vsub.f32 %v2144_v52, %v2352_v55 }
 0x266   : > { %v1529_v14 = vpop.eup %1528  ;;  %v1105_v57 = vadd.f32 %v2250_v41, %v1066_v45  ;;  %v1028_v37 = vmul.f32 %v1527_v12, %v996_v60  ;;  %v1013_v12 = vsub.f32 %v2141_v1, %v2356_v42 }
 0x267   : > { %v1043_v15 = vmul.f32 %v1529_v14, %v1011_v43  ;;  %1532 = vrsqrt.f32 %v933_v22  ;;  %v902_v18 = vsub.f32 %v838_v58, %v870_v30  ;;  %v917_v46 = vsub.f32 %v853_v39, %v885_v16 }
 0x268   : > { %1137 = vst [vmem:[%s2261_s28 + $0x30] sm:$0xff] %v1105_v57  ;;  %v1067_v24 = vmul.f32 %v2239_v47, %v1028_v37  ;;  %v784_v25 = vpop.xlane.xlu1 %783  ;;  %v658_v27 = vpop.xlane.xlu0 %657 }
 0x269   : > { %v1531_v33 = vpop.eup %1530  ;;  %v1082_v34 = vmul.f32 %v2239_v47, %v1043_v15  ;;  %v934_v23 = vadd.f32 1e-05, %v902_v18  ;;  %v949_v38 = vadd.f32 1e-05, %v917_v46  ;;  %v854_v35 = vmul.f32 0.0078125, %v784_v25 }
 0x26a   : > { %v1106_v40 = vadd.f32 %v2250_v41, %v1067_v24  ;;  %v1044_v59 = vmul.f32 %v1531_v33, %v1012_v3  ;;  %v2382_v49 = vmul.f32 0.0078125, %v658_v27  ;;  %v1014_v3 = vsub.f32 %v2149_v54, %v2365_v62 }
 0x26b   : > { %v1121_v4 = vadd.f32 %v2250_v41, %v1082_v34  ;;  %1534 = vrsqrt.f32 %v934_v23  ;;  %v918_v48 = vsub.f32 %v854_v35, %v886_v51 }
 0x26c   : > { %1138 = vst [vmem:[%s2261_s28 + $0x38] sm:$0xff] %v1106_v40  ;;  %v1083_v50 = vmul.f32 %v2239_v47, %v1044_v59  ;;  %1536 = vrsqrt.f32 %v949_v38  ;;  %v660_v53 = vpop.xlane.xlu1 %659  ;;  %v690_v56 = vpop.xlane.xlu0 %689  ;;  %v871_v13 = vmul.f32 %v2382_v49, %v2382_v49 }
 0x26d   : > { %1153 = vst [vmem:[%s2261_s28 + $0xb0] sm:$0xff] %v1121_v4  ;;  %v950_v36 = vadd.f32 1e-05, %v918_v48  ;;  %v2388_v61 = vmul.f32 0.0078125, %v660_v53  ;;  %v2392_v43 = vmul.f32 0.0078125, %v690_v56 }
 0x26e   : > { %v1122_v0 = vadd.f32 %v2250_v41, %v1083_v50 }
 0x26f   : > { %1538 = vrsqrt.f32 %v950_v36  ;;  %v872_v32 = vmul.f32 %v2388_v61, %v2388_v61  ;;  %v887_v14 = vmul.f32 %v2392_v43, %v2392_v43 }
 0x270   : > { %1154 = vst [vmem:[%s2261_s28 + $0xb8] sm:$0xff] %v1122_v0  ;;  %v692_v44 = vpop.xlane.xlu1 %691  ;;  %v754_v2 = vpop.xlane.xlu0 %753  ;;  %v999_v0 = vsub.f32 %v2161_v5, %v2382_v49 }
 0x271   : > { %v1533_v60 = vpop.eup %1532  ;;  %v839_v45 = vmul.f32 0.0078125, %v754_v2  ;;  %v2401_v16 = vmul.f32 0.0078125, %v692_v44 }
 0x272   : > { %v1029_v30 = vmul.f32 %v1533_v60, %v997_v10 }
 0x273   : > { %v903_v8 = vsub.f32 %v839_v45, %v871_v13  ;;  %v888_v51 = vmul.f32 %v2401_v16, %v2401_v16 }
 0x274   : > { %v1068_v63 = vmul.f32 %v2239_v47, %v1029_v30  ;;  %v756_v22 = vpop.xlane.xlu1 %755  ;;  %v786_v58 = vpop.xlane.xlu0 %785 }
 0x275   : > { %v1535_v39 = vpop.eup %1534  ;;  %v935_v57 = vadd.f32 1e-05, %v903_v8  ;;  %v840_v52 = vmul.f32 0.0078125, %v756_v22  ;;  %v855_v55 = vmul.f32 0.0078125, %v786_v58  ;;  %v1000_v8 = vsub.f32 %v2168_v6, %v2388_v61 }
 0x276   : > { %v1537_v37 = vpop.eup %1536  ;;  %v1107_v1 = vadd.f32 %v2250_v41, %v1068_v63  ;;  %v1030_v42 = vmul.f32 %v1535_v39, %v998_v11  ;;  %v1015_v63 = vsub.f32 %v2165_v7, %v2392_v43 }
 0x277   : > { %v1045_v15 = vmul.f32 %v1537_v37, %v1013_v12  ;;  %1540 = vrsqrt.f32 %v935_v57  ;;  %v904_v18 = vsub.f32 %v840_v52, %v872_v32  ;;  %v919_v46 = vsub.f32 %v855_v55, %v887_v14 }
 0x278   : > { %1139 = vst [vmem:[%s2261_s28 + $0x40] sm:$0xff] %v1107_v1  ;;  %v1069_v24 = vmul.f32 %v2239_v47, %v1030_v42  ;;  %v788_v25 = vpop.xlane.xlu1 %787  ;;  %v662_v27 = vpop.xlane.xlu0 %661  ;;  %v1016_v42 = vsub.f32 %v2173_v9, %v2401_v16 }
 0x279   : > { %v1539_v33 = vpop.eup %1538  ;;  %v1084_v34 = vmul.f32 %v2239_v47, %v1045_v15  ;;  %v936_v23 = vadd.f32 1e-05, %v904_v18  ;;  %v951_v38 = vadd.f32 1e-05, %v919_v46  ;;  %v856_v35 = vmul.f32 0.0078125, %v788_v25 }
 0x27a   : > { %v1108_v40 = vadd.f32 %v2250_v41, %v1069_v24  ;;  %v1046_v54 = vmul.f32 %v1539_v33, %v1014_v3  ;;  %v2418_v56 = vmul.f32 0.0078125, %v662_v27 }
 0x27b   : > { %v1123_v62 = vadd.f32 %v2250_v41, %v1084_v34  ;;  %1542 = vrsqrt.f32 %v936_v23  ;;  %v920_v59 = vsub.f32 %v856_v35, %v888_v51 }
 0x27c   : > { %1140 = vst [vmem:[%s2261_s28 + $0x48] sm:$0xff] %v1108_v40  ;;  %v1085_v4 = vmul.f32 %v2239_v47, %v1046_v54  ;;  %1544 = vrsqrt.f32 %v951_v38  ;;  %v664_v48 = vpop.xlane.xlu1 %663  ;;  %v694_v50 = vpop.xlane.xlu0 %693  ;;  %v873_v13 = vmul.f32 %v2418_v56, %v2418_v56 }
 0x27d   : > { %1155 = vst [vmem:[%s2261_s28 + $0xc0] sm:$0xff] %v1123_v62  ;;  %v952_v53 = vadd.f32 1e-05, %v920_v59  ;;  %v2424_v10 = vmul.f32 0.0078125, %v664_v48  ;;  %v2428_v45 = vmul.f32 0.0078125, %v694_v50 }
 0x27e   : > { %v1124_v36 = vadd.f32 %v2250_v41, %v1085_v4  ;;  %v1001_v4 = vsub.f32 %v2185_v17, %v2418_v56 }
 0x27f   : > { %1546 = vrsqrt.f32 %v952_v53  ;;  %v874_v49 = vmul.f32 %v2424_v10, %v2424_v10  ;;  %v889_v14 = vmul.f32 %v2428_v45, %v2428_v45 }
 0x280   : > { %1156 = vst [vmem:[%s2261_s28 + $0xc8] sm:$0xff] %v1124_v36  ;;  %v696_v44 = vpop.xlane.xlu1 %695  ;;  %v758_v2 = vpop.xlane.xlu0 %757 }
 0x281   : > { %v1541_v60 = vpop.eup %1540  ;;  %v841_v30 = vmul.f32 0.0078125, %v758_v2  ;;  %v2437_v32 = vmul.f32 0.0078125, %v696_v44 }
 0x282   : > { %v1031_v11 = vmul.f32 %v1541_v60, %v999_v0 }
 0x283   : > { %v905_v12 = vsub.f32 %v841_v30, %v873_v13  ;;  %v890_v18 = vmul.f32 %v2437_v32, %v2437_v32  ;;  %v1002_v13 = vsub.f32 %v2192_v20, %v2424_v10 }
 0x284   : > { %v1070_v5 = vmul.f32 %v2239_v47, %v1031_v11  ;;  %v760_v22 = vpop.xlane.xlu1 %759  ;;  %v790_v58 = vpop.xlane.xlu0 %789  ;;  %v1017_v11 = vsub.f32 %v2189_v19, %v2428_v45  ;;  %v1018_v45 = vsub.f32 %v2197_v21, %v2437_v32 }
 0x285   : > { %v1543_v39 = vpop.eup %1542  ;;  %v937_v57 = vadd.f32 1e-05, %v905_v12  ;;  %v842_v6 = vmul.f32 0.0078125, %v760_v22  ;;  %v857_v61 = vmul.f32 0.0078125, %v790_v58 }
 0x286   : > { %v1545_v52 = vpop.eup %1544  ;;  %v1109_v7 = vadd.f32 %v2250_v41, %v1070_v5  ;;  %v1032_v43 = vmul.f32 %v1543_v39, %v1000_v8 }
 0x287   : > { %v1047_v55 = vmul.f32 %v1545_v52, %v1015_v63  ;;  %1548 = vrsqrt.f32 %v937_v57  ;;  %v906_v37 = vsub.f32 %v842_v6, %v874_v49  ;;  %v921_v1 = vsub.f32 %v857_v61, %v889_v14 }
 0x288   : > { %1141 = vst [vmem:[%s2261_s28 + $0x50] sm:$0xff] %v1109_v7  ;;  %v1071_v15 = vmul.f32 %v2239_v47, %v1032_v43  ;;  %v792_v46 = vpop.xlane.xlu1 %791  ;;  %v666_v3 = vpop.xlane.xlu0 %665 }
 0x289   : > { %v1547_v24 = vpop.eup %1546  ;;  %v1086_v51 = vmul.f32 %v2239_v47, %v1047_v55  ;;  %v938_v25 = vadd.f32 1e-05, %v906_v37  ;;  %v953_v27 = vadd.f32 1e-05, %v921_v1  ;;  %v858_v33 = vmul.f32 0.0078125, %v792_v46 }
 0x28a   : > { %v1110_v34 = vadd.f32 %v2250_v41, %v1071_v15  ;;  %v1048_v9 = vmul.f32 %v1547_v24, %v1016_v42  ;;  %v811_v62 = vmul.f32 0.0078125, %v666_v3 }
 0x28b   : > { %v1125_v16 = vadd.f32 %v2250_v41, %v1086_v51  ;;  %1550 = vrsqrt.f32 %v938_v25  ;;  %v922_v23 = vsub.f32 %v858_v33, %v890_v18 }
 0x28c   : > { %1142 = vst [vmem:[%s2261_s28 + $0x58] sm:$0xff] %v1110_v34  ;;  %v1087_v38 = vmul.f32 %v2239_v47, %v1048_v9  ;;  %1552 = vrsqrt.f32 %v953_v27  ;;  %v668_v35 = vpop.xlane.xlu1 %667  ;;  %v698_v40 = vpop.xlane.xlu0 %697  ;;  %v875_v0 = vmul.f32 %v811_v62, %v811_v62  ;;  %v1003_v51 = vsub.f32 %v2209_v26, %v811_v62 }
 0x28d   : > { %1157 = vst [vmem:[%s2261_s28 + $0xd0] sm:$0xff] %v1125_v16  ;;  %v954_v54 = vadd.f32 1e-05, %v922_v23  ;;  %v812_v48 = vmul.f32 0.0078125, %v668_v35  ;;  %v827_v44 = vmul.f32 0.0078125, %v698_v40 }
 0x28e   : > { %v1126_v59 = vadd.f32 %v2250_v41, %v1087_v38 }
 0x28f   : > { %1554 = vrsqrt.f32 %v954_v54  ;;  %v876_v12 = vmul.f32 %v812_v48, %v812_v48  ;;  %v891_v49 = vmul.f32 %v827_v44, %v827_v44  ;;  %v1004_v33 = vsub.f32 %v2216_v29, %v812_v48 }
 0x290   : > { %1158 = vst [vmem:[%s2261_s28 + $0xd8] sm:$0xff] %v1126_v59  ;;  %v700_v50 = vpop.xlane.xlu1 %699  ;;  %v762_v53 = vpop.xlane.xlu0 %761  ;;  %v1019_v16 = vsub.f32 %v2213_v28, %v827_v44 }
 0x291   : > { %v1549_v36 = vpop.eup %1548  ;;  %v843_v2 = vmul.f32 0.0078125, %v762_v53  ;;  %v828_v63 = vmul.f32 0.0078125, %v700_v50 }
 0x292   : > { %v1033_v60 = vmul.f32 %v1549_v36, %v1001_v4 }
 0x293   : > { %v907_v30 = vsub.f32 %v843_v2, %v875_v0  ;;  %v892_v52 = vmul.f32 %v828_v63, %v828_v63  ;;  %v1020_v26 = vsub.f32 %v2220_v31, %v828_v63 }
 0x294   : > { %v1072_v8 = vmul.f32 %v2239_v47, %v1033_v60  ;;  %v764_v17 = vpop.xlane.xlu1 %763  ;;  %v794_v56 = vpop.xlane.xlu0 %793 }
 0x295   : > { %v1551_v5 = vpop.eup %1550  ;;  %v939_v22 = vadd.f32 1e-05, %v907_v30  ;;  %v844_v58 = vmul.f32 0.0078125, %v764_v17  ;;  %v859_v39 = vmul.f32 0.0078125, %v794_v56 }
 0x296   : > { %v1553_v14 = vpop.eup %1552  ;;  %v1111_v57 = vadd.f32 %v2250_v41, %v1072_v8  ;;  %v1034_v20 = vmul.f32 %v1551_v5, %v1002_v13 }
 0x297   : > { %v1049_v10 = vmul.f32 %v1553_v14, %v1017_v11  ;;  %1556 = vrsqrt.f32 %v939_v22  ;;  %v908_v6 = vsub.f32 %v844_v58, %v876_v12  ;;  %v923_v19 = vsub.f32 %v859_v39, %v891_v49 }
 0x298   : > { %1143 = vst [vmem:[%s2261_s28 + $0x60] sm:$0xff] %v1111_v57  ;;  %v1073_v61 = vmul.f32 %v2239_v47, %v1034_v20  ;;  %v796_v7 = vpop.xlane.xlu1 %795 }
 0x299   : > { %v1555_v43 = vpop.eup %1554  ;;  %v1088_v55 = vmul.f32 %v2239_v47, %v1049_v10  ;;  %v940_v37 = vadd.f32 1e-05, %v908_v6  ;;  %v955_v1 = vadd.f32 1e-05, %v923_v19  ;;  %v860_v42 = vmul.f32 0.0078125, %v796_v7 }
 0x29a   : > { %v1112_v15 = vadd.f32 %v2250_v41, %v1073_v61  ;;  %v1050_v18 = vmul.f32 %v1555_v43, %v1018_v45 }
 0x29b   : > { %v1127_v46 = vadd.f32 %v2250_v41, %v1088_v55  ;;  %1558 = vrsqrt.f32 %v940_v37  ;;  %v924_v21 = vsub.f32 %v860_v42, %v892_v52 }
 0x29c   : > { %1144 = vst [vmem:[%s2261_s28 + $0x68] sm:$0xff] %v1112_v15  ;;  %v1089_v32 = vmul.f32 %v2239_v47, %v1050_v18  ;;  %1560 = vrsqrt.f32 %v955_v1 }
 0x29d   : > { %1159 = vst [vmem:[%s2261_s28 + $0xe0] sm:$0xff] %v1127_v46  ;;  %v956_v3 = vadd.f32 1e-05, %v924_v21 }
 0x29e   : > { %v1128_v24 = vadd.f32 %v2250_v41, %v1089_v32 }
 0x29f   : > { %1562 = vrsqrt.f32 %v956_v3 }
 0x2a0   : > { %1160 = vst [vmem:[%s2261_s28 + $0xe8] sm:$0xff] %v1128_v24 }
 0x2a1   : > { %v1557_v25 = vpop.eup %1556 }
 0x2a2   : > { %v1035_v27 = vmul.f32 %v1557_v25, %v1003_v51 }
 0x2a4   : > { %v1074_v34 = vmul.f32 %v2239_v47, %v1035_v27 }
 0x2a5   : > { %v1559_v9 = vpop.eup %1558 }
 0x2a6   : > { %v1561_v23 = vpop.eup %1560  ;;  %v1113_v38 = vadd.f32 %v2250_v41, %v1074_v34  ;;  %v1036_v35 = vmul.f32 %v1559_v9, %v1004_v33 }
 0x2a7   : > { %v1051_v40 = vmul.f32 %v1561_v23, %v1019_v16 }
 0x2a8   : > { %1145 = vst [vmem:[%s2261_s28 + $0x70] sm:$0xff] %v1113_v38  ;;  %v1075_v54 = vmul.f32 %v2239_v47, %v1036_v35 }
 0x2a9   : > { %v1563_v29 = vpop.eup %1562  ;;  %v1090_v62 = vmul.f32 %v2239_v47, %v1051_v40 }
 0x2aa   : > { %v1114_v59 = vadd.f32 %v2250_v41, %v1075_v54  ;;  %v1052_v4 = vmul.f32 %v1563_v29, %v1020_v26  ;;  %1170 = sbr.rel (!%p2575_p9) target bundleno = 717 (0x2cd), region = 52 }
 0x2ab   : > { %v1129_v28 = vadd.f32 %v2250_v41, %v1090_v62 }
 0x2ac   : > { %1146 = vst [vmem:[%s2261_s28 + $0x78] sm:$0xff] %v1114_v59  ;;  %v1091_v48 = vmul.f32 %v2239_v47, %v1052_v4 }
 0x2ad   : > { %1161 = vst [vmem:[%s2261_s28 + $0xf0] sm:$0xff] %v1129_v28 }
 0x2ae   : > { %v1130_v50 = vadd.f32 %v2250_v41, %v1091_v48 }
 0x2b0   : > { %1162 = vst [vmem:[%s2261_s28 + $0xf8] sm:$0xff] %v1130_v50 }
 0x2b1   : > { %s2584_s11 = smov (!%p1173_p10, %s1172_s11), 32 }
 0x2b2   : > { %s2496_s12 = sshll.u32 %s2584_s11, 7 }
 0x2b3   : > { %s1177_s14 = ssub.s32 4096, %s2496_s12 }
 0x2b4   : > { %1178 = vsyncadd %s1164_s23, %s1177_s14  ;;  %p1289_p1 = scmp.ne.s32.totalorder %s2496_s12, 0  ;;  %s1298_s30 = sshll.u32 %s1753_s22, 12 }
 0x2b5   : > { %s2506_s29 = scalar_lea.hbm %s2560_s5, %s1298_s30  ;;  %s1183_s7 = sshll.u32 %s2261_s28, 4  ;;  %s2509_s7 = int_to_ptr.vmem [resolvable:$true] %s1183_s7 }
 0x2b6   : > { %s1620_s10 = scalar_lea.vmem %s2509_s7, %s2496_s12  ;;  %s1699_s16 = smov [#allocation7]  }
 0x2b7   : > { %p1621_p4 = scmp.ne.s32.totalorder %s2509_s7, %s1620_s10  ;;  %s1624_s26 = sshll.u32 %s1699_s16, 4  ;;  %s1625_s26 = int_to_ptr.vmem [resolvable:$false] %s1624_s26 }
 0x2b8   : > { %s1626_s22 = scalar_lea.vmem %s1625_s26, 8192  ;;  %p1627_p12 = scmp.lt.s32.totalorder %s2509_s7, %s1625_s26 }
 0x2b9   : > { %p1622_p5 = pnand %p1621_p4, %p1289_p1  ;;  %p1628_p2 = scmp.lt.s32.totalorder %s1626_s22, %s1620_s10 }
 0x2bb   : > { %p1623_p11 = pneg %p1622_p5  ;;  %p1629_p3 = por %p1628_p2, %p1627_p12 }
 0x2bd   : > { %p1630_p13 = pnand %p1629_p3, %p1623_p11 }
 0x2bf   : > { %1633 = shalt.err (!%p1630_p13)
}
 0x2c0   : > { %s1634_s8 = scalar_lea.hbm %s2506_s29, %s2496_s12  ;;  %s1638_s25 = scalar_lea.hbm %s2560_s5, 8064 }
 0x2c1   : > { %p1635_p7 = scmp.ne.s32.totalorder %s2506_s29, %s1634_s8  ;;  %p1639_p9 = scmp.lt.u32.totalorder %s2506_s29, %s2560_s5 }
 0x2c2   : > { %p1640_p10 = scmp.lt.u32.totalorder %s1638_s25, %s1634_s8  ;;  %p1642_p5 = scmp.lt.u32.totalorder %s1634_s8, %s2506_s29 }
 0x2c3   : > { %p1636_p6 = pnand %p1635_p7, %p1289_p1 }
 0x2c4   : > { %p1641_p4 = por %p1640_p10, %p1639_p9 }
 0x2c5   : > { %p1637_p8 = pneg %p1636_p6 }
 0x2c6   : > { %p1643_p11 = por %p1642_p5, %p1641_p4 }
 0x2c8   : > { %p1644_p12 = pnand %p1643_p11, %p1637_p8 }
 0x2ca   : > { %1647 = shalt.err (!%p1644_p12)
}
 0x2cb   : > { %s1700_s30 = smov 128   ;;  %s1701_s15 = smov 8  }
 0x2cc   : > { %1189 = dma.vmem_to_hbm [thread:$0]  (%p1289_p1), %s2509_s7, %s2496_s12, %s2506_s29, %s1164_s23, %s1700_s30, %s1700_s30, %s1701_s15  }
 0x2cd PF: > { %s1198_s9 = sand.u32 1, %s1678_s18   ;;  %p2576_p2 = scmp.ne.s32.totalorder %s2567_s6, 0 }
 0x2ce   : > { %s1199_s10 = scalar_lea.sflag [#allocation4], %s1198_s9 }
 0x2cf   : > { %p1390_p3 = pnand %p1269_p0, %p2576_p2 }
 0x2d1   : > { %1673 = dma.done.wait (!%p1390_p3), %s1199_s10, 4096  }
 0x2d2   : > { %1675 = vsyncadd (!%p1390_p3), %s1199_s10, 4294963200  ;;  %p19_p13 = scmp.ge.s32.totalorder %s1757_s24, 4   ;;  %s2577_s18 = smov %s1682_s19 }
 0x2d3   : > { %s2578_s19 = smov %s1686_s20  ;;  %s2579_s20 = smov %s1769_s27 }
 0x2d4   : > { %s2580_s21 = smov %s1757_s24  ;;  %21 = sbr.rel (!%p19_p13) target bundleno = 6 (0x6), region = 89 }
 0x2db   :  { %1204 = vsyncpa [#allocation3], 1 }
 0x2dc   :  { %1206 = vsyncpa [#allocation3 + $0x1], 1 }
 0x2dd   :  { %1207 = vsyncpa [#allocation6], 1 }
 0x2de   :  { %1208 = vsyncpa [#allocation4], 1 }
 0x2df   :  { %1210 = vsyncpa [#allocation4 + $0x1], 1 }

// kernel: tpu_custom_call.1
= control target key start
LH: loop header
LB: loop body
LE: loop exit
PB: predicated region body
PF: predicated region fallthrough
CT: control target
= control target key end

     0   :  { %10 = vsyncpa [#allocation3], 0  ;;  %s2555_s0 = inlined_call_operand.hbm [shape: f32[500,256], index: 0, kind: input, shape index: {}]   ;;  %s2556_s1 = inlined_call_operand.hbm [shape: f32[256,128], index: 1, kind: input, shape index: {}]   ;;  %s2557_s2 = inlined_call_operand.vmem [shape: f32[1,128], index: 2, kind: input, shape index: {}]   ;;  %s2558_s3 = inlined_call_operand.vmem [shape: f32[1,128], index: 3, kind: input, shape index: {}]   ;;  %s2559_s4 = inlined_call_operand.vmem [shape: f32[1,128], index: 4, kind: input, shape index: {}]   ;;  %s2560_s5 = inlined_call_operand.hbm [shape: f32[500,128], index: 5, kind: output, shape index: {}]  }
   0x1   :  { %12 = vsyncpa [#allocation3 + $0x1], 0 }
   0x2   :  { %13 = vsyncpa [#allocation6], 0 }
   0x3   :  { %14 = vsyncpa [#allocation4], 0 }
   0x4   :  { %16 = vsyncpa [#allocation4 + $0x1], 0  ;;  %s1732_s18 = smov 0   ;;  %s1734_s19 = smov 0  }
   0x5   :  { %s1736_s20 = smov 0   ;;  %s1738_s21 = smov 0  }
   0x6 LB: > { %s1753_s22 = sadd.s32 4294967295, %s1690_s21   ;;  %s1266_s23 = sadd.s32 4294967294, %s1690_s21   ;;  %s1690_s21 = sphi %s1738_s21, %s2580_s21   ;;  %s1686_s20 = sphi %s1736_s20, %s2579_s20   ;;  %s1682_s19 = sphi %s1734_s19, %s2578_s19   ;;  %s1678_s18 = sphi %s1732_s18, %s2577_s18  }
   0x7   : > { %s1757_s24 = sadd.s32 1, %s1690_s21   ;;  %s29_s25 = sadd.s32 1, %s1686_s20 }
   0x8   : > { %s26_s26 = ssub.s32 %s1690_s21, %s1757_s24  ;;  %p36_p0 = scmp.ne.s32.totalorder %s1686_s20, %s1682_s19 }
   0x9   : > { %p27_p1 = scmp.eq.s32.totalorder %s26_s26, 0  ;;  %p37_p2 = scmp.eq.s32.totalorder %s1690_s21, 0 }
   0xa   : > { %p42_p3 = scmp.ne.s32.totalorder %s1682_s19, %s1678_s18  ;;  %p2561_p4 = scmp.eq.s32.totalorder %s1753_s22, 0 }
   0xb   : > { %s1769_s27 = scalar_select %p27_p1, %s1686_s20, %s29_s25  }
   0xc   : > { %p1771_p5 = por %p37_p2, %p36_p0  ;;  %p1777_p6 = por %p2561_p4, %p42_p3 }
   0xd   : > { %p150_p7 = scmp.eq.s32.totalorder %s1753_s22, 1  ;;  %p156_p8 = scmp.eq.s32.totalorder %s1266_s23, 1 }
   0xe   : > { %s2564_s28 = scalar_select %p1771_p5, 1, 0 }
   0xf   : > { %s2565_s29 = scalar_select %p1777_p6, 1, 0 }
  0x10   : > { %p1267_p9 = scmp.ge.s32.totalorder %s1690_s21, 1  ;;  %p163_p10 = scmp.lt.s32.totalorder %s1690_s21, 3 }
  0x11   : > { %p1784_p11 = por %p150_p7, %p36_p0  ;;  %p1788_p12 = por %p156_p8, %p42_p3 }
  0x12   : > { %p1792_p13 = pnand %p1267_p9, %p163_p10  ;;  %s1692_s8 = smov [#allocation5]  }
  0x13   : > { %s2566_s30 = scalar_select %p1784_p11, 1, 0 }
  0x14   : > { %s2567_s6 = scalar_select %p1788_p12, 1, 0 }
  0x15   : > { %s2568_s7 = scalar_select %p1792_p13, 1, 0 }
  0x16   : > { %p1385_p1 = pneg %p1792_p13  ;;  %s175_s9 = sshll.u32 %s1692_s8, 4  ;;  %s176_s9 = int_to_ptr.vmem [resolvable:$true] %s175_s9 }
  0x17   : > { %s1564_s13 = scalar_lea.hbm %s2556_s1, 4096 }
  0x18   : > { %p1800_p2 = pnand %p1385_p1, %p2561_p4  ;;  %p1565_p0 = scmp.ne.s32.totalorder %s2556_s1, %s1564_s13 }
  0x19   : > { %p1571_p9 = scmp.lt.u32.totalorder %s1564_s13, %s2556_s1 }
  0x1a   : > { %p1566_p3 = pneg %p1800_p2 }
  0x1c   : > { %p1567_p7 = pnand %p1566_p3, %p1565_p0 }
  0x1e   : > { %p1568_p8 = pneg %p1567_p7 }
  0x20   : > { %p1573_p10 = pnand %p1571_p9, %p1568_p8 }
  0x22   : > { %1576 = shalt.err (!%p1573_p10)
}
  0x23   : > { %s1577_s23 = scalar_lea.vmem %s176_s9, 4096  ;;  %p1585_p11 = scmp.lt.s32.totalorder %s176_s9, %s176_s9 }
  0x24   : > { %p1578_p1 = scmp.ne.s32.totalorder %s176_s9, %s1577_s23  ;;  %p1586_p6 = scmp.lt.s32.totalorder %s1577_s23, %s1577_s23 }
  0x26   : > { %p1580_p4 = pnand %p1578_p1, %p1566_p3  ;;  %p1587_p13 = por %p1586_p6, %p1585_p11 }
  0x28   : > { %p1581_p12 = pneg %p1580_p4 }
  0x2a   : > { %p1588_p5 = pnand %p1587_p13, %p1581_p12 }
  0x2c   : > { %1591 = shalt.err (!%p1588_p5)
}
  0x2d   : > { %s1693_s25 = smov 128   ;;  %s1694_s26 = smov 8  }
  0x2e   : > { %1388 = dma.hbm_to_vmem [thread:$0]  (!%p1800_p2), %s2556_s1, 4096, %s176_s9, [#allocation6], %s1693_s25, %s1693_s25, %s1694_s26  }
  0x2f   : > { %p1269_p0 = scmp.ge.s32.totalorder %s1690_s21, 2 }
  0x30   : > { %p2570_p4 = scmp.ne.s32.totalorder (!%p1269_p0), %s2564_s28, 0 }
  0x31   : > { %194 = sbr.rel (%p1269_p0) target bundleno = 91 (0x5b), region = 32 }
  0x38   : > { %197 = sbr.rel (!%p2570_p4) target bundleno = 91 (0x5b), region = 36  ;;  %s198_s12 = sand.u32 (%p2570_p4), 1, %s1686_s20  }
  0x39   : > { %s1271_s13 = sshll.u32 (%p2570_p4), %s1690_s21, 5  ;;  %s1270_s14 = sshll.u32 (%p2570_p4), %s198_s12, 9 }
  0x3a   : > { %s204_s15 = ssub.s32 (%p2570_p4), 63, %s1271_s13  ;;  %s1830_s16 = scalar_lea.sflag (%p2570_p4), [#allocation3], %s198_s12 }
  0x3b   : > { %p205_p5 = scmp.lt.s32.totalorder (%p2570_p4), %s204_s15, 32  ;;  %s202_s17 = scalar_lea.vmem (%p2570_p4), [#allocation2], %s1270_s14 }
  0x3f   : > { %s2582_s15 = smov (!%p205_p5, %s204_s15), 32 }
  0x40   : > { %s1827_s10 = sshll.u32 %s2582_s15, 8 }
  0x41   : > { %s210_s9 = ssub.s32 8192, %s1827_s10 }
  0x42   : > { %211 = vsyncadd %s1830_s16, %s210_s9  ;;  %p1274_p6 = scmp.ne.s32.totalorder %s1827_s10, 0  ;;  %s1297_s28 = sshll.u32 %s1690_s21, 13 }
  0x43   : > { %s1838_s26 = scalar_lea.hbm %s2555_s0, %s1297_s28  ;;  %s217_s8 = sshll.u32 %s202_s17, 4  ;;  %s1840_s8 = int_to_ptr.vmem [resolvable:$true] %s217_s8 }
  0x44   : > { %s1592_s11 = scalar_lea.hbm %s1838_s26, %s1827_s10  ;;  %s1596_s14 = scalar_lea.hbm %s2555_s0, 16128 }
  0x45   : > { %p1593_p11 = scmp.ne.s32.totalorder %s1838_s26, %s1592_s11  ;;  %p1597_p2 = scmp.lt.u32.totalorder %s1838_s26, %s2555_s0 }
  0x46   : > { %p1598_p3 = scmp.lt.u32.totalorder %s1596_s14, %s1592_s11  ;;  %p1600_p8 = scmp.lt.u32.totalorder %s1592_s11, %s1838_s26 }
  0x47   : > { %p1594_p12 = pnand %p1593_p11, %p1274_p6 }
  0x48   : > { %p1599_p7 = por %p1598_p3, %p1597_p2 }
  0x49   : > { %p1595_p13 = pneg %p1594_p12 }
  0x4a   : > { %p1601_p9 = por %p1600_p8, %p1599_p7 }
  0x4c   : > { %p1602_p10 = pnand %p1601_p9, %p1595_p13 }
  0x4e   : > { %1605 = shalt.err (!%p1602_p10)
}
  0x4f   : > { %s1606_s17 = scalar_lea.vmem %s1840_s8, %s1827_s10  ;;  %s1695_s28 = smov [#allocation2]  }
  0x50   : > { %p1607_p1 = scmp.ne.s32.totalorder %s1840_s8, %s1606_s17  ;;  %s1610_s23 = sshll.u32 %s1695_s28, 4  ;;  %s1611_s23 = int_to_ptr.vmem [resolvable:$false] %s1610_s23 }
  0x51   : > { %s1612_s25 = scalar_lea.vmem %s1611_s23, 16384  ;;  %p1613_p11 = scmp.lt.s32.totalorder %s1840_s8, %s1611_s23 }
  0x52   : > { %p1608_p4 = pnand %p1607_p1, %p1274_p6  ;;  %p1614_p12 = scmp.lt.s32.totalorder %s1612_s25, %s1606_s17 }
  0x54   : > { %p1609_p5 = pneg %p1608_p4  ;;  %p1615_p2 = por %p1614_p12, %p1613_p11 }
  0x56   : > { %p1616_p3 = pnand %p1615_p2, %p1609_p5 }
  0x58   : > { %1619 = shalt.err (!%p1616_p3)
}
  0x59   : > { %s1696_s11 = smov 256   ;;  %s1697_s12 = smov 16  }
  0x5a   : > { %223 = dma.hbm_to_vmem [thread:$0]  (%p1274_p6), %s1838_s26, %s1827_s10, %s1840_s8, %s1830_s16, %s1696_s11, %s1696_s11, %s1697_s12  }
  0x5b PF: > { %p2571_p13 = scmp.ne.s32.totalorder %s2568_s7, 0 }
  0x5c   : > { %s1870_s13 = sand.u32 (!%p2571_p13), 1, %s1682_s19   ;;  %p2572_p7 = scmp.ne.s32.totalorder (!%p2571_p13), %s2565_s29, 0 }
  0x5d   : > { %229 = sbr.rel (%p2571_p13) target bundleno = 717 (0x2cd), region = 40  ;;  %s1280_s14 = sshll.u32 (!%p2571_p13), %s1870_s13, 9 }
  0x5e   : > { %s232_s15 = scalar_lea.sflag (!%p2571_p13), [#allocation3], %s1870_s13  ;;  %s1874_s9 = scalar_lea.vmem (!%p2571_p13), [#allocation2], %s1280_s14 }
  0x64   : > { %1665 = dma.done.wait (%p2572_p7), %s232_s15, 8192  }
  0x65   : > { %1667 = vsyncadd (%p2572_p7), %s232_s15, 4294959104  ;;  %p2573_p6 = scmp.eq.s32.totalorder %s1753_s22, 0 }
  0x67   : > { %1669 = dma.done.wait (%p2573_p6), [#allocation6], 4096   ;;  %p2574_p8 = pmov %p2573_p6 }
  0x68   : > { %v1698_v0 = vmov 0.0|0.0   ;;  %v341_v1 = vld [vmem:[#allocation5] sm:$0xff]  ;;  %v342_v2 = vld [vmem:[#allocation5 + $0x8] sm:$0xff]  ;;  %v343_v3 = vld [vmem:[#allocation5 + $0x10] sm:$0xff]  ;;  %s1282_s26 = sshll.u32 %s1870_s13, 8  ;;  %s1164_s23 = scalar_lea.sflag [#allocation4], %s1870_s13 }
  0x69   : > { %1671 = vsyncadd (%p2574_p8), [#allocation6], 4294963200  ;;  %1299 = vmatprep.subr.bf16.mxu0 %v1698_v0  ;;  %1347 = vmatprep.subr.bf16.mxu1 %v1698_v0  ;;  %v1300_v4 = vpack.c.bf16 %v342_v2, %v341_v1  ;;  %v344_v5 = vld [vmem:[#allocation5 + $0x18] sm:$0xff]  ;;  %v345_v7 = vld [vmem:[#allocation5 + $0x20] sm:$0xff]  ;;  %s2261_s28 = scalar_lea.vmem [#allocation7], %s1282_s26  ;;  %p2575_p9 = scmp.ne.s32.totalorder %s2566_s30, 0 }
  0x6a   : > { %v1303_v6 = vpack.c.bf16 %v344_v5, %v343_v3  ;;  %v346_v8 = vld [vmem:[#allocation5 + $0x28] sm:$0xff]  ;;  %v347_v10 = vld [vmem:[#allocation5 + $0x30] sm:$0xff]  ;;  %v348_v11 = vld [vmem:[#allocation5 + $0x38] sm:$0xff]  ;;  %s1287_s25 = sshll.u32 (%p2575_p9), %s1753_s22, 5 }
  0x6b   : > { %1301 = vmatpush1.bf16.msra.mxu0 %v1300_v4  ;;  %1363 = vmatpush1.bf16.msra.mxu1 %v1300_v4  ;;  %v1306_v9 = vpack.c.bf16 %v346_v8, %v345_v7  ;;  %v278_v12 = vld [vmem:[%s1874_s9 + $0x8] sm:$0xff]  ;;  %v1309_v13 = vpack.c.bf16 %v348_v11, %v347_v10  ;;  %v349_v15 = vld [vmem:[#allocation5 + $0x40] sm:$0xff]  ;;  %v351_v18 = vld [vmem:[#allocation5 + $0x50] sm:$0xff]  ;;  %s1172_s11 = ssub.s32 (%p2575_p9), 63, %s1287_s25 }
  0x6c   : > { %1302 = vmatprep.subr.bf16.mxu0 %v1698_v0  ;;  %1348 = vmatprep.subr.bf16.mxu1 %v1698_v0  ;;  %v310_v14 = vld [vmem:[%s1874_s9 + $0x108] sm:$0xff]  ;;  %v352_v19 = vld [vmem:[#allocation5 + $0x58] sm:$0xff]  ;;  %v353_v21 = vld [vmem:[#allocation5 + $0x60] sm:$0xff]  ;;  %p1173_p10 = scmp.lt.s32.totalorder (%p2575_p9), %s1172_s11, 32 }
  0x6d   : > { %v350_v16 = vld [vmem:[#allocation5 + $0x48] sm:$0xff]  ;;  %444 = vmatprep.mubr.f32.mxu0 %v278_v12  ;;  %524 = vmatprep.mubr.f32.mxu1 %v310_v14  ;;  %v1315_v20 = vpack.c.bf16 %v352_v19, %v351_v18  ;;  %v355_v24 = vld [vmem:[#allocation5 + $0x70] sm:$0xff]  ;;  %v356_v25 = vld [vmem:[#allocation5 + $0x78] sm:$0xff] }
  0x6e   : > { %v1312_v17 = vpack.c.bf16 %v350_v16, %v349_v15  ;;  %v354_v22 = vld [vmem:[#allocation5 + $0x68] sm:$0xff]  ;;  %v1321_v26 = vpack.c.bf16 %v356_v25, %v355_v24  ;;  %v357_v27 = vld [vmem:[#allocation5 + $0x80] sm:$0xff]  ;;  %v359_v30 = vld [vmem:[#allocation5 + $0x90] sm:$0xff] }
  0x6f   : > { %1304 = vmatpush1.bf16.msra.mxu0 %v1303_v6  ;;  %1364 = vmatpush1.bf16.msra.mxu1 %v1303_v6  ;;  %v1318_v23 = vpack.c.bf16 %v354_v22, %v353_v21  ;;  %v358_v28 = vld [vmem:[#allocation5 + $0x88] sm:$0xff]  ;;  %v360_v31 = vld [vmem:[#allocation5 + $0x98] sm:$0xff]  ;;  %v361_v33 = vld [vmem:[#allocation5 + $0xa0] sm:$0xff] }
  0x70   : > { %1305 = vmatprep.subr.bf16.mxu0 %v1698_v0  ;;  %1349 = vmatprep.subr.bf16.mxu1 %v1698_v0  ;;  %v1324_v29 = vpack.c.bf16 %v358_v28, %v357_v27  ;;  %v1327_v32 = vpack.c.bf16 %v360_v31, %v359_v30  ;;  %v362_v34 = vld [vmem:[#allocation5 + $0xa8] sm:$0xff]  ;;  %v363_v36 = vld [vmem:[#allocation5 + $0xb0] sm:$0xff]  ;;  %v364_v37 = vld [vmem:[#allocation5 + $0xb8] sm:$0xff] }
  0x71   : > { %v1330_v35 = vpack.c.bf16 %v362_v34, %v361_v33  ;;  %v1333_v38 = vpack.c.bf16 %v364_v37, %v363_v36  ;;  %v365_v39 = vld [vmem:[#allocation5 + $0xc0] sm:$0xff]  ;;  %v366_v40 = vld [vmem:[#allocation5 + $0xc8] sm:$0xff]  ;;  %v367_v42 = vld [vmem:[#allocation5 + $0xd0] sm:$0xff] }
  0x72   : > { %v1336_v41 = vpack.c.bf16 %v366_v40, %v365_v39  ;;  %v368_v43 = vld [vmem:[#allocation5 + $0xd8] sm:$0xff]  ;;  %v369_v45 = vld [vmem:[#allocation5 + $0xe0] sm:$0xff]  ;;  %v370_v46 = vld [vmem:[#allocation5 + $0xe8] sm:$0xff] }
  0x73   : > { %1307 = vmatpush1.bf16.msra.mxu0 %v1306_v9  ;;  %1365 = vmatpush1.bf16.msra.mxu1 %v1306_v9  ;;  %v1339_v44 = vpack.c.bf16 %v368_v43, %v367_v42  ;;  %v1342_v47 = vpack.c.bf16 %v370_v46, %v369_v45  ;;  %v371_v48 = vld [vmem:[#allocation5 + $0xf0] sm:$0xff]  ;;  %v372_v49 = vld [vmem:[#allocation5 + $0xf8] sm:$0xff]  ;;  %v277_v51 = vld [vmem:[%s1874_s9] sm:$0xff] }
  0x74   : > { %1308 = vmatprep.subr.bf16.mxu0 %v1698_v0  ;;  %1350 = vmatprep.subr.bf16.mxu1 %v1698_v0  ;;  %v1345_v50 = vpack.c.bf16 %v372_v49, %v371_v48  ;;  %v309_v52 = vld [vmem:[%s1874_s9 + $0x100] sm:$0xff]  ;;  %v312_v53 = vld [vmem:[%s1874_s9 + $0x118] sm:$0xff]  ;;  %v311_v55 = vld [vmem:[%s1874_s9 + $0x110] sm:$0xff] }
  0x75   : > { %v280_v54 = vld [vmem:[%s1874_s9 + $0x18] sm:$0xff]  ;;  %v279_v56 = vld [vmem:[%s1874_s9 + $0x10] sm:$0xff]  ;;  %v282_v57 = vld [vmem:[%s1874_s9 + $0x28] sm:$0xff] }
  0x76   : > { %v314_v58 = vld [vmem:[%s1874_s9 + $0x128] sm:$0xff]  ;;  %v281_v59 = vld [vmem:[%s1874_s9 + $0x20] sm:$0xff]  ;;  %v284_v61 = vld [vmem:[%s1874_s9 + $0x38] sm:$0xff] }
  0x77   : > { %1310 = vmatpush1.bf16.msra.mxu0 %v1309_v13  ;;  %1366 = vmatpush1.bf16.msra.mxu1 %v1309_v13  ;;  %v313_v60 = vld [vmem:[%s1874_s9 + $0x120] sm:$0xff]  ;;  %v316_v62 = vld [vmem:[%s1874_s9 + $0x138] sm:$0xff]  ;;  %v283_v63 = vld [vmem:[%s1874_s9 + $0x30] sm:$0xff] }
  0x78   : > { %1311 = vmatprep.subr.bf16.mxu0 %v1698_v0  ;;  %1351 = vmatprep.subr.bf16.mxu1 %v1698_v0  ;;  %v286_v1 = vld [vmem:[%s1874_s9 + $0x48] sm:$0xff]  ;;  %v285_v3 = vld [vmem:[%s1874_s9 + $0x40] sm:$0xff]  ;;  %v288_v5 = vld [vmem:[%s1874_s9 + $0x58] sm:$0xff] }
  0x79   : > { %v318_v2 = vld [vmem:[%s1874_s9 + $0x148] sm:$0xff]  ;;  %v317_v4 = vld [vmem:[%s1874_s9 + $0x140] sm:$0xff]  ;;  %v320_v6 = vld [vmem:[%s1874_s9 + $0x158] sm:$0xff] }
  0x7a   : > { %v287_v7 = vld [vmem:[%s1874_s9 + $0x50] sm:$0xff]  ;;  %v290_v9 = vld [vmem:[%s1874_s9 + $0x68] sm:$0xff]  ;;  %v289_v11 = vld [vmem:[%s1874_s9 + $0x60] sm:$0xff] }
  0x7b   : > { %1313 = vmatpush1.bf16.msra.mxu0 %v1312_v17  ;;  %1367 = vmatpush1.bf16.msra.mxu1 %v1312_v17  ;;  %v319_v8 = vld [vmem:[%s1874_s9 + $0x150] sm:$0xff]  ;;  %v322_v10 = vld [vmem:[%s1874_s9 + $0x168] sm:$0xff]  ;;  %v321_v12 = vld [vmem:[%s1874_s9 + $0x160] sm:$0xff] }
  0x7c   : > { %1314 = vmatprep.subr.bf16.mxu0 %v1698_v0  ;;  %1352 = vmatprep.subr.bf16.mxu1 %v1698_v0  ;;  %v292_v13 = vld [vmem:[%s1874_s9 + $0x78] sm:$0xff]  ;;  %v291_v15 = vld [vmem:[%s1874_s9 + $0x70] sm:$0xff]  ;;  %v294_v17 = vld [vmem:[%s1874_s9 + $0x88] sm:$0xff] }
  0x7d   : > { %v324_v14 = vld [vmem:[%s1874_s9 + $0x178] sm:$0xff]  ;;  %v323_v16 = vld [vmem:[%s1874_s9 + $0x170] sm:$0xff]  ;;  %v326_v18 = vld [vmem:[%s1874_s9 + $0x188] sm:$0xff] }
  0x7e   : > { %v293_v19 = vld [vmem:[%s1874_s9 + $0x80] sm:$0xff]  ;;  %v296_v21 = vld [vmem:[%s1874_s9 + $0x98] sm:$0xff]  ;;  %v327_v24 = vld [vmem:[%s1874_s9 + $0x190] sm:$0xff] }
  0x7f   : > { %1316 = vmatpush1.bf16.msra.mxu0 %v1315_v20  ;;  %1368 = vmatpush1.bf16.msra.mxu1 %v1315_v20  ;;  %v325_v20 = vld [vmem:[%s1874_s9 + $0x180] sm:$0xff]  ;;  %v328_v22 = vld [vmem:[%s1874_s9 + $0x198] sm:$0xff]  ;;  %v298_v25 = vld [vmem:[%s1874_s9 + $0xa8] sm:$0xff] }
  0x80   : > { %1317 = vmatprep.subr.bf16.mxu0 %v1698_v0  ;;  %1353 = vmatprep.subr.bf16.mxu1 %v1698_v0  ;;  %v297_v27 = vld [vmem:[%s1874_s9 + $0xa0] sm:$0xff]  ;;  %v332_v30 = vld [vmem:[%s1874_s9 + $0x1b8] sm:$0xff]  ;;  %v299_v31 = vld [vmem:[%s1874_s9 + $0xb0] sm:$0xff] }
  0x81   : > { %v329_v28 = vld [vmem:[%s1874_s9 + $0x1a0] sm:$0xff]  ;;  %v302_v33 = vld [vmem:[%s1874_s9 + $0xc8] sm:$0xff]  ;;  %v304_v37 = vld [vmem:[%s1874_s9 + $0xd8] sm:$0xff] }
  0x82   : > { %v334_v34 = vld [vmem:[%s1874_s9 + $0x1c8] sm:$0xff]  ;;  %v333_v36 = vld [vmem:[%s1874_s9 + $0x1c0] sm:$0xff]  ;;  %v303_v39 = vld [vmem:[%s1874_s9 + $0xd0] sm:$0xff] }
  0x83   : > { %1319 = vmatpush1.bf16.msra.mxu0 %v1318_v23  ;;  %1369 = vmatpush1.bf16.msra.mxu1 %v1318_v23  ;;  %v295_v23 = vld [vmem:[%s1874_s9 + $0x90] sm:$0xff]  ;;  %v338_v42 = vld [vmem:[%s1874_s9 + $0x1e8] sm:$0xff]  ;;  %v305_v43 = vld [vmem:[%s1874_s9 + $0xe0] sm:$0xff] }
  0x84   : > { %1320 = vmatprep.subr.bf16.mxu0 %v1698_v0  ;;  %1354 = vmatprep.subr.bf16.mxu1 %v1698_v0  ;;  %v335_v40 = vld [vmem:[%s1874_s9 + $0x1d0] sm:$0xff]  ;;  %v308_v45 = vld [vmem:[%s1874_s9 + $0xf8] sm:$0xff]  ;;  %v1983_v49 = vld [vmem:[%s2557_s2] ss:$0 sm:$0xff] }
  0x85   : > { %v340_v46 = vld [vmem:[%s1874_s9 + $0x1f8] sm:$0xff]  ;;  %v339_v48 = vld [vmem:[%s1874_s9 + $0x1f0] sm:$0xff] }
  0x87   : > { %1322 = vmatpush1.bf16.msra.mxu0 %v1321_v26  ;;  %1370 = vmatpush1.bf16.msra.mxu1 %v1321_v26  ;;  %v330_v26 = vld [vmem:[%s1874_s9 + $0x1a8] sm:$0xff] }
  0x88   : > { %1323 = vmatprep.subr.bf16.mxu0 %v1698_v0  ;;  %1355 = vmatprep.subr.bf16.mxu1 %v1698_v0 }
  0x8b   : > { %1325 = vmatpush1.bf16.msra.mxu0 %v1324_v29  ;;  %1371 = vmatpush1.bf16.msra.mxu1 %v1324_v29  ;;  %v300_v29 = vld [vmem:[%s1874_s9 + $0xb8] sm:$0xff] }
  0x8c   : > { %1326 = vmatprep.subr.bf16.mxu0 %v1698_v0  ;;  %1356 = vmatprep.subr.bf16.mxu1 %v1698_v0 }
  0x8f   : > { %1328 = vmatpush1.bf16.msra.mxu0 %v1327_v32  ;;  %1372 = vmatpush1.bf16.msra.mxu1 %v1327_v32  ;;  %v331_v32 = vld [vmem:[%s1874_s9 + $0x1b0] sm:$0xff] }
  0x90   : > { %1329 = vmatprep.subr.bf16.mxu0 %v1698_v0  ;;  %1357 = vmatprep.subr.bf16.mxu1 %v1698_v0 }
  0x93   : > { %1331 = vmatpush1.bf16.msra.mxu0 %v1330_v35  ;;  %1373 = vmatpush1.bf16.msra.mxu1 %v1330_v35  ;;  %v301_v35 = vld [vmem:[%s1874_s9 + $0xc0] sm:$0xff] }
  0x94   : > { %1332 = vmatprep.subr.bf16.mxu0 %v1698_v0  ;;  %1358 = vmatprep.subr.bf16.mxu1 %v1698_v0 }
  0x97   : > { %1334 = vmatpush1.bf16.msra.mxu0 %v1333_v38  ;;  %1374 = vmatpush1.bf16.msra.mxu1 %v1333_v38  ;;  %v336_v38 = vld [vmem:[%s1874_s9 + $0x1d8] sm:$0xff] }
  0x98   : > { %1335 = vmatprep.subr.bf16.mxu0 %v1698_v0  ;;  %1359 = vmatprep.subr.bf16.mxu1 %v1698_v0 }
  0x9b   : > { %1337 = vmatpush1.bf16.msra.mxu0 %v1336_v41  ;;  %1375 = vmatpush1.bf16.msra.mxu1 %v1336_v41  ;;  %v306_v41 = vld [vmem:[%s1874_s9 + $0xe8] sm:$0xff] }
  0x9c   : > { %1338 = vmatprep.subr.bf16.mxu0 %v1698_v0  ;;  %1360 = vmatprep.subr.bf16.mxu1 %v1698_v0 }
  0x9f   : > { %1340 = vmatpush1.bf16.msra.mxu0 %v1339_v44  ;;  %1376 = vmatpush1.bf16.msra.mxu1 %v1339_v44  ;;  %v337_v44 = vld [vmem:[%s1874_s9 + $0x1e0] sm:$0xff] }
  0xa0   : > { %1341 = vmatprep.subr.bf16.mxu0 %v1698_v0  ;;  %1361 = vmatprep.subr.bf16.mxu1 %v1698_v0 }
  0xa3   : > { %1343 = vmatpush1.bf16.msra.mxu0 %v1342_v47  ;;  %1377 = vmatpush1.bf16.msra.mxu1 %v1342_v47  ;;  %v307_v47 = vld [vmem:[%s1874_s9 + $0xf0] sm:$0xff] }
  0xa4   : > { %1344 = vmatprep.subr.bf16.mxu0 %v1698_v0  ;;  %1362 = vmatprep.subr.bf16.mxu1 %v1698_v0  ;;  %v315_v0 = vld [vmem:[%s1874_s9 + $0x130] sm:$0xff] }
  0xa7   : > { %1346 = vmatpush1.bf16.msra.mxu0 %v1345_v50  ;;  %1378 = vmatpush1.bf16.msra.mxu1 %v1345_v50 }
  0xaa   : > { %445 = vmatmul.mubr.f32.vlgmr.msra.gmra.mrb[0].mxu0 %v277_v51  ;;  %525 = vmatmul.mubr.f32.vlgmr.msra.gmra.mrb[0].mxu1 %v309_v52 }
  0xab   : > { %529 = vmatprep.mubr.f32.mxu1 %v312_v53  ;;  %449 = vmatprep.mubr.f32.mxu0 %v280_v54 }
  0xae   : > { %530 = vmatmul.mubr.f32.gmra.mrb[2].mxu1 %v311_v55  ;;  %450 = vmatmul.mubr.f32.gmra.mrb[2].mxu0 %v279_v56 }
  0xaf   : > { %454 = vmatprep.mubr.f32.mxu0 %v282_v57  ;;  %534 = vmatprep.mubr.f32.mxu1 %v314_v58 }
  0xb2   : > { %455 = vmatmul.mubr.f32.gmra.mrb[4].mxu0 %v281_v59  ;;  %535 = vmatmul.mubr.f32.gmra.mrb[4].mxu1 %v313_v60 }
  0xb3   : > { %459 = vmatprep.mubr.f32.mxu0 %v284_v61  ;;  %539 = vmatprep.mubr.f32.mxu1 %v316_v62 }
  0xb6   : > { %460 = vmatmul.mubr.f32.gmra.mrb[6].mxu0 %v283_v63  ;;  %540 = vmatmul.mubr.f32.gmra.mrb[6].mxu1 %v315_v0 }
  0xb7   : > { %464 = vmatprep.mubr.f32.mxu0 %v286_v1  ;;  %544 = vmatprep.mubr.f32.mxu1 %v318_v2 }
  0xba   : > { %465 = vmatmul.mubr.f32.gmra.mrb[8].mxu0 %v285_v3  ;;  %545 = vmatmul.mubr.f32.gmra.mrb[8].mxu1 %v317_v4 }
  0xbb   : > { %469 = vmatprep.mubr.f32.mxu0 %v288_v5  ;;  %549 = vmatprep.mubr.f32.mxu1 %v320_v6 }
  0xbe   : > { %470 = vmatmul.mubr.f32.gmra.mrb[10].mxu0 %v287_v7  ;;  %550 = vmatmul.mubr.f32.gmra.mrb[10].mxu1 %v319_v8 }
  0xbf   : > { %474 = vmatprep.mubr.f32.mxu0 %v290_v9  ;;  %554 = vmatprep.mubr.f32.mxu1 %v322_v10 }
  0xc2   : > { %475 = vmatmul.mubr.f32.gmra.mrb[12].mxu0 %v289_v11  ;;  %555 = vmatmul.mubr.f32.gmra.mrb[12].mxu1 %v321_v12 }
  0xc3   : > { %479 = vmatprep.mubr.f32.mxu0 %v292_v13  ;;  %559 = vmatprep.mubr.f32.mxu1 %v324_v14 }
  0xc6   : > { %480 = vmatmul.mubr.f32.gmra.mrb[14].mxu0 %v291_v15  ;;  %560 = vmatmul.mubr.f32.gmra.mrb[14].mxu1 %v323_v16 }
  0xc7   : > { %484 = vmatprep.mubr.f32.mxu0 %v294_v17  ;;  %564 = vmatprep.mubr.f32.mxu1 %v326_v18 }
  0xca   : > { %485 = vmatmul.mubr.f32.gmra.mrb[16].mxu0 %v293_v19  ;;  %565 = vmatmul.mubr.f32.gmra.mrb[16].mxu1 %v325_v20 }
  0xcb   : > { %489 = vmatprep.mubr.f32.mxu0 %v296_v21  ;;  %569 = vmatprep.mubr.f32.mxu1 %v328_v22 }
  0xce   : > { %490 = vmatmul.mubr.f32.gmra.mrb[18].mxu0 %v295_v23  ;;  %570 = vmatmul.mubr.f32.gmra.mrb[18].mxu1 %v327_v24 }
  0xcf   : > { %494 = vmatprep.mubr.f32.mxu0 %v298_v25  ;;  %574 = vmatprep.mubr.f32.mxu1 %v330_v26 }
  0xd2   : > { %495 = vmatmul.mubr.f32.gmra.mrb[20].mxu0 %v297_v27  ;;  %575 = vmatmul.mubr.f32.gmra.mrb[20].mxu1 %v329_v28 }
  0xd3   : > { %499 = vmatprep.mubr.f32.mxu0 %v300_v29  ;;  %579 = vmatprep.mubr.f32.mxu1 %v332_v30 }
  0xd6   : > { %500 = vmatmul.mubr.f32.gmra.mrb[22].mxu0 %v299_v31  ;;  %580 = vmatmul.mubr.f32.gmra.mrb[22].mxu1 %v331_v32 }
  0xd7   : > { %504 = vmatprep.mubr.f32.mxu0 %v302_v33  ;;  %584 = vmatprep.mubr.f32.mxu1 %v334_v34 }
  0xda   : > { %505 = vmatmul.mubr.f32.gmra.mrb[24].mxu0 %v301_v35  ;;  %585 = vmatmul.mubr.f32.gmra.mrb[24].mxu1 %v333_v36 }
  0xdb   : > { %509 = vmatprep.mubr.f32.mxu0 %v304_v37  ;;  %589 = vmatprep.mubr.f32.mxu1 %v336_v38 }
  0xde   : > { %510 = vmatmul.mubr.f32.gmra.mrb[26].mxu0 %v303_v39  ;;  %590 = vmatmul.mubr.f32.gmra.mrb[26].mxu1 %v335_v40 }
  0xdf   : > { %514 = vmatprep.mubr.f32.mxu0 %v306_v41  ;;  %594 = vmatprep.mubr.f32.mxu1 %v338_v42 }
  0xe2   : > { %515 = vmatmul.mubr.f32.gmra.mrb[28].mxu0 %v305_v43  ;;  %595 = vmatmul.mubr.f32.gmra.mrb[28].mxu1 %v337_v44 }
  0xe3   : > { %519 = vmatprep.mubr.f32.mxu0 %v308_v45  ;;  %599 = vmatprep.mubr.f32.mxu1 %v340_v46 }
  0xe6   : > { %520 = vmatmul.mubr.f32.gmra.mrb[30].mxu0 %v307_v47  ;;  %600 = vmatmul.mubr.f32.gmra.mrb[30].mxu1 %v339_v48 }
 0x17d   : > { %v446_v50 = vpop.f32.mrb[0].mxu0  ;;  %v526_v51 = vpop.f32.mrb[0].mxu1 }
 0x17e   : > { %v447_v52 = vadd.f32 %v1983_v49, %v446_v50  ;;  %v528_v53 = vpop.f32.mrb[1].mxu1  ;;  %v448_v54 = vpop.f32.mrb[1].mxu0  ;;  %v527_v55 = vadd.f32 %v1983_v49, %v526_v51 }
 0x180   : > { %1436 = vtanh.f32 %v447_v52 }
 0x181   : > { %v531_v56 = vpop.f32.mrb[2].mxu1  ;;  %v451_v57 = vpop.f32.mrb[2].mxu0  ;;  %1438 = vtanh.f32 %v527_v55 }
 0x182   : > { %v532_v58 = vadd.f32 %v1983_v49, %v531_v56  ;;  %v452_v59 = vadd.f32 %v1983_v49, %v451_v57  ;;  %v533_v60 = vpop.f32.mrb[3].mxu1  ;;  %v453_v61 = vpop.f32.mrb[3].mxu0 }
 0x184   : > { %1440 = vtanh.f32 %v532_v58 }
 0x185   : > { %1442 = vtanh.f32 %v452_v59  ;;  %v456_v62 = vpop.f32.mrb[4].mxu0  ;;  %v536_v63 = vpop.f32.mrb[4].mxu1 }
 0x186   : > { %v458_v0 = vpop.f32.mrb[5].mxu0  ;;  %v538_v1 = vpop.f32.mrb[5].mxu1  ;;  %v457_v5 = vadd.f32 %v1983_v49, %v456_v62  ;;  %v537_v9 = vadd.f32 %v1983_v49, %v536_v63 }
 0x188   : > { %1444 = vtanh.f32 %v457_v5 }
 0x189   : > { %v461_v2 = vpop.f32.mrb[6].mxu0  ;;  %v541_v3 = vpop.f32.mrb[6].mxu1  ;;  %1446 = vtanh.f32 %v537_v9 }
 0x18a   : > { %v1989_v4 = vpop.eup %1436  ;;  %v463_v6 = vpop.f32.mrb[7].mxu0  ;;  %v462_v13 = vadd.f32 %v1983_v49, %v461_v2  ;;  %v542_v21 = vadd.f32 %v1983_v49, %v541_v3 }
 0x18b   : > { %v543_v7 = vpop.f32.mrb[7].mxu1  ;;  %637 = vadd.xlane.f32.xlu0 %v1989_v4  ;;  %v1993_v8 = vpop.eup %1438  ;;  %v701_v18 = vmul.f32 %v1989_v4, %v1989_v4 }
 0x18c   : > { %1448 = vtanh.f32 %v462_v13  ;;  %v717_v25 = vmul.f32 %v1993_v8, %v1993_v8 }
 0x18d   : > { %v466_v10 = vpop.f32.mrb[8].mxu0  ;;  %v546_v11 = vpop.f32.mrb[8].mxu1  ;;  %1450 = vtanh.f32 %v542_v21 }
 0x18e   : > { %v1996_v12 = vpop.eup %1440  ;;  %v468_v14 = vpop.f32.mrb[9].mxu0  ;;  %v467_v33 = vadd.f32 %v1983_v49, %v466_v10  ;;  %v547_v38 = vadd.f32 %v1983_v49, %v546_v11 }
 0x18f   : > { %v548_v15 = vpop.f32.mrb[9].mxu1  ;;  %v1999_v16 = vpop.eup %1442  ;;  %671 = vadd.xlane.f32.xlu1 %v1996_v12  ;;  %669 = vadd.xlane.f32.xlu0 %v1993_v8  ;;  %v718_v24 = vmul.f32 %v1996_v12, %v1996_v12 }
 0x190   : > { %v702_v17 = vmul.f32 %v1999_v16, %v1999_v16  ;;  %1452 = vtanh.f32 %v467_v33 }
 0x191   : > { %v471_v19 = vpop.f32.mrb[10].mxu0  ;;  %v551_v20 = vpop.f32.mrb[10].mxu1  ;;  %1454 = vtanh.f32 %v547_v38 }
 0x192   : > { %v473_v22 = vpop.f32.mrb[11].mxu0  ;;  %v553_v23 = vpop.f32.mrb[11].mxu1  ;;  %v472_v41 = vadd.f32 %v1983_v49, %v471_v19  ;;  %v552_v51 = vadd.f32 %v1983_v49, %v551_v20 }
 0x193   : > { %735 = vadd.xlane.f32.xlu1 %v702_v17  ;;  %733 = vadd.xlane.f32.xlu0 %v701_v18  ;;  %v2014_v30 = vpop.eup %1444 }
 0x194   : > { %v2019_v36 = vpop.eup %1446  ;;  %v703_v47 = vmul.f32 %v2014_v30, %v2014_v30  ;;  %1456 = vtanh.f32 %v472_v41 }
 0x195   : > { %v476_v26 = vpop.f32.mrb[12].mxu0  ;;  %v2012_v27 = vpop.f32.mrb[12].mxu1  ;;  %v719_v57 = vmul.f32 %v2019_v36, %v2019_v36  ;;  %1458 = vtanh.f32 %v552_v51 }
 0x196   : > { %v478_v28 = vpop.f32.mrb[13].mxu0  ;;  %v558_v29 = vpop.f32.mrb[13].mxu1  ;;  %v477_v5 = vadd.f32 %v1983_v49, %v476_v26  ;;  %v557_v14 = vadd.f32 %v1983_v49, %v2012_v27 }
 0x197   : > { %767 = vadd.xlane.f32.xlu1 %v718_v24  ;;  %765 = vadd.xlane.f32.xlu0 %v717_v25  ;;  %v2023_v37 = vpop.eup %1448 }
 0x198   : > { %v2035_v46 = vpop.eup %1450  ;;  %v704_v56 = vmul.f32 %v2023_v37, %v2023_v37  ;;  %1460 = vtanh.f32 %v477_v5 }
 0x199   : > { %v481_v31 = vpop.f32.mrb[14].mxu0  ;;  %v2016_v32 = vpop.f32.mrb[14].mxu1  ;;  %v720_v1 = vmul.f32 %v2035_v46, %v2035_v46  ;;  %1462 = vtanh.f32 %v557_v14 }
 0x19a   : > { %v483_v34 = vpop.f32.mrb[15].mxu0  ;;  %v563_v35 = vpop.f32.mrb[15].mxu1  ;;  %v482_v18 = vadd.f32 %v1983_v49, %v481_v31  ;;  %v562_v27 = vadd.f32 %v1983_v49, %v2016_v32 }
 0x19b   : > { %641 = vadd.xlane.f32.xlu1 %v2014_v30  ;;  %639 = vadd.xlane.f32.xlu0 %v1999_v16  ;;  %v2057_v0 = vpop.eup %1452 }
 0x19c   : > { %v2068_v11 = vpop.eup %1454  ;;  %v705_v24 = vmul.f32 %v2057_v0, %v2057_v0  ;;  %1464 = vtanh.f32 %v482_v18 }
 0x19d   : > { %v486_v39 = vpop.f32.mrb[16].mxu0  ;;  %v566_v40 = vpop.f32.mrb[16].mxu1  ;;  %v721_v35 = vmul.f32 %v2068_v11, %v2068_v11  ;;  %1466 = vtanh.f32 %v562_v27 }
 0x19e   : > { %v2028_v42 = vadd.f32 %v1983_v49, %v486_v39  ;;  %v488_v43 = vpop.f32.mrb[17].mxu0  ;;  %v2031_v44 = vadd.f32 %v1983_v49, %v566_v40  ;;  %v568_v45 = vpop.f32.mrb[17].mxu1 }
 0x19f   : > { %643 = vadd.xlane.f32.xlu1 %v2023_v37  ;;  %673 = vadd.xlane.f32.xlu0 %v2019_v36  ;;  %v2071_v13 = vpop.eup %1456 }
 0x1a0   : > { %v2084_v23 = vpop.eup %1458  ;;  %v706_v34 = vmul.f32 %v2071_v13, %v2071_v13  ;;  %1468 = vtanh.f32 %v2028_v42 }
 0x1a1   : > { %v491_v48 = vpop.f32.mrb[18].mxu0  ;;  %v571_v50 = vpop.f32.mrb[18].mxu1  ;;  %1470 = vtanh.f32 %v2031_v44 }
 0x1a2   : > { %v2041_v52 = vadd.f32 %v1983_v49, %v491_v48  ;;  %v493_v53 = vpop.f32.mrb[19].mxu0  ;;  %v2044_v54 = vadd.f32 %v1983_v49, %v571_v50  ;;  %v573_v55 = vpop.f32.mrb[19].mxu1 }
 0x1a3   : > { %675 = vadd.xlane.f32.xlu1 %v2035_v46  ;;  %737 = vadd.xlane.f32.xlu0 %v703_v47  ;;  %v2107_v45 = vpop.eup %1460  ;;  %v722_v47 = vmul.f32 %v2084_v23, %v2084_v23 }
 0x1a4   : > { %1472 = vtanh.f32 %v2041_v52 }
 0x1a5   : > { %v496_v58 = vpop.f32.mrb[20].mxu0  ;;  %v576_v59 = vpop.f32.mrb[20].mxu1  ;;  %1474 = vtanh.f32 %v2044_v54 }
 0x1a6   : > { %v2052_v60 = vadd.f32 %v1983_v49, %v496_v58  ;;  %v498_v61 = vpop.f32.mrb[21].mxu0  ;;  %v2055_v62 = vadd.f32 %v1983_v49, %v576_v59  ;;  %v578_v63 = vpop.f32.mrb[21].mxu1 }
 0x1a7   : > { %739 = vadd.xlane.f32.xlu1 %v704_v56  ;;  %769 = vadd.xlane.f32.xlu0 %v719_v57  ;;  %v2117_v57 = vpop.eup %1462 }
 0x1a8   : > { %v2120_v58 = vpop.eup %1464  ;;  %v723_v42 = vmul.f32 %v2117_v57, %v2117_v57  ;;  %1476 = vtanh.f32 %v2052_v60 }
 0x1a9   : > { %v501_v2 = vpop.f32.mrb[22].mxu0  ;;  %v581_v3 = vpop.f32.mrb[22].mxu1  ;;  %v708_v61 = vmul.f32 %v2120_v58, %v2120_v58  ;;  %1478 = vtanh.f32 %v2055_v62 }
 0x1aa   : > { %v2063_v6 = vadd.f32 %v1983_v49, %v501_v2  ;;  %v503_v7 = vpop.f32.mrb[23].mxu0  ;;  %v2066_v9 = vadd.f32 %v1983_v49, %v581_v3  ;;  %v583_v10 = vpop.f32.mrb[23].mxu1 }
 0x1ab   : > { %771 = vadd.xlane.f32.xlu1 %v720_v1  ;;  %645 = vadd.xlane.f32.xlu0 %v2057_v0  ;;  %v2125_v59 = vpop.eup %1466 }
 0x1ac   : > { %v2137_v63 = vpop.eup %1468  ;;  %v724_v44 = vmul.f32 %v2125_v59, %v2125_v59  ;;  %1480 = vtanh.f32 %v2063_v6 }
 0x1ad   : > { %v506_v15 = vpop.f32.mrb[24].mxu0  ;;  %v586_v17 = vpop.f32.mrb[24].mxu1  ;;  %v709_v2 = vmul.f32 %v2137_v63, %v2137_v63  ;;  %1482 = vtanh.f32 %v2066_v9 }
 0x1ae   : > { %v2077_v19 = vadd.f32 %v1983_v49, %v506_v15  ;;  %v508_v20 = vpop.f32.mrb[25].mxu0  ;;  %v2080_v21 = vadd.f32 %v1983_v49, %v586_v17  ;;  %v588_v22 = vpop.f32.mrb[25].mxu1 }
 0x1af   : > { %647 = vadd.xlane.f32.xlu1 %v2071_v13  ;;  %677 = vadd.xlane.f32.xlu0 %v2068_v11  ;;  %v2141_v1 = vpop.eup %1470 }
 0x1b0   : > { %v2144_v52 = vpop.eup %1472  ;;  %v725_v60 = vmul.f32 %v2141_v1, %v2141_v1  ;;  %1484 = vtanh.f32 %v2077_v19 }
 0x1b1   : > { %v511_v25 = vpop.f32.mrb[26].mxu0  ;;  %v591_v26 = vpop.f32.mrb[26].mxu1  ;;  %v710_v3 = vmul.f32 %v2144_v52, %v2144_v52  ;;  %1486 = vtanh.f32 %v2080_v21 }
 0x1b2   : > { %v2091_v28 = vadd.f32 %v1983_v49, %v511_v25  ;;  %v513_v29 = vpop.f32.mrb[27].mxu0  ;;  %v2094_v31 = vadd.f32 %v1983_v49, %v591_v26  ;;  %v593_v33 = vpop.f32.mrb[27].mxu1 }
 0x1b3   : > { %679 = vadd.xlane.f32.xlu1 %v2084_v23  ;;  %741 = vadd.xlane.f32.xlu0 %v705_v24  ;;  %v2149_v54 = vpop.eup %1474 }
 0x1b4   : > { %v2161_v5 = vpop.eup %1476  ;;  %v726_v62 = vmul.f32 %v2149_v54, %v2149_v54  ;;  %1488 = vtanh.f32 %v2091_v28 }
 0x1b5   : > { %v516_v38 = vpop.f32.mrb[28].mxu0  ;;  %v596_v39 = vpop.f32.mrb[28].mxu1  ;;  %v711_v10 = vmul.f32 %v2161_v5, %v2161_v5  ;;  %1490 = vtanh.f32 %v2094_v31 }
 0x1b6   : > { %v2102_v32 = vadd.f32 %v1983_v49, %v516_v38  ;;  %v518_v40 = vpop.f32.mrb[29].mxu0  ;;  %v2105_v41 = vadd.f32 %v1983_v49, %v596_v39  ;;  %v598_v43 = vpop.f32.mrb[29].mxu1 }
 0x1b7   : > { %743 = vadd.xlane.f32.xlu1 %v706_v34  ;;  %773 = vadd.xlane.f32.xlu0 %v721_v35  ;;  %v2165_v7 = vpop.eup %1478 }
 0x1b8   : > { %v2168_v6 = vpop.eup %1480  ;;  %v727_v15 = vmul.f32 %v2165_v7, %v2165_v7  ;;  %1492 = vtanh.f32 %v2102_v32 }
 0x1b9   : > { %v521_v48 = vpop.f32.mrb[30].mxu0  ;;  %v601_v50 = vpop.f32.mrb[30].mxu1  ;;  %v712_v14 = vmul.f32 %v2168_v6, %v2168_v6  ;;  %1494 = vtanh.f32 %v2105_v41 }
 0x1ba   : > { %v2112_v51 = vadd.f32 %v1983_v49, %v521_v48  ;;  %v523_v53 = vpop.f32.mrb[31].mxu0  ;;  %v2115_v55 = vadd.f32 %v1983_v49, %v601_v50  ;;  %v603_v56 = vpop.f32.mrb[31].mxu1  ;;  %v707_v49 = vmul.f32 %v2107_v45, %v2107_v45 }
 0x1bb   : > { %775 = vadd.xlane.f32.xlu1 %v722_v47  ;;  %649 = vadd.xlane.f32.xlu0 %v2107_v45  ;;  %v2173_v9 = vpop.eup %1482 }
 0x1bc   : > { %v2185_v17 = vpop.eup %1484  ;;  %v728_v18 = vmul.f32 %v2173_v9, %v2173_v9  ;;  %1496 = vtanh.f32 %v2112_v51 }
 0x1bd   : > { %v2189_v19 = vpop.eup %1486  ;;  %v713_v22 = vmul.f32 %v2185_v17, %v2185_v17  ;;  %1498 = vtanh.f32 %v2115_v55 }
 0x1be   : > { %v2192_v20 = vpop.eup %1488  ;;  %v729_v25 = vmul.f32 %v2189_v19, %v2189_v19 }
 0x1bf   : > { %651 = vadd.xlane.f32.xlu1 %v2120_v58  ;;  %681 = vadd.xlane.f32.xlu0 %v2117_v57  ;;  %v2197_v21 = vpop.eup %1490  ;;  %v714_v24 = vmul.f32 %v2192_v20, %v2192_v20 }
 0x1c0   : > { %v730_v27 = vmul.f32 %v2197_v21, %v2197_v21 }
 0x1c2   : > { %v2209_v26 = vpop.eup %1492 }
 0x1c3   : > { %683 = vadd.xlane.f32.xlu1 %v2125_v59  ;;  %745 = vadd.xlane.f32.xlu0 %v707_v49  ;;  %v2213_v28 = vpop.eup %1494  ;;  %v715_v33 = vmul.f32 %v2209_v26, %v2209_v26 }
 0x1c4   : > { %v731_v35 = vmul.f32 %v2213_v28, %v2213_v28 }
 0x1c6   : > { %v2216_v29 = vpop.eup %1496 }
 0x1c7   : > { %747 = vadd.xlane.f32.xlu1 %v708_v61  ;;  %777 = vadd.xlane.f32.xlu0 %v723_v42  ;;  %v2220_v31 = vpop.eup %1498  ;;  %v716_v34 = vmul.f32 %v2216_v29, %v2216_v29 }
 0x1c8   : > { %v732_v38 = vmul.f32 %v2220_v31, %v2220_v31 }
 0x1cb   : > { %779 = vadd.xlane.f32.xlu1 %v724_v44  ;;  %653 = vadd.xlane.f32.xlu0 %v2137_v63 }
 0x1cf   : > { %655 = vadd.xlane.f32.xlu1 %v2144_v52  ;;  %685 = vadd.xlane.f32.xlu0 %v2141_v1 }
 0x1d3   : > { %687 = vadd.xlane.f32.xlu1 %v2149_v54  ;;  %749 = vadd.xlane.f32.xlu0 %v709_v2 }
 0x1d7   : > { %751 = vadd.xlane.f32.xlu1 %v710_v3  ;;  %781 = vadd.xlane.f32.xlu0 %v725_v60 }
 0x1db   : > { %783 = vadd.xlane.f32.xlu1 %v726_v62  ;;  %657 = vadd.xlane.f32.xlu0 %v2161_v5 }
 0x1df   : > { %659 = vadd.xlane.f32.xlu1 %v2168_v6  ;;  %689 = vadd.xlane.f32.xlu0 %v2165_v7 }
 0x1e3   : > { %691 = vadd.xlane.f32.xlu1 %v2173_v9  ;;  %753 = vadd.xlane.f32.xlu0 %v711_v10 }
 0x1e7   : > { %755 = vadd.xlane.f32.xlu1 %v712_v14  ;;  %785 = vadd.xlane.f32.xlu0 %v727_v15 }
 0x1eb   : > { %787 = vadd.xlane.f32.xlu1 %v728_v18  ;;  %661 = vadd.xlane.f32.xlu0 %v2185_v17 }
 0x1ef   : > { %663 = vadd.xlane.f32.xlu1 %v2192_v20  ;;  %693 = vadd.xlane.f32.xlu0 %v2189_v19 }
 0x1f3   : > { %695 = vadd.xlane.f32.xlu1 %v2197_v21  ;;  %757 = vadd.xlane.f32.xlu0 %v713_v22 }
 0x1f7   : > { %759 = vadd.xlane.f32.xlu1 %v714_v24  ;;  %789 = vadd.xlane.f32.xlu0 %v729_v25 }
 0x1fb   : > { %791 = vadd.xlane.f32.xlu1 %v730_v27  ;;  %665 = vadd.xlane.f32.xlu0 %v2209_v26 }
 0x1ff   : > { %667 = vadd.xlane.f32.xlu1 %v2216_v29  ;;  %697 = vadd.xlane.f32.xlu0 %v2213_v28 }
 0x203   : > { %699 = vadd.xlane.f32.xlu1 %v2220_v31  ;;  %761 = vadd.xlane.f32.xlu0 %v715_v33 }
 0x207   : > { %763 = vadd.xlane.f32.xlu1 %v716_v34  ;;  %793 = vadd.xlane.f32.xlu0 %v731_v35 }
 0x20b   : > { %795 = vadd.xlane.f32.xlu1 %v732_v38 }
 0x218   : > { %v638_v39 = vpop.xlane.xlu0 %637 }
 0x219   : > { %v797_v41 = vmul.f32 0.0078125, %v638_v39 }
 0x21b   : > { %v861_v50 = vmul.f32 %v797_v41, %v797_v41  ;;  %v989_v39 = vsub.f32 %v1989_v4, %v797_v41  ;;  %v2250_v41 = vld [vmem:[%s2559_s4] ss:$0 sm:$0xff] }
 0x21c   : > { %v672_v32 = vpop.xlane.xlu1 %671  ;;  %v670_v40 = vpop.xlane.xlu0 %669 }
 0x21d   : > { %v814_v43 = vmul.f32 0.0078125, %v672_v32  ;;  %v813_v51 = vmul.f32 0.0078125, %v670_v40 }
 0x21f   : > { %v878_v56 = vmul.f32 %v814_v43, %v814_v43  ;;  %v877_v42 = vmul.f32 %v813_v51, %v813_v51  ;;  %v1006_v4 = vsub.f32 %v1996_v12, %v814_v43 }
 0x220   : > { %v736_v47 = vpop.xlane.xlu1 %735  ;;  %v734_v48 = vpop.xlane.xlu0 %733 }
 0x221   : > { %v829_v53 = vmul.f32 0.0078125, %v734_v48  ;;  %v830_v24 = vmul.f32 0.0078125, %v736_v47  ;;  %v2239_v47 = vld [vmem:[%s2558_s3] ss:$0 sm:$0xff] }
 0x223   : > { %v893_v55 = vsub.f32 %v829_v53, %v861_v50 }
 0x224   : > { %v768_v49 = vpop.xlane.xlu1 %767  ;;  %v766_v61 = vpop.xlane.xlu0 %765 }
 0x225   : > { %v925_v44 = vadd.f32 1e-05, %v893_v55  ;;  %v846_v2 = vmul.f32 0.0078125, %v768_v49  ;;  %v845_v3 = vmul.f32 0.0078125, %v766_v61 }
 0x227   : > { %1500 = vrsqrt.f32 %v925_v44  ;;  %v910_v60 = vsub.f32 %v846_v2, %v878_v56  ;;  %v909_v62 = vsub.f32 %v845_v3, %v877_v42  ;;  %v1005_v42 = vsub.f32 %v1993_v8, %v813_v51 }
 0x228   : > { %v642_v10 = vpop.xlane.xlu1 %641  ;;  %v640_v14 = vpop.xlane.xlu0 %639 }
 0x229   : > { %v942_v15 = vadd.f32 1e-05, %v910_v60  ;;  %v941_v18 = vadd.f32 1e-05, %v909_v62  ;;  %v798_v22 = vmul.f32 0.0078125, %v640_v14  ;;  %v2231_v34 = vmul.f32 0.0078125, %v642_v10 }
 0x22b   : > { %1502 = vrsqrt.f32 %v942_v15  ;;  %v862_v25 = vmul.f32 %v798_v22, %v798_v22  ;;  %v863_v53 = vmul.f32 %v2231_v34, %v2231_v34 }
 0x22c   : > { %1504 = vrsqrt.f32 %v941_v18  ;;  %v644_v27 = vpop.xlane.xlu1 %643  ;;  %v674_v33 = vpop.xlane.xlu0 %673 }
 0x22d   : > { %v894_v35 = vsub.f32 %v830_v24, %v862_v25  ;;  %v2234_v32 = vmul.f32 0.0078125, %v644_v27  ;;  %v2243_v55 = vmul.f32 0.0078125, %v674_v33 }
 0x22f   : > { %v926_v38 = vadd.f32 1e-05, %v894_v35  ;;  %v864_v2 = vmul.f32 %v2234_v32, %v2234_v32  ;;  %v879_v12 = vmul.f32 %v2243_v55, %v2243_v55 }
 0x230   : > { %v676_v40 = vpop.xlane.xlu1 %675  ;;  %v738_v48 = vpop.xlane.xlu0 %737 }
 0x231   : > { %v1501_v50 = vpop.eup %1500  ;;  %1506 = vrsqrt.f32 %v926_v38  ;;  %v831_v56 = vmul.f32 0.0078125, %v738_v48  ;;  %v2256_v3 = vmul.f32 0.0078125, %v676_v40 }
 0x232   : > { %v1021_v49 = vmul.f32 %v1501_v50, %v989_v39 }
 0x233   : > { %v895_v61 = vsub.f32 %v831_v56, %v863_v53  ;;  %v880_v35 = vmul.f32 %v2256_v3, %v2256_v3 }
 0x234   : > { %v1060_v44 = vmul.f32 %v2239_v47, %v1021_v49  ;;  %v740_v60 = vpop.xlane.xlu1 %739  ;;  %v770_v62 = vpop.xlane.xlu0 %769  ;;  %v990_v49 = vsub.f32 %v1999_v16, %v798_v22  ;;  %v991_v16 = vsub.f32 %v2014_v30, %v2231_v34  ;;  %v1007_v30 = vsub.f32 %v2019_v36, %v2243_v55 }
 0x235   : > { %v1503_v10 = vpop.eup %1502  ;;  %v927_v43 = vadd.f32 1e-05, %v895_v61  ;;  %v832_v14 = vmul.f32 0.0078125, %v740_v60  ;;  %v847_v15 = vmul.f32 0.0078125, %v770_v62 }
 0x236   : > { %v1505_v18 = vpop.eup %1504  ;;  %v1099_v24 = vadd.f32 %v2250_v41, %v1060_v44  ;;  %v1038_v8 = vmul.f32 %v1503_v10, %v1006_v4 }
 0x237   : > { %v1037_v51 = vmul.f32 %v1505_v18, %v1005_v42  ;;  %1508 = vrsqrt.f32 %v927_v43  ;;  %v896_v25 = vsub.f32 %v832_v14, %v864_v2  ;;  %v911_v27 = vsub.f32 %v847_v15, %v879_v12 }
 0x238   : > { %1131 = vst [vmem:[%s2261_s28] sm:$0xff] %v1099_v24  ;;  %v1077_v33 = vmul.f32 %v2239_v47, %v1038_v8  ;;  %v772_v38 = vpop.xlane.xlu1 %771  ;;  %v646_v39 = vpop.xlane.xlu0 %645 }
 0x239   : > { %v1076_v40 = vmul.f32 %v2239_v47, %v1037_v51  ;;  %v928_v48 = vadd.f32 1e-05, %v896_v25  ;;  %v943_v50 = vadd.f32 1e-05, %v911_v27  ;;  %v848_v53 = vmul.f32 0.0078125, %v772_v38 }
 0x23a   : > { %v1116_v56 = vadd.f32 %v2250_v41, %v1077_v33  ;;  %v2273_v10 = vmul.f32 0.0078125, %v646_v39  ;;  %v992_v27 = vsub.f32 %v2023_v37, %v2234_v32 }
 0x23b   : > { %v1507_v4 = vpop.eup %1506  ;;  %v1115_v61 = vadd.f32 %v2250_v41, %v1076_v40  ;;  %1510 = vrsqrt.f32 %v928_v48  ;;  %v912_v42 = vsub.f32 %v848_v53, %v880_v35 }
 0x23c   : > { %1148 = vst [vmem:[%s2261_s28 + $0x88] sm:$0xff] %v1116_v56  ;;  %v1022_v44 = vmul.f32 %v1507_v4, %v990_v49  ;;  %1512 = vrsqrt.f32 %v943_v50  ;;  %v648_v2 = vpop.xlane.xlu1 %647  ;;  %v678_v60 = vpop.xlane.xlu0 %677  ;;  %v865_v24 = vmul.f32 %v2273_v10, %v2273_v10 }
 0x23d   : > { %1147 = vst [vmem:[%s2261_s28 + $0x80] sm:$0xff] %v1115_v61  ;;  %v944_v62 = vadd.f32 1e-05, %v912_v42  ;;  %v2279_v43 = vmul.f32 0.0078125, %v648_v2  ;;  %v2283_v8 = vmul.f32 0.0078125, %v678_v60  ;;  %v1008_v42 = vsub.f32 %v2035_v46, %v2256_v3 }
 0x23e   : > { %v1061_v12 = vmul.f32 %v2239_v47, %v1022_v44 }
 0x23f   : > { %1514 = vrsqrt.f32 %v944_v62  ;;  %v866_v35 = vmul.f32 %v2279_v43, %v2279_v43  ;;  %v881_v50 = vmul.f32 %v2283_v8, %v2283_v8 }
 0x240   : > { %v1100_v22 = vadd.f32 %v2250_v41, %v1061_v12  ;;  %v680_v14 = vpop.xlane.xlu1 %679  ;;  %v742_v15 = vpop.xlane.xlu0 %741 }
 0x241   : > { %v1509_v18 = vpop.eup %1508  ;;  %v833_v51 = vmul.f32 0.0078125, %v742_v15  ;;  %v2293_v38 = vmul.f32 0.0078125, %v680_v14 }
 0x242   : > { %1132 = vst [vmem:[%s2261_s28 + $0x8] sm:$0xff] %v1100_v22  ;;  %v1023_v25 = vmul.f32 %v1509_v18, %v991_v16 }
 0x243   : > { %v897_v33 = vsub.f32 %v833_v51, %v865_v24  ;;  %v882_v2 = vmul.f32 %v2293_v38, %v2293_v38 }
 0x244   : > { %v1062_v34 = vmul.f32 %v2239_v47, %v1023_v25  ;;  %v744_v39 = vpop.xlane.xlu1 %743  ;;  %v774_v40 = vpop.xlane.xlu0 %773 }
 0x245   : > { %v1511_v48 = vpop.eup %1510  ;;  %v929_v53 = vadd.f32 1e-05, %v897_v33  ;;  %v834_v37 = vmul.f32 0.0078125, %v744_v39  ;;  %v849_v32 = vmul.f32 0.0078125, %v774_v40 }
 0x246   : > { %v1513_v56 = vpop.eup %1512  ;;  %v1101_v36 = vadd.f32 %v2250_v41, %v1062_v34  ;;  %v1024_v55 = vmul.f32 %v1511_v48, %v992_v27 }
 0x247   : > { %v1039_v49 = vmul.f32 %v1513_v56, %v1007_v30  ;;  %1516 = vrsqrt.f32 %v929_v53  ;;  %v898_v4 = vsub.f32 %v834_v37, %v866_v35  ;;  %v913_v61 = vsub.f32 %v849_v32, %v881_v50 }
 0x248   : > { %1133 = vst [vmem:[%s2261_s28 + $0x10] sm:$0xff] %v1101_v36  ;;  %v1063_v44 = vmul.f32 %v2239_v47, %v1024_v55  ;;  %v776_v60 = vpop.xlane.xlu1 %775  ;;  %v650_v62 = vpop.xlane.xlu0 %649  ;;  %v993_v35 = vsub.f32 %v2057_v0, %v2273_v10  ;;  %v994_v36 = vsub.f32 %v2071_v13, %v2279_v43 }
 0x249   : > { %v1515_v12 = vpop.eup %1514  ;;  %v1078_v16 = vmul.f32 %v2239_v47, %v1039_v49  ;;  %v930_v22 = vadd.f32 1e-05, %v898_v4  ;;  %v945_v14 = vadd.f32 1e-05, %v913_v61  ;;  %v850_v15 = vmul.f32 0.0078125, %v776_v60 }
 0x24a   : > { %v1102_v18 = vadd.f32 %v2250_v41, %v1063_v44  ;;  %v1040_v46 = vmul.f32 %v1515_v12, %v1008_v42  ;;  %v2310_v30 = vmul.f32 0.0078125, %v650_v62  ;;  %v1009_v49 = vsub.f32 %v2068_v11, %v2283_v8 }
 0x24b   : > { %v1117_v3 = vadd.f32 %v2250_v41, %v1078_v16  ;;  %1518 = vrsqrt.f32 %v930_v22  ;;  %v914_v24 = vsub.f32 %v850_v15, %v882_v2 }
 0x24c   : > { %1134 = vst [vmem:[%s2261_s28 + $0x18] sm:$0xff] %v1102_v18  ;;  %v1079_v51 = vmul.f32 %v2239_v47, %v1040_v46  ;;  %1520 = vrsqrt.f32 %v945_v14  ;;  %v652_v25 = vpop.xlane.xlu1 %651  ;;  %v682_v27 = vpop.xlane.xlu0 %681  ;;  %v867_v53 = vmul.f32 %v2310_v30, %v2310_v30  ;;  %v1010_v14 = vsub.f32 %v2084_v23, %v2293_v38 }
 0x24d   : > { %1149 = vst [vmem:[%s2261_s28 + $0x90] sm:$0xff] %v1117_v3  ;;  %v946_v33 = vadd.f32 1e-05, %v914_v24  ;;  %v2316_v39 = vmul.f32 0.0078125, %v652_v25  ;;  %v2320_v37 = vmul.f32 0.0078125, %v682_v27 }
 0x24e   : > { %v1118_v34 = vadd.f32 %v2250_v41, %v1079_v51 }
 0x24f   : > { %1522 = vrsqrt.f32 %v946_v33  ;;  %v868_v10 = vmul.f32 %v2316_v39, %v2316_v39  ;;  %v883_v2 = vmul.f32 %v2320_v37, %v2320_v37 }
 0x250   : > { %1150 = vst [vmem:[%s2261_s28 + $0x98] sm:$0xff] %v1118_v34  ;;  %v684_v40 = vpop.xlane.xlu1 %683  ;;  %v746_v48 = vpop.xlane.xlu0 %745 }
 0x251   : > { %v1517_v50 = vpop.eup %1516  ;;  %v835_v32 = vmul.f32 0.0078125, %v746_v48  ;;  %v2329_v4 = vmul.f32 0.0078125, %v684_v40 }
 0x252   : > { %v1025_v56 = vmul.f32 %v1517_v50, %v993_v35 }
 0x253   : > { %v899_v55 = vsub.f32 %v835_v32, %v867_v53  ;;  %v884_v18 = vmul.f32 %v2329_v4, %v2329_v4 }
 0x254   : > { %v1064_v0 = vmul.f32 %v2239_v47, %v1025_v56  ;;  %v748_v61 = vpop.xlane.xlu1 %747  ;;  %v778_v42 = vpop.xlane.xlu0 %777 }
 0x255   : > { %v1519_v44 = vpop.eup %1518  ;;  %v931_v60 = vadd.f32 1e-05, %v899_v55  ;;  %v836_v13 = vmul.f32 0.0078125, %v748_v61  ;;  %v851_v43 = vmul.f32 0.0078125, %v778_v42 }
 0x256   : > { %v1521_v62 = vpop.eup %1520  ;;  %v1103_v11 = vadd.f32 %v2250_v41, %v1064_v0  ;;  %v1026_v8 = vmul.f32 %v1519_v44, %v994_v36  ;;  %v995_v36 = vsub.f32 %v2107_v45, %v2310_v30 }
 0x257   : > { %v1041_v12 = vmul.f32 %v1521_v62, %v1009_v49  ;;  %1524 = vrsqrt.f32 %v931_v60  ;;  %v900_v16 = vsub.f32 %v836_v13, %v868_v10  ;;  %v915_v22 = vsub.f32 %v851_v43, %v883_v2 }
 0x258   : > { %1135 = vst [vmem:[%s2261_s28 + $0x20] sm:$0xff] %v1103_v11  ;;  %v1065_v15 = vmul.f32 %v2239_v47, %v1026_v8  ;;  %v780_v46 = vpop.xlane.xlu1 %779  ;;  %v654_v3 = vpop.xlane.xlu0 %653  ;;  %v996_v60 = vsub.f32 %v2120_v58, %v2316_v39  ;;  %v1011_v43 = vsub.f32 %v2117_v57, %v2320_v37 }
 0x259   : > { %v1523_v24 = vpop.eup %1522  ;;  %v1080_v51 = vmul.f32 %v2239_v47, %v1041_v12  ;;  %v932_v25 = vadd.f32 1e-05, %v900_v16  ;;  %v947_v27 = vadd.f32 1e-05, %v915_v22  ;;  %v852_v33 = vmul.f32 0.0078125, %v780_v46 }
 0x25a   : > { %v1104_v34 = vadd.f32 %v2250_v41, %v1065_v15  ;;  %v1042_v23 = vmul.f32 %v1523_v24, %v1010_v14  ;;  %v2346_v32 = vmul.f32 0.0078125, %v654_v3  ;;  %v1012_v3 = vsub.f32 %v2125_v59, %v2329_v4 }
 0x25b   : > { %v1119_v38 = vadd.f32 %v2250_v41, %v1080_v51  ;;  %1526 = vrsqrt.f32 %v932_v25  ;;  %v916_v35 = vsub.f32 %v852_v33, %v884_v18 }
 0x25c   : > { %1136 = vst [vmem:[%s2261_s28 + $0x28] sm:$0xff] %v1104_v34  ;;  %v1081_v40 = vmul.f32 %v2239_v47, %v1042_v23  ;;  %1528 = vrsqrt.f32 %v947_v27  ;;  %v656_v48 = vpop.xlane.xlu1 %655  ;;  %v686_v50 = vpop.xlane.xlu0 %685  ;;  %v869_v61 = vmul.f32 %v2346_v32, %v2346_v32 }
 0x25d   : > { %1151 = vst [vmem:[%s2261_s28 + $0xa0] sm:$0xff] %v1119_v38  ;;  %v948_v53 = vadd.f32 1e-05, %v916_v35  ;;  %v2352_v55 = vmul.f32 0.0078125, %v656_v48  ;;  %v2356_v42 = vmul.f32 0.0078125, %v686_v50 }
 0x25e   : > { %v1120_v56 = vadd.f32 %v2250_v41, %v1081_v40 }
 0x25f   : > { %1530 = vrsqrt.f32 %v948_v53  ;;  %v870_v30 = vmul.f32 %v2352_v55, %v2352_v55  ;;  %v885_v16 = vmul.f32 %v2356_v42, %v2356_v42 }
 0x260   : > { %1152 = vst [vmem:[%s2261_s28 + $0xa8] sm:$0xff] %v1120_v56  ;;  %v688_v49 = vpop.xlane.xlu1 %687  ;;  %v750_v0 = vpop.xlane.xlu0 %749 }
 0x261   : > { %v1525_v10 = vpop.eup %1524  ;;  %v837_v44 = vmul.f32 0.0078125, %v750_v0  ;;  %v2365_v62 = vmul.f32 0.0078125, %v688_v49 }
 0x262   : > { %v1027_v2 = vmul.f32 %v1525_v10, %v995_v36  ;;  %v997_v10 = vsub.f32 %v2137_v63, %v2346_v32 }
 0x263   : > { %v901_v13 = vsub.f32 %v837_v44, %v869_v61  ;;  %v886_v51 = vmul.f32 %v2365_v62, %v2365_v62 }
 0x264   : > { %v1066_v45 = vmul.f32 %v2239_v47, %v1027_v2  ;;  %v752_v11 = vpop.xlane.xlu1 %751  ;;  %v782_v8 = vpop.xlane.xlu0 %781 }
 0x265   : > { %v1527_v12 = vpop.eup %1526  ;;  %v933_v22 = vadd.f32 1e-05, %v901_v13  ;;  %v838_v58 = vmul.f32 0.0078125, %v752_v11  ;;  %v853_v39 = vmul.f32 0.0078125, %v782_v8  ;;  %v998_v11 = vsub.f32 %v2144_v52, %v2352_v55 }
 0x266   : > { %v1529_v14 = vpop.eup %1528  ;;  %v1105_v57 = vadd.f32 %v2250_v41, %v1066_v45  ;;  %v1028_v37 = vmul.f32 %v1527_v12, %v996_v60  ;;  %v1013_v12 = vsub.f32 %v2141_v1, %v2356_v42 }
 0x267   : > { %v1043_v15 = vmul.f32 %v1529_v14, %v1011_v43  ;;  %1532 = vrsqrt.f32 %v933_v22  ;;  %v902_v18 = vsub.f32 %v838_v58, %v870_v30  ;;  %v917_v46 = vsub.f32 %v853_v39, %v885_v16 }
 0x268   : > { %1137 = vst [vmem:[%s2261_s28 + $0x30] sm:$0xff] %v1105_v57  ;;  %v1067_v24 = vmul.f32 %v2239_v47, %v1028_v37  ;;  %v784_v25 = vpop.xlane.xlu1 %783  ;;  %v658_v27 = vpop.xlane.xlu0 %657 }
 0x269   : > { %v1531_v33 = vpop.eup %1530  ;;  %v1082_v34 = vmul.f32 %v2239_v47, %v1043_v15  ;;  %v934_v23 = vadd.f32 1e-05, %v902_v18  ;;  %v949_v38 = vadd.f32 1e-05, %v917_v46  ;;  %v854_v35 = vmul.f32 0.0078125, %v784_v25 }
 0x26a   : > { %v1106_v40 = vadd.f32 %v2250_v41, %v1067_v24  ;;  %v1044_v59 = vmul.f32 %v1531_v33, %v1012_v3  ;;  %v2382_v49 = vmul.f32 0.0078125, %v658_v27  ;;  %v1014_v3 = vsub.f32 %v2149_v54, %v2365_v62 }
 0x26b   : > { %v1121_v4 = vadd.f32 %v2250_v41, %v1082_v34  ;;  %1534 = vrsqrt.f32 %v934_v23  ;;  %v918_v48 = vsub.f32 %v854_v35, %v886_v51 }
 0x26c   : > { %1138 = vst [vmem:[%s2261_s28 + $0x38] sm:$0xff] %v1106_v40  ;;  %v1083_v50 = vmul.f32 %v2239_v47, %v1044_v59  ;;  %1536 = vrsqrt.f32 %v949_v38  ;;  %v660_v53 = vpop.xlane.xlu1 %659  ;;  %v690_v56 = vpop.xlane.xlu0 %689  ;;  %v871_v13 = vmul.f32 %v2382_v49, %v2382_v49 }
 0x26d   : > { %1153 = vst [vmem:[%s2261_s28 + $0xb0] sm:$0xff] %v1121_v4  ;;  %v950_v36 = vadd.f32 1e-05, %v918_v48  ;;  %v2388_v61 = vmul.f32 0.0078125, %v660_v53  ;;  %v2392_v43 = vmul.f32 0.0078125, %v690_v56 }
 0x26e   : > { %v1122_v0 = vadd.f32 %v2250_v41, %v1083_v50 }
 0x26f   : > { %1538 = vrsqrt.f32 %v950_v36  ;;  %v872_v32 = vmul.f32 %v2388_v61, %v2388_v61  ;;  %v887_v14 = vmul.f32 %v2392_v43, %v2392_v43 }
 0x270   : > { %1154 = vst [vmem:[%s2261_s28 + $0xb8] sm:$0xff] %v1122_v0  ;;  %v692_v44 = vpop.xlane.xlu1 %691  ;;  %v754_v2 = vpop.xlane.xlu0 %753  ;;  %v999_v0 = vsub.f32 %v2161_v5, %v2382_v49 }
 0x271   : > { %v1533_v60 = vpop.eup %1532  ;;  %v839_v45 = vmul.f32 0.0078125, %v754_v2  ;;  %v2401_v16 = vmul.f32 0.0078125, %v692_v44 }
 0x272   : > { %v1029_v30 = vmul.f32 %v1533_v60, %v997_v10 }
 0x273   : > { %v903_v8 = vsub.f32 %v839_v45, %v871_v13  ;;  %v888_v51 = vmul.f32 %v2401_v16, %v2401_v16 }
 0x274   : > { %v1068_v63 = vmul.f32 %v2239_v47, %v1029_v30  ;;  %v756_v22 = vpop.xlane.xlu1 %755  ;;  %v786_v58 = vpop.xlane.xlu0 %785 }
 0x275   : > { %v1535_v39 = vpop.eup %1534  ;;  %v935_v57 = vadd.f32 1e-05, %v903_v8  ;;  %v840_v52 = vmul.f32 0.0078125, %v756_v22  ;;  %v855_v55 = vmul.f32 0.0078125, %v786_v58  ;;  %v1000_v8 = vsub.f32 %v2168_v6, %v2388_v61 }
 0x276   : > { %v1537_v37 = vpop.eup %1536  ;;  %v1107_v1 = vadd.f32 %v2250_v41, %v1068_v63  ;;  %v1030_v42 = vmul.f32 %v1535_v39, %v998_v11  ;;  %v1015_v63 = vsub.f32 %v2165_v7, %v2392_v43 }
 0x277   : > { %v1045_v15 = vmul.f32 %v1537_v37, %v1013_v12  ;;  %1540 = vrsqrt.f32 %v935_v57  ;;  %v904_v18 = vsub.f32 %v840_v52, %v872_v32  ;;  %v919_v46 = vsub.f32 %v855_v55, %v887_v14 }
 0x278   : > { %1139 = vst [vmem:[%s2261_s28 + $0x40] sm:$0xff] %v1107_v1  ;;  %v1069_v24 = vmul.f32 %v2239_v47, %v1030_v42  ;;  %v788_v25 = vpop.xlane.xlu1 %787  ;;  %v662_v27 = vpop.xlane.xlu0 %661  ;;  %v1016_v42 = vsub.f32 %v2173_v9, %v2401_v16 }
 0x279   : > { %v1539_v33 = vpop.eup %1538  ;;  %v1084_v34 = vmul.f32 %v2239_v47, %v1045_v15  ;;  %v936_v23 = vadd.f32 1e-05, %v904_v18  ;;  %v951_v38 = vadd.f32 1e-05, %v919_v46  ;;  %v856_v35 = vmul.f32 0.0078125, %v788_v25 }
 0x27a   : > { %v1108_v40 = vadd.f32 %v2250_v41, %v1069_v24  ;;  %v1046_v54 = vmul.f32 %v1539_v33, %v1014_v3  ;;  %v2418_v56 = vmul.f32 0.0078125, %v662_v27 }
 0x27b   : > { %v1123_v62 = vadd.f32 %v2250_v41, %v1084_v34  ;;  %1542 = vrsqrt.f32 %v936_v23  ;;  %v920_v59 = vsub.f32 %v856_v35, %v888_v51 }
 0x27c   : > { %1140 = vst [vmem:[%s2261_s28 + $0x48] sm:$0xff] %v1108_v40  ;;  %v1085_v4 = vmul.f32 %v2239_v47, %v1046_v54  ;;  %1544 = vrsqrt.f32 %v951_v38  ;;  %v664_v48 = vpop.xlane.xlu1 %663  ;;  %v694_v50 = vpop.xlane.xlu0 %693  ;;  %v873_v13 = vmul.f32 %v2418_v56, %v2418_v56 }
 0x27d   : > { %1155 = vst [vmem:[%s2261_s28 + $0xc0] sm:$0xff] %v1123_v62  ;;  %v952_v53 = vadd.f32 1e-05, %v920_v59  ;;  %v2424_v10 = vmul.f32 0.0078125, %v664_v48  ;;  %v2428_v45 = vmul.f32 0.0078125, %v694_v50 }
 0x27e   : > { %v1124_v36 = vadd.f32 %v2250_v41, %v1085_v4  ;;  %v1001_v4 = vsub.f32 %v2185_v17, %v2418_v56 }
 0x27f   : > { %1546 = vrsqrt.f32 %v952_v53  ;;  %v874_v49 = vmul.f32 %v2424_v10, %v2424_v10  ;;  %v889_v14 = vmul.f32 %v2428_v45, %v2428_v45 }
 0x280   : > { %1156 = vst [vmem:[%s2261_s28 + $0xc8] sm:$0xff] %v1124_v36  ;;  %v696_v44 = vpop.xlane.xlu1 %695  ;;  %v758_v2 = vpop.xlane.xlu0 %757 }
 0x281   : > { %v1541_v60 = vpop.eup %1540  ;;  %v841_v30 = vmul.f32 0.0078125, %v758_v2  ;;  %v2437_v32 = vmul.f32 0.0078125, %v696_v44 }
 0x282   : > { %v1031_v11 = vmul.f32 %v1541_v60, %v999_v0 }
 0x283   : > { %v905_v12 = vsub.f32 %v841_v30, %v873_v13  ;;  %v890_v18 = vmul.f32 %v2437_v32, %v2437_v32  ;;  %v1002_v13 = vsub.f32 %v2192_v20, %v2424_v10 }
 0x284   : > { %v1070_v5 = vmul.f32 %v2239_v47, %v1031_v11  ;;  %v760_v22 = vpop.xlane.xlu1 %759  ;;  %v790_v58 = vpop.xlane.xlu0 %789  ;;  %v1017_v11 = vsub.f32 %v2189_v19, %v2428_v45  ;;  %v1018_v45 = vsub.f32 %v2197_v21, %v2437_v32 }
 0x285   : > { %v1543_v39 = vpop.eup %1542  ;;  %v937_v57 = vadd.f32 1e-05, %v905_v12  ;;  %v842_v6 = vmul.f32 0.0078125, %v760_v22  ;;  %v857_v61 = vmul.f32 0.0078125, %v790_v58 }
 0x286   : > { %v1545_v52 = vpop.eup %1544  ;;  %v1109_v7 = vadd.f32 %v2250_v41, %v1070_v5  ;;  %v1032_v43 = vmul.f32 %v1543_v39, %v1000_v8 }
 0x287   : > { %v1047_v55 = vmul.f32 %v1545_v52, %v1015_v63  ;;  %1548 = vrsqrt.f32 %v937_v57  ;;  %v906_v37 = vsub.f32 %v842_v6, %v874_v49  ;;  %v921_v1 = vsub.f32 %v857_v61, %v889_v14 }
 0x288   : > { %1141 = vst [vmem:[%s2261_s28 + $0x50] sm:$0xff] %v1109_v7  ;;  %v1071_v15 = vmul.f32 %v2239_v47, %v1032_v43  ;;  %v792_v46 = vpop.xlane.xlu1 %791  ;;  %v666_v3 = vpop.xlane.xlu0 %665 }
 0x289   : > { %v1547_v24 = vpop.eup %1546  ;;  %v1086_v51 = vmul.f32 %v2239_v47, %v1047_v55  ;;  %v938_v25 = vadd.f32 1e-05, %v906_v37  ;;  %v953_v27 = vadd.f32 1e-05, %v921_v1  ;;  %v858_v33 = vmul.f32 0.0078125, %v792_v46 }
 0x28a   : > { %v1110_v34 = vadd.f32 %v2250_v41, %v1071_v15  ;;  %v1048_v9 = vmul.f32 %v1547_v24, %v1016_v42  ;;  %v811_v62 = vmul.f32 0.0078125, %v666_v3 }
 0x28b   : > { %v1125_v16 = vadd.f32 %v2250_v41, %v1086_v51  ;;  %1550 = vrsqrt.f32 %v938_v25  ;;  %v922_v23 = vsub.f32 %v858_v33, %v890_v18 }
 0x28c   : > { %1142 = vst [vmem:[%s2261_s28 + $0x58] sm:$0xff] %v1110_v34  ;;  %v1087_v38 = vmul.f32 %v2239_v47, %v1048_v9  ;;  %1552 = vrsqrt.f32 %v953_v27  ;;  %v668_v35 = vpop.xlane.xlu1 %667  ;;  %v698_v40 = vpop.xlane.xlu0 %697  ;;  %v875_v0 = vmul.f32 %v811_v62, %v811_v62  ;;  %v1003_v51 = vsub.f32 %v2209_v26, %v811_v62 }
 0x28d   : > { %1157 = vst [vmem:[%s2261_s28 + $0xd0] sm:$0xff] %v1125_v16  ;;  %v954_v54 = vadd.f32 1e-05, %v922_v23  ;;  %v812_v48 = vmul.f32 0.0078125, %v668_v35  ;;  %v827_v44 = vmul.f32 0.0078125, %v698_v40 }
 0x28e   : > { %v1126_v59 = vadd.f32 %v2250_v41, %v1087_v38 }
 0x28f   : > { %1554 = vrsqrt.f32 %v954_v54  ;;  %v876_v12 = vmul.f32 %v812_v48, %v812_v48  ;;  %v891_v49 = vmul.f32 %v827_v44, %v827_v44  ;;  %v1004_v33 = vsub.f32 %v2216_v29, %v812_v48 }
 0x290   : > { %1158 = vst [vmem:[%s2261_s28 + $0xd8] sm:$0xff] %v1126_v59  ;;  %v700_v50 = vpop.xlane.xlu1 %699  ;;  %v762_v53 = vpop.xlane.xlu0 %761  ;;  %v1019_v16 = vsub.f32 %v2213_v28, %v827_v44 }
 0x291   : > { %v1549_v36 = vpop.eup %1548  ;;  %v843_v2 = vmul.f32 0.0078125, %v762_v53  ;;  %v828_v63 = vmul.f32 0.0078125, %v700_v50 }
 0x292   : > { %v1033_v60 = vmul.f32 %v1549_v36, %v1001_v4 }
 0x293   : > { %v907_v30 = vsub.f32 %v843_v2, %v875_v0  ;;  %v892_v52 = vmul.f32 %v828_v63, %v828_v63  ;;  %v1020_v26 = vsub.f32 %v2220_v31, %v828_v63 }
 0x294   : > { %v1072_v8 = vmul.f32 %v2239_v47, %v1033_v60  ;;  %v764_v17 = vpop.xlane.xlu1 %763  ;;  %v794_v56 = vpop.xlane.xlu0 %793 }
 0x295   : > { %v1551_v5 = vpop.eup %1550  ;;  %v939_v22 = vadd.f32 1e-05, %v907_v30  ;;  %v844_v58 = vmul.f32 0.0078125, %v764_v17  ;;  %v859_v39 = vmul.f32 0.0078125, %v794_v56 }
 0x296   : > { %v1553_v14 = vpop.eup %1552  ;;  %v1111_v57 = vadd.f32 %v2250_v41, %v1072_v8  ;;  %v1034_v20 = vmul.f32 %v1551_v5, %v1002_v13 }
 0x297   : > { %v1049_v10 = vmul.f32 %v1553_v14, %v1017_v11  ;;  %1556 = vrsqrt.f32 %v939_v22  ;;  %v908_v6 = vsub.f32 %v844_v58, %v876_v12  ;;  %v923_v19 = vsub.f32 %v859_v39, %v891_v49 }
 0x298   : > { %1143 = vst [vmem:[%s2261_s28 + $0x60] sm:$0xff] %v1111_v57  ;;  %v1073_v61 = vmul.f32 %v2239_v47, %v1034_v20  ;;  %v796_v7 = vpop.xlane.xlu1 %795 }
 0x299   : > { %v1555_v43 = vpop.eup %1554  ;;  %v1088_v55 = vmul.f32 %v2239_v47, %v1049_v10  ;;  %v940_v37 = vadd.f32 1e-05, %v908_v6  ;;  %v955_v1 = vadd.f32 1e-05, %v923_v19  ;;  %v860_v42 = vmul.f32 0.0078125, %v796_v7 }
 0x29a   : > { %v1112_v15 = vadd.f32 %v2250_v41, %v1073_v61  ;;  %v1050_v18 = vmul.f32 %v1555_v43, %v1018_v45 }
 0x29b   : > { %v1127_v46 = vadd.f32 %v2250_v41, %v1088_v55  ;;  %1558 = vrsqrt.f32 %v940_v37  ;;  %v924_v21 = vsub.f32 %v860_v42, %v892_v52 }
 0x29c   : > { %1144 = vst [vmem:[%s2261_s28 + $0x68] sm:$0xff] %v1112_v15  ;;  %v1089_v32 = vmul.f32 %v2239_v47, %v1050_v18  ;;  %1560 = vrsqrt.f32 %v955_v1 }
 0x29d   : > { %1159 = vst [vmem:[%s2261_s28 + $0xe0] sm:$0xff] %v1127_v46  ;;  %v956_v3 = vadd.f32 1e-05, %v924_v21 }
 0x29e   : > { %v1128_v24 = vadd.f32 %v2250_v41, %v1089_v32 }
 0x29f   : > { %1562 = vrsqrt.f32 %v956_v3 }
 0x2a0   : > { %1160 = vst [vmem:[%s2261_s28 + $0xe8] sm:$0xff] %v1128_v24 }
 0x2a1   : > { %v1557_v25 = vpop.eup %1556 }
 0x2a2   : > { %v1035_v27 = vmul.f32 %v1557_v25, %v1003_v51 }
 0x2a4   : > { %v1074_v34 = vmul.f32 %v2239_v47, %v1035_v27 }
 0x2a5   : > { %v1559_v9 = vpop.eup %1558 }
 0x2a6   : > { %v1561_v23 = vpop.eup %1560  ;;  %v1113_v38 = vadd.f32 %v2250_v41, %v1074_v34  ;;  %v1036_v35 = vmul.f32 %v1559_v9, %v1004_v33 }
 0x2a7   : > { %v1051_v40 = vmul.f32 %v1561_v23, %v1019_v16 }
 0x2a8   : > { %1145 = vst [vmem:[%s2261_s28 + $0x70] sm:$0xff] %v1113_v38  ;;  %v1075_v54 = vmul.f32 %v2239_v47, %v1036_v35 }
 0x2a9   : > { %v1563_v29 = vpop.eup %1562  ;;  %v1090_v62 = vmul.f32 %v2239_v47, %v1051_v40 }
 0x2aa   : > { %v1114_v59 = vadd.f32 %v2250_v41, %v1075_v54  ;;  %v1052_v4 = vmul.f32 %v1563_v29, %v1020_v26  ;;  %1170 = sbr.rel (!%p2575_p9) target bundleno = 717 (0x2cd), region = 52 }
 0x2ab   : > { %v1129_v28 = vadd.f32 %v2250_v41, %v1090_v62 }
 0x2ac   : > { %1146 = vst [vmem:[%s2261_s28 + $0x78] sm:$0xff] %v1114_v59  ;;  %v1091_v48 = vmul.f32 %v2239_v47, %v1052_v4 }
 0x2ad   : > { %1161 = vst [vmem:[%s2261_s28 + $0xf0] sm:$0xff] %v1129_v28 }
 0x2ae   : > { %v1130_v50 = vadd.f32 %v2250_v41, %v1091_v48 }
 0x2b0   : > { %1162 = vst [vmem:[%s2261_s28 + $0xf8] sm:$0xff] %v1130_v50 }
 0x2b1   : > { %s2584_s11 = smov (!%p1173_p10, %s1172_s11), 32 }
 0x2b2   : > { %s2496_s12 = sshll.u32 %s2584_s11, 7 }
 0x2b3   : > { %s1177_s14 = ssub.s32 4096, %s2496_s12 }
 0x2b4   : > { %1178 = vsyncadd %s1164_s23, %s1177_s14  ;;  %p1289_p1 = scmp.ne.s32.totalorder %s2496_s12, 0  ;;  %s1298_s30 = sshll.u32 %s1753_s22, 12 }
 0x2b5   : > { %s2506_s29 = scalar_lea.hbm %s2560_s5, %s1298_s30  ;;  %s1183_s7 = sshll.u32 %s2261_s28, 4  ;;  %s2509_s7 = int_to_ptr.vmem [resolvable:$true] %s1183_s7 }
 0x2b6   : > { %s1620_s10 = scalar_lea.vmem %s2509_s7, %s2496_s12  ;;  %s1699_s16 = smov [#allocation7]  }
 0x2b7   : > { %p1621_p4 = scmp.ne.s32.totalorder %s2509_s7, %s1620_s10  ;;  %s1624_s26 = sshll.u32 %s1699_s16, 4  ;;  %s1625_s26 = int_to_ptr.vmem [resolvable:$false] %s1624_s26 }
 0x2b8   : > { %s1626_s22 = scalar_lea.vmem %s1625_s26, 8192  ;;  %p1627_p12 = scmp.lt.s32.totalorder %s2509_s7, %s1625_s26 }
 0x2b9   : > { %p1622_p5 = pnand %p1621_p4, %p1289_p1  ;;  %p1628_p2 = scmp.lt.s32.totalorder %s1626_s22, %s1620_s10 }
 0x2bb   : > { %p1623_p11 = pneg %p1622_p5  ;;  %p1629_p3 = por %p1628_p2, %p1627_p12 }
 0x2bd   : > { %p1630_p13 = pnand %p1629_p3, %p1623_p11 }
 0x2bf   : > { %1633 = shalt.err (!%p1630_p13)
}
 0x2c0   : > { %s1634_s8 = scalar_lea.hbm %s2506_s29, %s2496_s12  ;;  %s1638_s25 = scalar_lea.hbm %s2560_s5, 8064 }
 0x2c1   : > { %p1635_p7 = scmp.ne.s32.totalorder %s2506_s29, %s1634_s8  ;;  %p1639_p9 = scmp.lt.u32.totalorder %s2506_s29, %s2560_s5 }
 0x2c2   : > { %p1640_p10 = scmp.lt.u32.totalorder %s1638_s25, %s1634_s8  ;;  %p1642_p5 = scmp.lt.u32.totalorder %s1634_s8, %s2506_s29 }
 0x2c3   : > { %p1636_p6 = pnand %p1635_p7, %p1289_p1 }
 0x2c4   : > { %p1641_p4 = por %p1640_p10, %p1639_p9 }
 0x2c5   : > { %p1637_p8 = pneg %p1636_p6 }
 0x2c6   : > { %p1643_p11 = por %p1642_p5, %p1641_p4 }
 0x2c8   : > { %p1644_p12 = pnand %p1643_p11, %p1637_p8 }
 0x2ca   : > { %1647 = shalt.err (!%p1644_p12)
}
 0x2cb   : > { %s1700_s30 = smov 128   ;;  %s1701_s15 = smov 8  }
 0x2cc   : > { %1189 = dma.vmem_to_hbm [thread:$0]  (%p1289_p1), %s2509_s7, %s2496_s12, %s2506_s29, %s1164_s23, %s1700_s30, %s1700_s30, %s1701_s15  }
 0x2cd PF: > { %s1198_s9 = sand.u32 1, %s1678_s18   ;;  %p2576_p2 = scmp.ne.s32.totalorder %s2567_s6, 0 }
 0x2ce   : > { %s1199_s10 = scalar_lea.sflag [#allocation4], %s1198_s9 }
 0x2cf   : > { %p1390_p3 = pnand %p1269_p0, %p2576_p2 }
 0x2d1   : > { %1673 = dma.done.wait (!%p1390_p3), %s1199_s10, 4096  }
 0x2d2   : > { %1675 = vsyncadd (!%p1390_p3), %s1199_s10, 4294963200  ;;  %p19_p13 = scmp.ge.s32.totalorder %s1757_s24, 4   ;;  %s2577_s18 = smov %s1682_s19 }
 0x2d3   : > { %s2578_s19 = smov %s1686_s20  ;;  %s2579_s20 = smov %s1769_s27 }
 0x2d4   : > { %s2580_s21 = smov %s1757_s24  ;;  %21 = sbr.rel (!%p19_p13) target bundleno = 6 (0x6), region = 89 }
 0x2db   :  { %1204 = vsyncpa [#allocation3], 1 }
 0x2dc   :  { %1206 = vsyncpa [#allocation3 + $0x1], 1 }
 0x2dd   :  { %1207 = vsyncpa [#allocation6], 1 }
 0x2de   :  { %1208 = vsyncpa [#allocation4], 1 }
 0x2df   :  { %1210 = vsyncpa [#allocation4 + $0x1], 1 }

</bundles_post_ra>
